<compile_context>
chip_gen: v7x
topology: tpu7x:2x2x1
jax: 0.10.0
libtpu: 0.0.40
codegen_flags: <defaults>
</compile_context>

<pallas_src>
import functools

import jax
import jax.numpy as jnp
from jax import lax
from jax.experimental import pallas as pl
from jax.experimental.pallas import tpu as pltpu

_KSIZE = 7
_PAD = (_KSIZE - 1) // 2            # 3
_TAPS = 2 * _KSIZE * _KSIZE         # 98 weights per gate (2 ZPool channels)
_BN_EPS = 1e-5

# Flat parameter layout handed to the kernels through SMEM:
#   [ w_hw (98) | w_cw (98) | w_hc^T (98) | b_hw, b_cw, b_hc ]
_W_HW_OFF = 0
_W_CW_OFF = _TAPS
_W_HC_OFF = 2 * _TAPS
_B_OFF = 3 * _TAPS
_NPARAMS = 3 * _TAPS + 3


# ----------------------------- in-kernel helpers -----------------------------

def _conv_bn_sigmoid(pmax, pmean, params_ref, work_ref, w_off, b_idx):
    """7x7 'same' conv (2 -> 1 ch, zero pad) + folded BN bias + sigmoid on one plane.

    pmax / pmean: (hm, wm) f32 ZPool planes (channel 0 = max, 1 = mean).
    The 7 lane(kj)-shifted copies of each zero-padded channel are written ONCE
    into `work_ref` (14 lane relayouts total), so the 98-tap accumulation below
    only needs cheap sublane-offset reads + FMAs.  Tap weights and the folded
    BN bias are read from the flat SMEM parameter table.
    """
    hm, wm = pmax.shape
    ph = hm + 2 * _PAD

    def _pad3(p):  # zero-pad by 3 on both axes (values only, stays in VMEM/vregs)
        zr = jnp.zeros((_PAD, wm), jnp.float32)
        p = jnp.concatenate([zr, p, zr], axis=0)
        zc = jnp.zeros((ph, _PAD), jnp.float32)
        return jnp.concatenate([zc, p, zc], axis=1)            # (ph, wm + 6)

    # Hoisted lane shifts: one relayout per (channel, kj) instead of per tap.
    for ch, plane in enumerate((_pad3(pmax), _pad3(pmean))):
        for kj in range(_KSIZE):
            work_ref[ch * _KSIZE + kj, :ph, :wm] = lax.slice(
                plane, (0, kj), (ph, kj + wm))

    def _ki_body(ki, acc):
        for ch in range(2):
            for kj in range(_KSIZE):
                wv = params_ref[w_off + ch * _KSIZE * _KSIZE + ki * _KSIZE + kj]
                acc = acc + wv * work_ref[ch * _KSIZE + kj, pl.ds(ki, hm), :wm]
        return acc

    acc = lax.fori_loop(0, _KSIZE, _ki_body, jnp.zeros((hm, wm), jnp.float32))
    y = acc + params_ref[b_idx]
    # sigmoid(y) == 0.5 * (tanh(0.5*y) + 1): a single EUP transcendental.
    return 0.5 * (jnp.tanh(0.5 * y) + 1.0)


# ------------------------------ pass 1: pool+gate -----------------------------

def _pool_gate_kernel(x_ref, params_ref, a_hw_ref, a_cw_ref, a_ch_ref,
                      hw_max, hw_sum, cw_max, cw_mean, ch_max, ch_mean, work,
                      *, C, no_spatial):
    # x_ref: (CB, H, W) channel chunk of one batch element (batch dim squeezed).
    k = pl.program_id(1)
    nk = pl.num_programs(1)
    CB, H, W = x_ref.shape
    xf = x_ref[...].astype(jnp.float32)          # per-chunk cast only (no full slab)

    # Running ZPool over C (for the a_hw gate), accumulated across chunks.
    if not no_spatial:
        @pl.when(k == 0)
        def _init_hw():
            hw_max[...] = jnp.full((H, W), -jnp.inf, jnp.float32)
            hw_sum[...] = jnp.zeros((H, W), jnp.float32)

        hw_max[...] = jnp.maximum(hw_max[...], jnp.max(xf, axis=0))
        hw_sum[...] = hw_sum[...] + jnp.sum(xf, axis=0)

    # Per-channel ZPool over H and over W for this chunk's channels.  The chunk
    # is resident in VMEM while the next chunk's HBM DMA is in flight, so these
    # block-wise reductions only cost VMEM reads (VMEM BW >> HBM BW).
    c0 = pl.multiple_of(k * CB, CB)
    cw_max[pl.ds(c0, CB), :] = jnp.max(xf, axis=1)                 # (CB, W)
    cw_mean[pl.ds(c0, CB), :] = jnp.sum(xf, axis=1) * (1.0 / H)    # (CB, W)
    ch_max[pl.ds(c0, CB), :] = jnp.max(xf, axis=2)                 # (CB, H)
    ch_mean[pl.ds(c0, CB), :] = jnp.sum(xf, axis=2) * (1.0 / W)    # (CB, H)

    # Finalize: run the three tiny 2->1 7x7 convs (+BN+sigmoid) once per batch
    # element, after the last channel chunk has been folded in.
    @pl.when(k == nk - 1)
    def _finalize():
        a_cw_ref[...] = _conv_bn_sigmoid(cw_max[...], cw_mean[...], params_ref,
                                         work, _W_CW_OFF, _B_OFF + 1)
        a_ch_ref[...] = _conv_bn_sigmoid(ch_max[...], ch_mean[...], params_ref,
                                         work, _W_HC_OFF, _B_OFF + 2)
        if no_spatial:
            a_hw_ref[...] = jnp.zeros_like(a_hw_ref)
        else:
            a_hw_ref[...] = _conv_bn_sigmoid(hw_max[...], hw_sum[...] * (1.0 / C),
                                             params_ref, work, _W_HW_OFF, _B_OFF)


# -------------------------------- pass 2: apply --------------------------------

def _apply_kernel(x_ref, a_hw_ref, a_cw_ref, a_ch_ref, o_ref, *, no_spatial):
    # x_ref / o_ref: (CB, H, W) channel chunk; a_hw: (H, W); a_cw: (C, W); a_ch: (C, H).
    k = pl.program_id(1)
    CB = x_ref.shape[0]
    c0 = pl.multiple_of(k * CB, CB)
    a_cw = a_cw_ref[pl.ds(c0, CB), :]                       # (CB, W)
    a_ch = a_ch_ref[pl.ds(c0, CB), :]                       # (CB, H)
    # Broadcasts happen exactly once per chunk (a_ch's lane-broadcast is the
    # only XLU-expensive one of the three).
    if no_spatial:
        attn = (a_cw[:, None, :] + a_ch[:, :, None]) * 0.5
    else:
        attn = (a_hw_ref[...][None, :, :] + a_cw[:, None, :]
                + a_ch[:, :, None]) * (1.0 / 3.0)
    o_ref[...] = (x_ref[...].astype(jnp.float32) * attn).astype(o_ref.dtype)


# --------------------------------- wrapper -------------------------------------

def _fold_bn_into_conv(w, gamma, beta, mean, var, eps=_BN_EPS):
    """Fold eval-mode BatchNorm2d(1) into the (1,2,7,7) conv -> ((2,7,7) w_eff, bias)."""
    s = gamma * lax.rsqrt(var + eps)
    return w[0].astype(jnp.float32) * s, (beta - mean * s).astype(jnp.float32)


def _vmem_limit_bytes():
    try:
        cap = pltpu.get_tpu_info().vmem_capacity_bytes or (64 << 20)
    except Exception:
        cap = 64 << 20
    # Leave headroom; caps lower automatically on 64-MiB-VMEM parts (v7x).
    return int(min(0.75 * cap, 96 * (1 << 20)))


def _largest_divisor(n, cap, prefer_multiple=8):
    """Largest divisor of n that is <= cap; prefer multiples of `prefer_multiple`."""
    cap = int(max(1, min(n, cap)))
    best, best_pref = 1, None
    for d in range(1, cap + 1):
        if n % d == 0:
            best = d
            if d % prefer_multiple == 0 or d == n:
                best_pref = d
    return best_pref if best_pref is not None else best


def triplet_attention_forward(x, params, no_spatial=False, *,
                              pool_chunk_bytes=4 << 20, apply_chunk_bytes=4 << 20):
    """x: (B, C, H, W).  params: 3 gate tuples (w[1,2,7,7], gamma, beta, mean, var)."""
    gate_hw, gate_cw, gate_hc = params
    B, C, H, W = x.shape

    w_cw, b_cw = _fold_bn_into_conv(*gate_cw)
    w_hc, b_hc = _fold_bn_into_conv(*gate_hc)
    # The hc gate runs in-kernel on the (C, H)-oriented plane (no in-kernel
    # transposes of pooled maps), so transpose its 7x7 taps here instead.
    w_hc = jnp.swapaxes(w_hc, -1, -2)
    if no_spatial:
        w_hw = jnp.zeros((2, _KSIZE, _KSIZE), jnp.float32)
        b_hw = jnp.zeros((), jnp.float32)
    else:
        w_hw, b_hw = _fold_bn_into_conv(*gate_hw)

    flat_params = jnp.concatenate(
        [w_hw.reshape(-1), w_cw.reshape(-1), w_hc.reshape(-1),
         jnp.stack([b_hw, b_cw, b_hc])]).astype(jnp.float32)
    assert flat_params.shape[0] == _NPARAMS

    plane_bytes = H * W * x.dtype.itemsize
    cb_pool = _largest_divisor(C, max(1, pool_chunk_bytes // max(plane_bytes, 1)))
    cb_apply = _largest_divisor(C, max(1, apply_chunk_bytes // max(plane_bytes, 1)))
    if B == 1 and C >= 2:
        # Give both v7x TensorCores work on the fully-parallel apply pass.
        cb_apply = min(cb_apply, _largest_divisor(C, C // 2))
    nc_pool, nc_apply = C // cb_pool, C // cb_apply
    vmem_limit = _vmem_limit_bytes()

    # ---- Pass 1: streamed ZPool + the three tiny gate convolutions ------------
    a_hw, a_cw, a_ch = pl.pallas_call(
        functools.partial(_pool_gate_kernel, C=C, no_spatial=no_spatial),
        out_shape=(jax.ShapeDtypeStruct((B, H, W), jnp.float32),
                   jax.ShapeDtypeStruct((B, C, W), jnp.float32),
                   jax.ShapeDtypeStruct((B, C, H), jnp.float32)),
        grid_spec=pltpu.PrefetchScalarGridSpec(
            num_scalar_prefetch=0,
            grid=(B, nc_pool),
            in_specs=[
                pl.BlockSpec((None, cb_pool, H, W), lambda b, k: (b, k, 0, 0)),
                # Tiny parameter table resident in SMEM.
                pl.BlockSpec(memory_space=pltpu.MemorySpace.SMEM),
            ],
            out_specs=(
                pl.BlockSpec((None, H, W), lambda b, k: (b, 0, 0)),
                pl.BlockSpec((None, C, W), lambda b, k: (b, 0, 0)),
                pl.BlockSpec((None, C, H), lambda b, k: (b, 0, 0)),
            ),
            scratch_shapes=[
                pltpu.VMEM((H, W), jnp.float32),   # running max over C
                pltpu.VMEM((H, W), jnp.float32),   # running sum over C
                pltpu.VMEM((C, W), jnp.float32),   # max over H
                pltpu.VMEM((C, W), jnp.float32),   # mean over H
                pltpu.VMEM((C, H), jnp.float32),   # max over W
                pltpu.VMEM((C, H), jnp.float32),   # mean over W
                # conv workspace: 14 lane-preshifted padded ZPool planes
                pltpu.VMEM((2 * _KSIZE, max(C, H) + 2 * _PAD, max(W, H)),
                           jnp.float32),
            ]),
        compiler_params=pltpu.CompilerParams(
            dimension_semantics=("parallel", "arbitrary"),
            vmem_limit_bytes=vmem_limit),
    )(x, flat_params)

    # ---- Pass 2: fused broadcast multiply-add, chunked & fully parallel -------
    out = pl.pallas_call(
        functools.partial(_apply_kernel, no_spatial=no_spatial),
        out_shape=jax.ShapeDtypeStruct((B, C, H, W), x.dtype),
        grid_spec=pltpu.PrefetchScalarGridSpec(
            num_scalar_prefetch=0,
            grid=(B, nc_apply),
            in_specs=[
                pl.BlockSpec((None, cb_apply, H, W), lambda b, k: (b, k, 0, 0)),
                pl.BlockSpec((None, H, W), lambda b, k: (b, 0, 0)),
                pl.BlockSpec((None, C, W), lambda b, k: (b, 0, 0)),
                pl.BlockSpec((None, C, H), lambda b, k: (b, 0, 0)),
            ],
            out_specs=pl.BlockSpec((None, cb_apply, H, W),
                                   lambda b, k: (b, k, 0, 0))),
        compiler_params=pltpu.CompilerParams(
            dimension_semantics=("parallel", "parallel"),
            vmem_limit_bytes=vmem_limit),
    )(x, a_hw, a_cw, a_ch)
    return out


# ----------------------------- pure-JAX reference ------------------------------

def _attention_gate_reference(t, w, gamma, beta, mean, var, eps=_BN_EPS):
    tf = t.astype(jnp.float32)
    zp = jnp.concatenate(
        [jnp.max(tf, axis=1, keepdims=True), jnp.mean(tf, axis=1, keepdims=True)],
        axis=1)
    conv = lax.conv_general_dilated(
        zp, w.astype(jnp.float32), window_strides=(1, 1),
        padding=((_PAD, _PAD), (_PAD, _PAD)),
        dimension_numbers=("NCHW", "OIHW", "NCHW"),
        precision=lax.Precision.HIGHEST)
    y = (conv - mean) * (gamma * lax.rsqrt(var + eps)) + beta
    return tf * jax.nn.sigmoid(y)


def triplet_attention_reference(x, params, no_spatial=False):
    gate_hw, gate_cw, gate_hc = params
    xp1 = jnp.transpose(x, (0, 2, 1, 3))
    o11 = jnp.transpose(_attention_gate_reference(xp1, *gate_cw), (0, 2, 1, 3))
    xp2 = jnp.transpose(x, (0, 3, 2, 1))
    o21 = jnp.transpose(_attention_gate_reference(xp2, *gate_hc), (0, 3, 2, 1))
    if no_spatial:
        out = (o11 + o21) * 0.5
    else:
        out = (_attention_gate_reference(x, *gate_hw) + o11 + o21) * (1.0 / 3.0)
    return out.astype(x.dtype)


def init_triplet_attention_params(key):
    def gate_params(k):
        kw, kg, kb, km, kv = jax.random.split(k, 5)
        w = 0.1 * jax.random.normal(kw, (1, 2, _KSIZE, _KSIZE), jnp.float32)
        gamma = 1.0 + 0.1 * jax.random.normal(kg, (), jnp.float32)
        beta = 0.1 * jax.random.normal(kb, (), jnp.float32)
        mean = 0.1 * jax.random.normal(km, (), jnp.float32)
        var = 1.0 + 0.2 * jax.random.uniform(kv, (), jnp.float32)
        return (w, gamma, beta, mean, var)

    k1, k2, k3 = jax.random.split(key, 3)
    return (gate_params(k1), gate_params(k2), gate_params(k3))


def _check(name, got, want, atol=3e-5, rtol=3e-5):
    assert got.shape == want.shape and got.dtype == want.dtype, name
    err = float(jnp.max(jnp.abs(got.astype(jnp.float32) - want.astype(jnp.float32))))
    assert jnp.allclose(got, want, atol=atol, rtol=rtol), f"{name}: max_err={err}"


if __name__ == "__main__":
    key = jax.random.PRNGKey(0)
    kx, kp = jax.random.split(key)
    params = init_triplet_attention_params(kp)

    # Primary example.
    x = jax.random.normal(kx, (2, 4, 16, 16), dtype=jnp.float32)
    out = jax.block_until_ready(triplet_attention_forward(x, params))
    _check("triplet", out, triplet_attention_reference(x, params))

    # Multi-chunk + B=1 path (exercises cross-chunk pooling accumulation and the
    # chunked, fully-parallel apply pass).
    x2 = jax.random.normal(jax.random.PRNGKey(1), (1, 8, 16, 16), dtype=jnp.float32)
    out2 = jax.block_until_ready(
        triplet_attention_forward(x2, params,
                                  pool_chunk_bytes=2 * 16 * 16 * 4,
                                  apply_chunk_bytes=2 * 16 * 16 * 4))
    _check("triplet_chunked", out2, triplet_attention_reference(x2, params))

    # no_spatial variant.
    out3 = jax.block_until_ready(
        triplet_attention_forward(x, params, no_spatial=True))
    _check("triplet_no_spatial", out3,
           triplet_attention_reference(x, params, no_spatial=True))

    print("KERNEL_OK")
</pallas_src>

<mosaic_0001>
module attributes {stable_mosaic.version = 11 : i64} {
  func.func @_pool_gate_kernel(%arg0: i32, %arg1: i32, %arg2: memref<1x4x16x16xf32, #tpu.memory_space<vmem>>, %arg3: memref<297xf32, #tpu.memory_space<smem>>, %arg4: memref<1x16x16xf32, #tpu.memory_space<vmem>>, %arg5: memref<1x4x16xf32, #tpu.memory_space<vmem>>, %arg6: memref<1x4x16xf32, #tpu.memory_space<vmem>>, %arg7: memref<16x16xf32, #tpu.memory_space<vmem>>, %arg8: memref<16x16xf32, #tpu.memory_space<vmem>>, %arg9: memref<4x16xf32, #tpu.memory_space<vmem>>, %arg10: memref<4x16xf32, #tpu.memory_space<vmem>>, %arg11: memref<4x16xf32, #tpu.memory_space<vmem>>, %arg12: memref<4x16xf32, #tpu.memory_space<vmem>>, %arg13: memref<14x22x16xf32, #tpu.memory_space<vmem>>) attributes {dimension_semantics = [#tpu.dimension_semantics<parallel>, #tpu.dimension_semantics<arbitrary>], iteration_bounds = array<i64: 2, 1>, scalar_prefetch = 0 : i64, scratch_operands = 7 : i64, tpu.core_type = #tpu.core_type<tc>, window_params = [{transform_indices = @transform_0, window_bounds = array<i64: 1, 4, 16, 16>}, {transform_indices = @transform_1, window_bounds = array<i64: 297>}, {transform_indices = @transform_2, window_bounds = array<i64: 1, 16, 16>}, {transform_indices = @transform_3, window_bounds = array<i64: 1, 4, 16>}, {transform_indices = @transform_4, window_bounds = array<i64: 1, 4, 16>}]} {
    %c0 = arith.constant 0 : index
    %c0_0 = arith.constant 0 : index
    %c0_1 = arith.constant 0 : index
    %c0_2 = arith.constant 0 : index
    %0 = vector.load %arg2[%c0, %c0_0, %c0_1, %c0_2] : memref<1x4x16x16xf32, #tpu.memory_space<vmem>>, vector<1x4x16x16xf32>
    %1 = vector.shape_cast %0 : vector<1x4x16x16xf32> to vector<4x16x16xf32>
    %c0_i32 = arith.constant 0 : i32
    %2 = arith.cmpi eq, %arg1, %c0_i32 : i32
    %3 = arith.extui %2 : i1 to i32
    %c0_i32_3 = arith.constant 0 : i32
    %4 = arith.cmpi ne, %3, %c0_i32_3 : i32
    scf.if %4 {
      %cst_25 = arith.constant 0xFF800000 : f32
      %34 = vector.broadcast %cst_25 : f32 to vector<16x16xf32>
      %c0_26 = arith.constant 0 : index
      %c0_27 = arith.constant 0 : index
      %35 = vector.load %arg7[%c0_26, %c0_27] : memref<16x16xf32, #tpu.memory_space<vmem>>, vector<16x16xf32>
      tpu.vector_store %arg7[%c0_26, %c0_27], %34 {strides = array<i32>} : memref<16x16xf32, #tpu.memory_space<vmem>>, vector<16x16xf32>,
      %cst_28 = arith.constant 0.000000e+00 : f32
      %36 = vector.broadcast %cst_28 : f32 to vector<16x16xf32>
      %c0_29 = arith.constant 0 : index
      %c0_30 = arith.constant 0 : index
      %37 = vector.load %arg8[%c0_29, %c0_30] : memref<16x16xf32, #tpu.memory_space<vmem>>, vector<16x16xf32>
      tpu.vector_store %arg8[%c0_29, %c0_30], %36 {strides = array<i32>} : memref<16x16xf32, #tpu.memory_space<vmem>>, vector<16x16xf32>,
    } else {
    }
    %c0_4 = arith.constant 0 : index
    %c0_5 = arith.constant 0 : index
    %5 = vector.load %arg7[%c0_4, %c0_5] : memref<16x16xf32, #tpu.memory_space<vmem>>, vector<16x16xf32>
    %cst = arith.constant dense<0xFF800000> : vector<16x16xf32>
    %6 = vector.multi_reduction <maximumf>, %1, %cst [0] : vector<4x16x16xf32> to vector<16x16xf32>
    %7 = arith.maximumf %5, %6 : vector<16x16xf32>
    %c0_6 = arith.constant 0 : index
    %c0_7 = arith.constant 0 : index
    %8 = vector.load %arg7[%c0_6, %c0_7] : memref<16x16xf32, #tpu.memory_space<vmem>>, vector<16x16xf32>
    tpu.vector_store %arg7[%c0_6, %c0_7], %7 {strides = array<i32>} : memref<16x16xf32, #tpu.memory_space<vmem>>, vector<16x16xf32>,
    %c0_8 = arith.constant 0 : index
    %c0_9 = arith.constant 0 : index
    %9 = vector.load %arg8[%c0_8, %c0_9] : memref<16x16xf32, #tpu.memory_space<vmem>>, vector<16x16xf32>
    %cst_10 = arith.constant dense<0.000000e+00> : vector<16x16xf32>
    %10 = vector.multi_reduction <add>, %1, %cst_10 [0] : vector<4x16x16xf32> to vector<16x16xf32>
    %11 = arith.addf %9, %10 : vector<16x16xf32>
    %c0_11 = arith.constant 0 : index
    %c0_12 = arith.constant 0 : index
    %12 = vector.load %arg8[%c0_11, %c0_12] : memref<16x16xf32, #tpu.memory_space<vmem>>, vector<16x16xf32>
    tpu.vector_store %arg8[%c0_11, %c0_12], %11 {strides = array<i32>} : memref<16x16xf32, #tpu.memory_space<vmem>>, vector<16x16xf32>,
    %c4_i32 = arith.constant 4 : i32
    %13 = arith.muli %arg1, %c4_i32 : i32
    %14 = tpu.assume_multiple %13, 4 : i32
    %cst_13 = arith.constant dense<0xFF800000> : vector<4x16xf32>
    %15 = vector.multi_reduction <maximumf>, %1, %cst_13 [1] : vector<4x16x16xf32> to vector<4x16xf32>
    %16 = arith.index_cast %14 : i32 to index
    %c0_14 = arith.constant 0 : index
    %17 = vector.load %arg9[%16, %c0_14] : memref<4x16xf32, #tpu.memory_space<vmem>>, vector<4x16xf32>
    tpu.vector_store %arg9[%16, %c0_14], %15 {strides = array<i32>} : memref<4x16xf32, #tpu.memory_space<vmem>>, vector<4x16xf32>,
    %cst_15 = arith.constant dense<0.000000e+00> : vector<4x16xf32>
    %18 = vector.multi_reduction <add>, %1, %cst_15 [1] : vector<4x16x16xf32> to vector<4x16xf32>
    %cst_16 = arith.constant 6.250000e-02 : f32
    %19 = vector.broadcast %cst_16 : f32 to vector<4x16xf32>
    %20 = arith.mulf %18, %19 : vector<4x16xf32>
    %21 = arith.index_cast %14 : i32 to index
    %c0_17 = arith.constant 0 : index
    %22 = vector.load %arg10[%21, %c0_17] : memref<4x16xf32, #tpu.memory_space<vmem>>, vector<4x16xf32>
    tpu.vector_store %arg10[%21, %c0_17], %20 {strides = array<i32>} : memref<4x16xf32, #tpu.memory_space<vmem>>, vector<4x16xf32>,
    %cst_18 = arith.constant dense<0xFF800000> : vector<4x16xf32>
    %23 = vector.multi_reduction <maximumf>, %1, %cst_18 [2] : vector<4x16x16xf32> to vector<4x16xf32>
    %24 = arith.index_cast %14 : i32 to index
    %c0_19 = arith.constant 0 : index
    %25 = vector.load %arg11[%24, %c0_19] : memref<4x16xf32, #tpu.memory_space<vmem>>, vector<4x16xf32>
    tpu.vector_store %arg11[%24, %c0_19], %23 {strides = array<i32>} : memref<4x16xf32, #tpu.memory_space<vmem>>, vector<4x16xf32>,
    %cst_20 = arith.constant dense<0.000000e+00> : vector<4x16xf32>
    %26 = vector.multi_reduction <add>, %1, %cst_20 [2] : vector<4x16x16xf32> to vector<4x16xf32>
    %cst_21 = arith.constant 6.250000e-02 : f32
    %27 = vector.broadcast %cst_21 : f32 to vector<4x16xf32>
    %28 = arith.mulf %26, %27 : vector<4x16xf32>
    %29 = arith.index_cast %14 : i32 to index
    %c0_22 = arith.constant 0 : index
    %30 = vector.load %arg12[%29, %c0_22] : memref<4x16xf32, #tpu.memory_space<vmem>>, vector<4x16xf32>
    tpu.vector_store %arg12[%29, %c0_22], %28 {strides = array<i32>} : memref<4x16xf32, #tpu.memory_space<vmem>>, vector<4x16xf32>,
    %c0_i32_23 = arith.constant 0 : i32
    %31 = arith.cmpi eq, %arg1, %c0_i32_23 : i32
    %32 = arith.extui %31 : i1 to i32
    %c0_i32_24 = arith.constant 0 : i32
    %33 = arith.cmpi ne, %32, %c0_i32_24 : i32
    scf.if %33 {
      %c0_25 = arith.constant 0 : index
      %c0_26 = arith.constant 0 : index
      %34 = vector.load %arg9[%c0_25, %c0_26] : memref<4x16xf32, #tpu.memory_space<vmem>>, vector<4x16xf32>
      %c0_27 = arith.constant 0 : index
      %c0_28 = arith.constant 0 : index
      %35 = vector.load %arg10[%c0_27, %c0_28] : memref<4x16xf32, #tpu.memory_space<vmem>>, vector<4x16xf32>
      %cst_29 = arith.constant 0.000000e+00 : f32
      %36 = vector.broadcast %cst_29 : f32 to vector<3x16xf32>
      %37 = tpu.concatenate %36, %34, %36 in 0 : vector<3x16xf32>, vector<4x16xf32>, vector<3x16xf32> -> vector<10x16xf32>
      %cst_30 = arith.constant 0.000000e+00 : f32
      %38 = vector.broadcast %cst_30 : f32 to vector<10x3xf32>
      %39 = tpu.concatenate %38, %37, %38 in 1 : vector<10x3xf32>, vector<10x16xf32>, vector<10x3xf32> -> vector<10x22xf32>
      %cst_31 = arith.constant 0.000000e+00 : f32
      %40 = vector.broadcast %cst_31 : f32 to vector<3x16xf32>
      %41 = tpu.concatenate %40, %35, %40 in 0 : vector<3x16xf32>, vector<4x16xf32>, vector<3x16xf32> -> vector<10x16xf32>
      %cst_32 = arith.constant 0.000000e+00 : f32
      %42 = vector.broadcast %cst_32 : f32 to vector<10x3xf32>
      %43 = tpu.concatenate %42, %41, %42 in 1 : vector<10x3xf32>, vector<10x16xf32>, vector<10x3xf32> -> vector<10x22xf32>
      %44 = vector.extract_strided_slice %39 {offsets = [0, 0], sizes = [10, 16], strides = [1, 1]} : vector<10x22xf32> to vector<10x16xf32>
      %c0_33 = arith.constant 0 : index
      %c0_34 = arith.constant 0 : index
      %c0_35 = arith.constant 0 : index
      %45 = vector.load %arg13[%c0_33, %c0_34, %c0_35] : memref<14x22x16xf32, #tpu.memory_space<vmem>>, vector<1x10x16xf32>
      %46 = vector.shape_cast %45 : vector<1x10x16xf32> to vector<10x16xf32>
      %47 = vector.shape_cast %44 : vector<10x16xf32> to vector<1x10x16xf32>
      tpu.vector_store %arg13[%c0_33, %c0_34, %c0_35], %47 {strides = array<i32>} : memref<14x22x16xf32, #tpu.memory_space<vmem>>, vector<1x10x16xf32>,
      %48 = vector.extract_strided_slice %39 {offsets = [0, 1], sizes = [10, 16], strides = [1, 1]} : vector<10x22xf32> to vector<10x16xf32>
      %c1 = arith.constant 1 : index
      %c0_36 = arith.constant 0 : index
      %c0_37 = arith.constant 0 : index
      %49 = vector.load %arg13[%c1, %c0_36, %c0_37] : memref<14x22x16xf32, #tpu.memory_space<vmem>>, vector<1x10x16xf32>
      %50 = vector.shape_cast %49 : vector<1x10x16xf32> to vector<10x16xf32>
      %51 = vector.shape_cast %48 : vector<10x16xf32> to vector<1x10x16xf32>
      tpu.vector_store %arg13[%c1, %c0_36, %c0_37], %51 {strides = array<i32>} : memref<14x22x16xf32, #tpu.memory_space<vmem>>, vector<1x10x16xf32>,
      %52 = vector.extract_strided_slice %39 {offsets = [0, 2], sizes = [10, 16], strides = [1, 1]} : vector<10x22xf32> to vector<10x16xf32>
      %c2 = arith.constant 2 : index
      %c0_38 = arith.constant 0 : index
      %c0_39 = arith.constant 0 : index
      %53 = vector.load %arg13[%c2, %c0_38, %c0_39] : memref<14x22x16xf32, #tpu.memory_space<vmem>>, vector<1x10x16xf32>
      %54 = vector.shape_cast %53 : vector<1x10x16xf32> to vector<10x16xf32>
      %55 = vector.shape_cast %52 : vector<10x16xf32> to vector<1x10x16xf32>
      tpu.vector_store %arg13[%c2, %c0_38, %c0_39], %55 {strides = array<i32>} : memref<14x22x16xf32, #tpu.memory_space<vmem>>, vector<1x10x16xf32>,
      %56 = vector.extract_strided_slice %39 {offsets = [0, 3], sizes = [10, 16], strides = [1, 1]} : vector<10x22xf32> to vector<10x16xf32>
      %c3 = arith.constant 3 : index
      %c0_40 = arith.constant 0 : index
      %c0_41 = arith.constant 0 : index
      %57 = vector.load %arg13[%c3, %c0_40, %c0_41] : memref<14x22x16xf32, #tpu.memory_space<vmem>>, vector<1x10x16xf32>
      %58 = vector.shape_cast %57 : vector<1x10x16xf32> to vector<10x16xf32>
      %59 = vector.shape_cast %56 : vector<10x16xf32> to vector<1x10x16xf32>
      tpu.vector_store %arg13[%c3, %c0_40, %c0_41], %59 {strides = array<i32>} : memref<14x22x16xf32, #tpu.memory_space<vmem>>, vector<1x10x16xf32>,
      %60 = vector.extract_strided_slice %39 {offsets = [0, 4], sizes = [10, 16], strides = [1, 1]} : vector<10x22xf32> to vector<10x16xf32>
      %c4 = arith.constant 4 : index
      %c0_42 = arith.constant 0 : index
      %c0_43 = arith.constant 0 : index
      %61 = vector.load %arg13[%c4, %c0_42, %c0_43] : memref<14x22x16xf32, #tpu.memory_space<vmem>>, vector<1x10x16xf32>
      %62 = vector.shape_cast %61 : vector<1x10x16xf32> to vector<10x16xf32>
      %63 = vector.shape_cast %60 : vector<10x16xf32> to vector<1x10x16xf32>
      tpu.vector_store %arg13[%c4, %c0_42, %c0_43], %63 {strides = array<i32>} : memref<14x22x16xf32, #tpu.memory_space<vmem>>, vector<1x10x16xf32>,
      %64 = vector.extract_strided_slice %39 {offsets = [0, 5], sizes = [10, 16], strides = [1, 1]} : vector<10x22xf32> to vector<10x16xf32>
      %c5 = arith.constant 5 : index
      %c0_44 = arith.constant 0 : index
      %c0_45 = arith.constant 0 : index
      %65 = vector.load %arg13[%c5, %c0_44, %c0_45] : memref<14x22x16xf32, #tpu.memory_space<vmem>>, vector<1x10x16xf32>
      %66 = vector.shape_cast %65 : vector<1x10x16xf32> to vector<10x16xf32>
      %67 = vector.shape_cast %64 : vector<10x16xf32> to vector<1x10x16xf32>
      tpu.vector_store %arg13[%c5, %c0_44, %c0_45], %67 {strides = array<i32>} : memref<14x22x16xf32, #tpu.memory_space<vmem>>, vector<1x10x16xf32>,
      %68 = vector.extract_strided_slice %39 {offsets = [0, 6], sizes = [10, 16], strides = [1, 1]} : vector<10x22xf32> to vector<10x16xf32>
      %c6 = arith.constant 6 : index
      %c0_46 = arith.constant 0 : index
      %c0_47 = arith.constant 0 : index
      %69 = vector.load %arg13[%c6, %c0_46, %c0_47] : memref<14x22x16xf32, #tpu.memory_space<vmem>>, vector<1x10x16xf32>
      %70 = vector.shape_cast %69 : vector<1x10x16xf32> to vector<10x16xf32>
      %71 = vector.shape_cast %68 : vector<10x16xf32> to vector<1x10x16xf32>
      tpu.vector_store %arg13[%c6, %c0_46, %c0_47], %71 {strides = array<i32>} : memref<14x22x16xf32, #tpu.memory_space<vmem>>, vector<1x10x16xf32>,
      %72 = vector.extract_strided_slice %43 {offsets = [0, 0], sizes = [10, 16], strides = [1, 1]} : vector<10x22xf32> to vector<10x16xf32>
      %c7 = arith.constant 7 : index
      %c0_48 = arith.constant 0 : index
      %c0_49 = arith.constant 0 : index
      %73 = vector.load %arg13[%c7, %c0_48, %c0_49] : memref<14x22x16xf32, #tpu.memory_space<vmem>>, vector<1x10x16xf32>
      %74 = vector.shape_cast %73 : vector<1x10x16xf32> to vector<10x16xf32>
      %75 = vector.shape_cast %72 : vector<10x16xf32> to vector<1x10x16xf32>
      tpu.vector_store %arg13[%c7, %c0_48, %c0_49], %75 {strides = array<i32>} : memref<14x22x16xf32, #tpu.memory_space<vmem>>, vector<1x10x16xf32>,
      %76 = vector.extract_strided_slice %43 {offsets = [0, 1], sizes = [10, 16], strides = [1, 1]} : vector<10x22xf32> to vector<10x16xf32>
      %c8 = arith.constant 8 : index
      %c0_50 = arith.constant 0 : index
      %c0_51 = arith.constant 0 : index
      %77 = vector.load %arg13[%c8, %c0_50, %c0_51] : memref<14x22x16xf32, #tpu.memory_space<vmem>>, vector<1x10x16xf32>
      %78 = vector.shape_cast %77 : vector<1x10x16xf32> to vector<10x16xf32>
      %79 = vector.shape_cast %76 : vector<10x16xf32> to vector<1x10x16xf32>
      tpu.vector_store %arg13[%c8, %c0_50, %c0_51], %79 {strides = array<i32>} : memref<14x22x16xf32, #tpu.memory_space<vmem>>, vector<1x10x16xf32>,
      %80 = vector.extract_strided_slice %43 {offsets = [0, 2], sizes = [10, 16], strides = [1, 1]} : vector<10x22xf32> to vector<10x16xf32>
      %c9 = arith.constant 9 : index
      %c0_52 = arith.constant 0 : index
      %c0_53 = arith.constant 0 : index
      %81 = vector.load %arg13[%c9, %c0_52, %c0_53] : memref<14x22x16xf32, #tpu.memory_space<vmem>>, vector<1x10x16xf32>
      %82 = vector.shape_cast %81 : vector<1x10x16xf32> to vector<10x16xf32>
      %83 = vector.shape_cast %80 : vector<10x16xf32> to vector<1x10x16xf32>
      tpu.vector_store %arg13[%c9, %c0_52, %c0_53], %83 {strides = array<i32>} : memref<14x22x16xf32, #tpu.memory_space<vmem>>, vector<1x10x16xf32>,
      %84 = vector.extract_strided_slice %43 {offsets = [0, 3], sizes = [10, 16], strides = [1, 1]} : vector<10x22xf32> to vector<10x16xf32>
      %c10 = arith.constant 10 : index
      %c0_54 = arith.constant 0 : index
      %c0_55 = arith.constant 0 : index
      %85 = vector.load %arg13[%c10, %c0_54, %c0_55] : memref<14x22x16xf32, #tpu.memory_space<vmem>>, vector<1x10x16xf32>
      %86 = vector.shape_cast %85 : vector<1x10x16xf32> to vector<10x16xf32>
      %87 = vector.shape_cast %84 : vector<10x16xf32> to vector<1x10x16xf32>
      tpu.vector_store %arg13[%c10, %c0_54, %c0_55], %87 {strides = array<i32>} : memref<14x22x16xf32, #tpu.memory_space<vmem>>, vector<1x10x16xf32>,
      %88 = vector.extract_strided_slice %43 {offsets = [0, 4], sizes = [10, 16], strides = [1, 1]} : vector<10x22xf32> to vector<10x16xf32>
      %c11 = arith.constant 11 : index
      %c0_56 = arith.constant 0 : index
      %c0_57 = arith.constant 0 : index
      %89 = vector.load %arg13[%c11, %c0_56, %c0_57] : memref<14x22x16xf32, #tpu.memory_space<vmem>>, vector<1x10x16xf32>
      %90 = vector.shape_cast %89 : vector<1x10x16xf32> to vector<10x16xf32>
      %91 = vector.shape_cast %88 : vector<10x16xf32> to vector<1x10x16xf32>
      tpu.vector_store %arg13[%c11, %c0_56, %c0_57], %91 {strides = array<i32>} : memref<14x22x16xf32, #tpu.memory_space<vmem>>, vector<1x10x16xf32>,
      %92 = vector.extract_strided_slice %43 {offsets = [0, 5], sizes = [10, 16], strides = [1, 1]} : vector<10x22xf32> to vector<10x16xf32>
      %c12 = arith.constant 12 : index
      %c0_58 = arith.constant 0 : index
      %c0_59 = arith.constant 0 : index
      %93 = vector.load %arg13[%c12, %c0_58, %c0_59] : memref<14x22x16xf32, #tpu.memory_space<vmem>>, vector<1x10x16xf32>
      %94 = vector.shape_cast %93 : vector<1x10x16xf32> to vector<10x16xf32>
      %95 = vector.shape_cast %92 : vector<10x16xf32> to vector<1x10x16xf32>
      tpu.vector_store %arg13[%c12, %c0_58, %c0_59], %95 {strides = array<i32>} : memref<14x22x16xf32, #tpu.memory_space<vmem>>, vector<1x10x16xf32>,
      %96 = vector.extract_strided_slice %43 {offsets = [0, 6], sizes = [10, 16], strides = [1, 1]} : vector<10x22xf32> to vector<10x16xf32>
      %c13 = arith.constant 13 : index
      %c0_60 = arith.constant 0 : index
      %c0_61 = arith.constant 0 : index
      %97 = vector.load %arg13[%c13, %c0_60, %c0_61] : memref<14x22x16xf32, #tpu.memory_space<vmem>>, vector<1x10x16xf32>
      %98 = vector.shape_cast %97 : vector<1x10x16xf32> to vector<10x16xf32>
      %99 = vector.shape_cast %96 : vector<10x16xf32> to vector<1x10x16xf32>
      tpu.vector_store %arg13[%c13, %c0_60, %c0_61], %99 {strides = array<i32>} : memref<14x22x16xf32, #tpu.memory_space<vmem>>, vector<1x10x16xf32>,
      %cst_62 = arith.constant 0.000000e+00 : f32
      %100 = vector.broadcast %cst_62 : f32 to vector<4x16xf32>
      %c0_i32_63 = arith.constant 0 : i32
      %c7_i32 = arith.constant 7 : i32
      %101 = arith.addi %c0_i32_63, %c7_i32 : i32
      %c1_i32 = arith.constant 1 : i32
      %102 = scf.for %arg14 = %c0_i32_63 to %101 step %c1_i32 iter_args(%arg15 = %100) -> (vector<4x16xf32>)  : i32 {
        %c7_i32_194 = arith.constant 7 : i32
        %282 = arith.muli %arg14, %c7_i32_194 : i32
        %c98_i32 = arith.constant 98 : i32
        %283 = arith.addi %c98_i32, %282 : i32
        %c0_i32_195 = arith.constant 0 : i32
        %284 = arith.addi %283, %c0_i32_195 : i32
        %285 = arith.index_cast %284 : i32 to index
        %286 = memref.load %arg3[%285] : memref<297xf32, #tpu.memory_space<smem>>
        %c0_196 = arith.constant 0 : index
        %287 = arith.index_cast %arg14 : i32 to index
        %c0_197 = arith.constant 0 : index
        %288 = vector.load %arg13[%c0_196, %287, %c0_197] : memref<14x22x16xf32, #tpu.memory_space<vmem>>, vector<1x4x16xf32>
        %289 = vector.shape_cast %288 : vector<1x4x16xf32> to vector<4x16xf32>
        %290 = vector.broadcast %286 : f32 to vector<4x16xf32>
        %291 = arith.mulf %290, %289 : vector<4x16xf32>
        %292 = arith.addf %arg15, %291 : vector<4x16xf32>
        %c7_i32_198 = arith.constant 7 : i32
        %293 = arith.muli %arg14, %c7_i32_198 : i32
        %c98_i32_199 = arith.constant 98 : i32
        %294 = arith.addi %c98_i32_199, %293 : i32
        %c1_i32_200 = arith.constant 1 : i32
        %295 = arith.addi %294, %c1_i32_200 : i32
        %296 = arith.index_cast %295 : i32 to index
        %297 = memref.load %arg3[%296] : memref<297xf32, #tpu.memory_space<smem>>
        %c1_201 = arith.constant 1 : index
        %298 = arith.index_cast %arg14 : i32 to index
        %c0_202 = arith.constant 0 : index
        %299 = vector.load %arg13[%c1_201, %298, %c0_202] : memref<14x22x16xf32, #tpu.memory_space<vmem>>, vector<1x4x16xf32>
        %300 = vector.shape_cast %299 : vector<1x4x16xf32> to vector<4x16xf32>
        %301 = vector.broadcast %297 : f32 to vector<4x16xf32>
        %302 = arith.mulf %301, %300 : vector<4x16xf32>
        %303 = arith.addf %292, %302 : vector<4x16xf32>
        %c7_i32_203 = arith.constant 7 : i32
        %304 = arith.muli %arg14, %c7_i32_203 : i32
        %c98_i32_204 = arith.constant 98 : i32
        %305 = arith.addi %c98_i32_204, %304 : i32
        %c2_i32 = arith.constant 2 : i32
        %306 = arith.addi %305, %c2_i32 : i32
        %307 = arith.index_cast %306 : i32 to index
        %308 = memref.load %arg3[%307] : memref<297xf32, #tpu.memory_space<smem>>
        %c2_205 = arith.constant 2 : index
        %309 = arith.index_cast %arg14 : i32 to index
        %c0_206 = arith.constant 0 : index
        %310 = vector.load %arg13[%c2_205, %309, %c0_206] : memref<14x22x16xf32, #tpu.memory_space<vmem>>, vector<1x4x16xf32>
        %311 = vector.shape_cast %310 : vector<1x4x16xf32> to vector<4x16xf32>
        %312 = vector.broadcast %308 : f32 to vector<4x16xf32>
        %313 = arith.mulf %312, %311 : vector<4x16xf32>
        %314 = arith.addf %303, %313 : vector<4x16xf32>
        %c7_i32_207 = arith.constant 7 : i32
        %315 = arith.muli %arg14, %c7_i32_207 : i32
        %c98_i32_208 = arith.constant 98 : i32
        %316 = arith.addi %c98_i32_208, %315 : i32
        %c3_i32 = arith.constant 3 : i32
        %317 = arith.addi %316, %c3_i32 : i32
        %318 = arith.index_cast %317 : i32 to index
        %319 = memref.load %arg3[%318] : memref<297xf32, #tpu.memory_space<smem>>
        %c3_209 = arith.constant 3 : index
        %320 = arith.index_cast %arg14 : i32 to index
        %c0_210 = arith.constant 0 : index
        %321 = vector.load %arg13[%c3_209, %320, %c0_210] : memref<14x22x16xf32, #tpu.memory_space<vmem>>, vector<1x4x16xf32>
        %322 = vector.shape_cast %321 : vector<1x4x16xf32> to vector<4x16xf32>
        %323 = vector.broadcast %319 : f32 to vector<4x16xf32>
        %324 = arith.mulf %323, %322 : vector<4x16xf32>
        %325 = arith.addf %314, %324 : vector<4x16xf32>
        %c7_i32_211 = arith.constant 7 : i32
        %326 = arith.muli %arg14, %c7_i32_211 : i32
        %c98_i32_212 = arith.constant 98 : i32
        %327 = arith.addi %c98_i32_212, %326 : i32
        %c4_i32_213 = arith.constant 4 : i32
        %328 = arith.addi %327, %c4_i32_213 : i32
        %329 = arith.index_cast %328 : i32 to index
        %330 = memref.load %arg3[%329] : memref<297xf32, #tpu.memory_space<smem>>
        %c4_214 = arith.constant 4 : index
        %331 = arith.index_cast %arg14 : i32 to index
        %c0_215 = arith.constant 0 : index
        %332 = vector.load %arg13[%c4_214, %331, %c0_215] : memref<14x22x16xf32, #tpu.memory_space<vmem>>, vector<1x4x16xf32>
        %333 = vector.shape_cast %332 : vector<1x4x16xf32> to vector<4x16xf32>
        %334 = vector.broadcast %330 : f32 to vector<4x16xf32>
        %335 = arith.mulf %334, %333 : vector<4x16xf32>
        %336 = arith.addf %325, %335 : vector<4x16xf32>
        %c7_i32_216 = arith.constant 7 : i32
        %337 = arith.muli %arg14, %c7_i32_216 : i32
        %c98_i32_217 = arith.constant 98 : i32
        %338 = arith.addi %c98_i32_217, %337 : i32
        %c5_i32 = arith.constant 5 : i32
        %339 = arith.addi %338, %c5_i32 : i32
        %340 = arith.index_cast %339 : i32 to index
        %341 = memref.load %arg3[%340] : memref<297xf32, #tpu.memory_space<smem>>
        %c5_218 = arith.constant 5 : index
        %342 = arith.index_cast %arg14 : i32 to index
        %c0_219 = arith.constant 0 : index
        %343 = vector.load %arg13[%c5_218, %342, %c0_219] : memref<14x22x16xf32, #tpu.memory_space<vmem>>, vector<1x4x16xf32>
        %344 = vector.shape_cast %343 : vector<1x4x16xf32> to vector<4x16xf32>
        %345 = vector.broadcast %341 : f32 to vector<4x16xf32>
        %346 = arith.mulf %345, %344 : vector<4x16xf32>
        %347 = arith.addf %336, %346 : vector<4x16xf32>
        %c7_i32_220 = arith.constant 7 : i32
        %348 = arith.muli %arg14, %c7_i32_220 : i32
        %c98_i32_221 = arith.constant 98 : i32
        %349 = arith.addi %c98_i32_221, %348 : i32
        %c6_i32 = arith.constant 6 : i32
        %350 = arith.addi %349, %c6_i32 : i32
        %351 = arith.index_cast %350 : i32 to index
        %352 = memref.load %arg3[%351] : memref<297xf32, #tpu.memory_space<smem>>
        %c6_222 = arith.constant 6 : index
        %353 = arith.index_cast %arg14 : i32 to index
        %c0_223 = arith.constant 0 : index
        %354 = vector.load %arg13[%c6_222, %353, %c0_223] : memref<14x22x16xf32, #tpu.memory_space<vmem>>, vector<1x4x16xf32>
        %355 = vector.shape_cast %354 : vector<1x4x16xf32> to vector<4x16xf32>
        %356 = vector.broadcast %352 : f32 to vector<4x16xf32>
        %357 = arith.mulf %356, %355 : vector<4x16xf32>
        %358 = arith.addf %347, %357 : vector<4x16xf32>
        %c7_i32_224 = arith.constant 7 : i32
        %359 = arith.muli %arg14, %c7_i32_224 : i32
        %c147_i32 = arith.constant 147 : i32
        %360 = arith.addi %c147_i32, %359 : i32
        %c0_i32_225 = arith.constant 0 : i32
        %361 = arith.addi %360, %c0_i32_225 : i32
        %362 = arith.index_cast %361 : i32 to index
        %363 = memref.load %arg3[%362] : memref<297xf32, #tpu.memory_space<smem>>
        %c7_226 = arith.constant 7 : index
        %364 = arith.index_cast %arg14 : i32 to index
        %c0_227 = arith.constant 0 : index
        %365 = vector.load %arg13[%c7_226, %364, %c0_227] : memref<14x22x16xf32, #tpu.memory_space<vmem>>, vector<1x4x16xf32>
        %366 = vector.shape_cast %365 : vector<1x4x16xf32> to vector<4x16xf32>
        %367 = vector.broadcast %363 : f32 to vector<4x16xf32>
        %368 = arith.mulf %367, %366 : vector<4x16xf32>
        %369 = arith.addf %358, %368 : vector<4x16xf32>
        %c7_i32_228 = arith.constant 7 : i32
        %370 = arith.muli %arg14, %c7_i32_228 : i32
        %c147_i32_229 = arith.constant 147 : i32
        %371 = arith.addi %c147_i32_229, %370 : i32
        %c1_i32_230 = arith.constant 1 : i32
        %372 = arith.addi %371, %c1_i32_230 : i32
        %373 = arith.index_cast %372 : i32 to index
        %374 = memref.load %arg3[%373] : memref<297xf32, #tpu.memory_space<smem>>
        %c8_231 = arith.constant 8 : index
        %375 = arith.index_cast %arg14 : i32 to index
        %c0_232 = arith.constant 0 : index
        %376 = vector.load %arg13[%c8_231, %375, %c0_232] : memref<14x22x16xf32, #tpu.memory_space<vmem>>, vector<1x4x16xf32>
        %377 = vector.shape_cast %376 : vector<1x4x16xf32> to vector<4x16xf32>
        %378 = vector.broadcast %374 : f32 to vector<4x16xf32>
        %379 = arith.mulf %378, %377 : vector<4x16xf32>
        %380 = arith.addf %369, %379 : vector<4x16xf32>
        %c7_i32_233 = arith.constant 7 : i32
        %381 = arith.muli %arg14, %c7_i32_233 : i32
        %c147_i32_234 = arith.constant 147 : i32
        %382 = arith.addi %c147_i32_234, %381 : i32
        %c2_i32_235 = arith.constant 2 : i32
        %383 = arith.addi %382, %c2_i32_235 : i32
        %384 = arith.index_cast %383 : i32 to index
        %385 = memref.load %arg3[%384] : memref<297xf32, #tpu.memory_space<smem>>
        %c9_236 = arith.constant 9 : index
        %386 = arith.index_cast %arg14 : i32 to index
        %c0_237 = arith.constant 0 : index
        %387 = vector.load %arg13[%c9_236, %386, %c0_237] : memref<14x22x16xf32, #tpu.memory_space<vmem>>, vector<1x4x16xf32>
        %388 = vector.shape_cast %387 : vector<1x4x16xf32> to vector<4x16xf32>
        %389 = vector.broadcast %385 : f32 to vector<4x16xf32>
        %390 = arith.mulf %389, %388 : vector<4x16xf32>
        %391 = arith.addf %380, %390 : vector<4x16xf32>
        %c7_i32_238 = arith.constant 7 : i32
        %392 = arith.muli %arg14, %c7_i32_238 : i32
        %c147_i32_239 = arith.constant 147 : i32
        %393 = arith.addi %c147_i32_239, %392 : i32
        %c3_i32_240 = arith.constant 3 : i32
        %394 = arith.addi %393, %c3_i32_240 : i32
        %395 = arith.index_cast %394 : i32 to index
        %396 = memref.load %arg3[%395] : memref<297xf32, #tpu.memory_space<smem>>
        %c10_241 = arith.constant 10 : index
        %397 = arith.index_cast %arg14 : i32 to index
        %c0_242 = arith.constant 0 : index
        %398 = vector.load %arg13[%c10_241, %397, %c0_242] : memref<14x22x16xf32, #tpu.memory_space<vmem>>, vector<1x4x16xf32>
        %399 = vector.shape_cast %398 : vector<1x4x16xf32> to vector<4x16xf32>
        %400 = vector.broadcast %396 : f32 to vector<4x16xf32>
        %401 = arith.mulf %400, %399 : vector<4x16xf32>
        %402 = arith.addf %391, %401 : vector<4x16xf32>
        %c7_i32_243 = arith.constant 7 : i32
        %403 = arith.muli %arg14, %c7_i32_243 : i32
        %c147_i32_244 = arith.constant 147 : i32
        %404 = arith.addi %c147_i32_244, %403 : i32
        %c4_i32_245 = arith.constant 4 : i32
        %405 = arith.addi %404, %c4_i32_245 : i32
        %406 = arith.index_cast %405 : i32 to index
        %407 = memref.load %arg3[%406] : memref<297xf32, #tpu.memory_space<smem>>
        %c11_246 = arith.constant 11 : index
        %408 = arith.index_cast %arg14 : i32 to index
        %c0_247 = arith.constant 0 : index
        %409 = vector.load %arg13[%c11_246, %408, %c0_247] : memref<14x22x16xf32, #tpu.memory_space<vmem>>, vector<1x4x16xf32>
        %410 = vector.shape_cast %409 : vector<1x4x16xf32> to vector<4x16xf32>
        %411 = vector.broadcast %407 : f32 to vector<4x16xf32>
        %412 = arith.mulf %411, %410 : vector<4x16xf32>
        %413 = arith.addf %402, %412 : vector<4x16xf32>
        %c7_i32_248 = arith.constant 7 : i32
        %414 = arith.muli %arg14, %c7_i32_248 : i32
        %c147_i32_249 = arith.constant 147 : i32
        %415 = arith.addi %c147_i32_249, %414 : i32
        %c5_i32_250 = arith.constant 5 : i32
        %416 = arith.addi %415, %c5_i32_250 : i32
        %417 = arith.index_cast %416 : i32 to index
        %418 = memref.load %arg3[%417] : memref<297xf32, #tpu.memory_space<smem>>
        %c12_251 = arith.constant 12 : index
        %419 = arith.index_cast %arg14 : i32 to index
        %c0_252 = arith.constant 0 : index
        %420 = vector.load %arg13[%c12_251, %419, %c0_252] : memref<14x22x16xf32, #tpu.memory_space<vmem>>, vector<1x4x16xf32>
        %421 = vector.shape_cast %420 : vector<1x4x16xf32> to vector<4x16xf32>
        %422 = vector.broadcast %418 : f32 to vector<4x16xf32>
        %423 = arith.mulf %422, %421 : vector<4x16xf32>
        %424 = arith.addf %413, %423 : vector<4x16xf32>
        %c7_i32_253 = arith.constant 7 : i32
        %425 = arith.muli %arg14, %c7_i32_253 : i32
        %c147_i32_254 = arith.constant 147 : i32
        %426 = arith.addi %c147_i32_254, %425 : i32
        %c6_i32_255 = arith.constant 6 : i32
        %427 = arith.addi %426, %c6_i32_255 : i32
        %428 = arith.index_cast %427 : i32 to index
        %429 = memref.load %arg3[%428] : memref<297xf32, #tpu.memory_space<smem>>
        %c13_256 = arith.constant 13 : index
        %430 = arith.index_cast %arg14 : i32 to index
        %c0_257 = arith.constant 0 : index
        %431 = vector.load %arg13[%c13_256, %430, %c0_257] : memref<14x22x16xf32, #tpu.memory_space<vmem>>, vector<1x4x16xf32>
        %432 = vector.shape_cast %431 : vector<1x4x16xf32> to vector<4x16xf32>
        %433 = vector.broadcast %429 : f32 to vector<4x16xf32>
        %434 = arith.mulf %433, %432 : vector<4x16xf32>
        %435 = arith.addf %424, %434 : vector<4x16xf32>
        scf.yield %435 : vector<4x16xf32>
      }
      %c7_i32_64 = arith.constant 7 : i32
      %c295 = arith.constant 295 : index
      %103 = memref.load %arg3[%c295] : memref<297xf32, #tpu.memory_space<smem>>
      %104 = vector.broadcast %103 : f32 to vector<4x16xf32>
      %105 = arith.addf %102, %104 : vector<4x16xf32>
      %cst_65 = arith.constant 5.000000e-01 : f32
      %106 = vector.broadcast %cst_65 : f32 to vector<4x16xf32>
      %107 = arith.mulf %106, %105 : vector<4x16xf32>
      %108 = math.tanh %107 : vector<4x16xf32>
      %cst_66 = arith.constant 1.000000e+00 : f32
      %109 = vector.broadcast %cst_66 : f32 to vector<4x16xf32>
      %110 = arith.addf %108, %109 : vector<4x16xf32>
      %cst_67 = arith.constant 5.000000e-01 : f32
      %111 = vector.broadcast %cst_67 : f32 to vector<4x16xf32>
      %112 = arith.mulf %111, %110 : vector<4x16xf32>
      %c0_68 = arith.constant 0 : index
      %c0_69 = arith.constant 0 : index
      %c0_70 = arith.constant 0 : index
      %113 = vector.load %arg5[%c0_68, %c0_69, %c0_70] : memref<1x4x16xf32, #tpu.memory_space<vmem>>, vector<1x4x16xf32>
      %114 = vector.shape_cast %113 : vector<1x4x16xf32> to vector<4x16xf32>
      %115 = vector.shape_cast %112 : vector<4x16xf32> to vector<1x4x16xf32>
      tpu.vector_store %arg5[%c0_68, %c0_69, %c0_70], %115 {strides = array<i32>} : memref<1x4x16xf32, #tpu.memory_space<vmem>>, vector<1x4x16xf32>,
      %c0_71 = arith.constant 0 : index
      %c0_72 = arith.constant 0 : index
      %116 = vector.load %arg11[%c0_71, %c0_72] : memref<4x16xf32, #tpu.memory_space<vmem>>, vector<4x16xf32>
      %c0_73 = arith.constant 0 : index
      %c0_74 = arith.constant 0 : index
      %117 = vector.load %arg12[%c0_73, %c0_74] : memref<4x16xf32, #tpu.memory_space<vmem>>, vector<4x16xf32>
      %cst_75 = arith.constant 0.000000e+00 : f32
      %118 = vector.broadcast %cst_75 : f32 to vector<3x16xf32>
      %119 = tpu.concatenate %118, %116, %118 in 0 : vector<3x16xf32>, vector<4x16xf32>, vector<3x16xf32> -> vector<10x16xf32>
      %cst_76 = arith.constant 0.000000e+00 : f32
      %120 = vector.broadcast %cst_76 : f32 to vector<10x3xf32>
      %121 = tpu.concatenate %120, %119, %120 in 1 : vector<10x3xf32>, vector<10x16xf32>, vector<10x3xf32> -> vector<10x22xf32>
      %cst_77 = arith.constant 0.000000e+00 : f32
      %122 = vector.broadcast %cst_77 : f32 to vector<3x16xf32>
      %123 = tpu.concatenate %122, %117, %122 in 0 : vector<3x16xf32>, vector<4x16xf32>, vector<3x16xf32> -> vector<10x16xf32>
      %cst_78 = arith.constant 0.000000e+00 : f32
      %124 = vector.broadcast %cst_78 : f32 to vector<10x3xf32>
      %125 = tpu.concatenate %124, %123, %124 in 1 : vector<10x3xf32>, vector<10x16xf32>, vector<10x3xf32> -> vector<10x22xf32>
      %126 = vector.extract_strided_slice %121 {offsets = [0, 0], sizes = [10, 16], strides = [1, 1]} : vector<10x22xf32> to vector<10x16xf32>
      %c0_79 = arith.constant 0 : index
      %c0_80 = arith.constant 0 : index
      %c0_81 = arith.constant 0 : index
      %127 = vector.load %arg13[%c0_79, %c0_80, %c0_81] : memref<14x22x16xf32, #tpu.memory_space<vmem>>, vector<1x10x16xf32>
      %128 = vector.shape_cast %127 : vector<1x10x16xf32> to vector<10x16xf32>
      %129 = vector.shape_cast %126 : vector<10x16xf32> to vector<1x10x16xf32>
      tpu.vector_store %arg13[%c0_79, %c0_80, %c0_81], %129 {strides = array<i32>} : memref<14x22x16xf32, #tpu.memory_space<vmem>>, vector<1x10x16xf32>,
      %130 = vector.extract_strided_slice %121 {offsets = [0, 1], sizes = [10, 16], strides = [1, 1]} : vector<10x22xf32> to vector<10x16xf32>
      %c1_82 = arith.constant 1 : index
      %c0_83 = arith.constant 0 : index
      %c0_84 = arith.constant 0 : index
      %131 = vector.load %arg13[%c1_82, %c0_83, %c0_84] : memref<14x22x16xf32, #tpu.memory_space<vmem>>, vector<1x10x16xf32>
      %132 = vector.shape_cast %131 : vector<1x10x16xf32> to vector<10x16xf32>
      %133 = vector.shape_cast %130 : vector<10x16xf32> to vector<1x10x16xf32>
      tpu.vector_store %arg13[%c1_82, %c0_83, %c0_84], %133 {strides = array<i32>} : memref<14x22x16xf32, #tpu.memory_space<vmem>>, vector<1x10x16xf32>,
      %134 = vector.extract_strided_slice %121 {offsets = [0, 2], sizes = [10, 16], strides = [1, 1]} : vector<10x22xf32> to vector<10x16xf32>
      %c2_85 = arith.constant 2 : index
      %c0_86 = arith.constant 0 : index
      %c0_87 = arith.constant 0 : index
      %135 = vector.load %arg13[%c2_85, %c0_86, %c0_87] : memref<14x22x16xf32, #tpu.memory_space<vmem>>, vector<1x10x16xf32>
      %136 = vector.shape_cast %135 : vector<1x10x16xf32> to vector<10x16xf32>
      %137 = vector.shape_cast %134 : vector<10x16xf32> to vector<1x10x16xf32>
      tpu.vector_store %arg13[%c2_85, %c0_86, %c0_87], %137 {strides = array<i32>} : memref<14x22x16xf32, #tpu.memory_space<vmem>>, vector<1x10x16xf32>,
      %138 = vector.extract_strided_slice %121 {offsets = [0, 3], sizes = [10, 16], strides = [1, 1]} : vector<10x22xf32> to vector<10x16xf32>
      %c3_88 = arith.constant 3 : index
      %c0_89 = arith.constant 0 : index
      %c0_90 = arith.constant 0 : index
      %139 = vector.load %arg13[%c3_88, %c0_89, %c0_90] : memref<14x22x16xf32, #tpu.memory_space<vmem>>, vector<1x10x16xf32>
      %140 = vector.shape_cast %139 : vector<1x10x16xf32> to vector<10x16xf32>
      %141 = vector.shape_cast %138 : vector<10x16xf32> to vector<1x10x16xf32>
      tpu.vector_store %arg13[%c3_88, %c0_89, %c0_90], %141 {strides = array<i32>} : memref<14x22x16xf32, #tpu.memory_space<vmem>>, vector<1x10x16xf32>,
      %142 = vector.extract_strided_slice %121 {offsets = [0, 4], sizes = [10, 16], strides = [1, 1]} : vector<10x22xf32> to vector<10x16xf32>
      %c4_91 = arith.constant 4 : index
      %c0_92 = arith.constant 0 : index
      %c0_93 = arith.constant 0 : index
      %143 = vector.load %arg13[%c4_91, %c0_92, %c0_93] : memref<14x22x16xf32, #tpu.memory_space<vmem>>, vector<1x10x16xf32>
      %144 = vector.shape_cast %143 : vector<1x10x16xf32> to vector<10x16xf32>
      %145 = vector.shape_cast %142 : vector<10x16xf32> to vector<1x10x16xf32>
      tpu.vector_store %arg13[%c4_91, %c0_92, %c0_93], %145 {strides = array<i32>} : memref<14x22x16xf32, #tpu.memory_space<vmem>>, vector<1x10x16xf32>,
      %146 = vector.extract_strided_slice %121 {offsets = [0, 5], sizes = [10, 16], strides = [1, 1]} : vector<10x22xf32> to vector<10x16xf32>
      %c5_94 = arith.constant 5 : index
      %c0_95 = arith.constant 0 : index
      %c0_96 = arith.constant 0 : index
      %147 = vector.load %arg13[%c5_94, %c0_95, %c0_96] : memref<14x22x16xf32, #tpu.memory_space<vmem>>, vector<1x10x16xf32>
      %148 = vector.shape_cast %147 : vector<1x10x16xf32> to vector<10x16xf32>
      %149 = vector.shape_cast %146 : vector<10x16xf32> to vector<1x10x16xf32>
      tpu.vector_store %arg13[%c5_94, %c0_95, %c0_96], %149 {strides = array<i32>} : memref<14x22x16xf32, #tpu.memory_space<vmem>>, vector<1x10x16xf32>,
      %150 = vector.extract_strided_slice %121 {offsets = [0, 6], sizes = [10, 16], strides = [1, 1]} : vector<10x22xf32> to vector<10x16xf32>
      %c6_97 = arith.constant 6 : index
      %c0_98 = arith.constant 0 : index
      %c0_99 = arith.constant 0 : index
      %151 = vector.load %arg13[%c6_97, %c0_98, %c0_99] : memref<14x22x16xf32, #tpu.memory_space<vmem>>, vector<1x10x16xf32>
      %152 = vector.shape_cast %151 : vector<1x10x16xf32> to vector<10x16xf32>
      %153 = vector.shape_cast %150 : vector<10x16xf32> to vector<1x10x16xf32>
      tpu.vector_store %arg13[%c6_97, %c0_98, %c0_99], %153 {strides = array<i32>} : memref<14x22x16xf32, #tpu.memory_space<vmem>>, vector<1x10x16xf32>,
      %154 = vector.extract_strided_slice %125 {offsets = [0, 0], sizes = [10, 16], strides = [1, 1]} : vector<10x22xf32> to vector<10x16xf32>
      %c7_100 = arith.constant 7 : index
      %c0_101 = arith.constant 0 : index
      %c0_102 = arith.constant 0 : index
      %155 = vector.load %arg13[%c7_100, %c0_101, %c0_102] : memref<14x22x16xf32, #tpu.memory_space<vmem>>, vector<1x10x16xf32>
      %156 = vector.shape_cast %155 : vector<1x10x16xf32> to vector<10x16xf32>
      %157 = vector.shape_cast %154 : vector<10x16xf32> to vector<1x10x16xf32>
      tpu.vector_store %arg13[%c7_100, %c0_101, %c0_102], %157 {strides = array<i32>} : memref<14x22x16xf32, #tpu.memory_space<vmem>>, vector<1x10x16xf32>,
      %158 = vector.extract_strided_slice %125 {offsets = [0, 1], sizes = [10, 16], strides = [1, 1]} : vector<10x22xf32> to vector<10x16xf32>
      %c8_103 = arith.constant 8 : index
      %c0_104 = arith.constant 0 : index
      %c0_105 = arith.constant 0 : index
      %159 = vector.load %arg13[%c8_103, %c0_104, %c0_105] : memref<14x22x16xf32, #tpu.memory_space<vmem>>, vector<1x10x16xf32>
      %160 = vector.shape_cast %159 : vector<1x10x16xf32> to vector<10x16xf32>
      %161 = vector.shape_cast %158 : vector<10x16xf32> to vector<1x10x16xf32>
      tpu.vector_store %arg13[%c8_103, %c0_104, %c0_105], %161 {strides = array<i32>} : memref<14x22x16xf32, #tpu.memory_space<vmem>>, vector<1x10x16xf32>,
      %162 = vector.extract_strided_slice %125 {offsets = [0, 2], sizes = [10, 16], strides = [1, 1]} : vector<10x22xf32> to vector<10x16xf32>
      %c9_106 = arith.constant 9 : index
      %c0_107 = arith.constant 0 : index
      %c0_108 = arith.constant 0 : index
      %163 = vector.load %arg13[%c9_106, %c0_107, %c0_108] : memref<14x22x16xf32, #tpu.memory_space<vmem>>, vector<1x10x16xf32>
      %164 = vector.shape_cast %163 : vector<1x10x16xf32> to vector<10x16xf32>
      %165 = vector.shape_cast %162 : vector<10x16xf32> to vector<1x10x16xf32>
      tpu.vector_store %arg13[%c9_106, %c0_107, %c0_108], %165 {strides = array<i32>} : memref<14x22x16xf32, #tpu.memory_space<vmem>>, vector<1x10x16xf32>,
      %166 = vector.extract_strided_slice %125 {offsets = [0, 3], sizes = [10, 16], strides = [1, 1]} : vector<10x22xf32> to vector<10x16xf32>
      %c10_109 = arith.constant 10 : index
      %c0_110 = arith.constant 0 : index
      %c0_111 = arith.constant 0 : index
      %167 = vector.load %arg13[%c10_109, %c0_110, %c0_111] : memref<14x22x16xf32, #tpu.memory_space<vmem>>, vector<1x10x16xf32>
      %168 = vector.shape_cast %167 : vector<1x10x16xf32> to vector<10x16xf32>
      %169 = vector.shape_cast %166 : vector<10x16xf32> to vector<1x10x16xf32>
      tpu.vector_store %arg13[%c10_109, %c0_110, %c0_111], %169 {strides = array<i32>} : memref<14x22x16xf32, #tpu.memory_space<vmem>>, vector<1x10x16xf32>,
      %170 = vector.extract_strided_slice %125 {offsets = [0, 4], sizes = [10, 16], strides = [1, 1]} : vector<10x22xf32> to vector<10x16xf32>
      %c11_112 = arith.constant 11 : index
      %c0_113 = arith.constant 0 : index
      %c0_114 = arith.constant 0 : index
      %171 = vector.load %arg13[%c11_112, %c0_113, %c0_114] : memref<14x22x16xf32, #tpu.memory_space<vmem>>, vector<1x10x16xf32>
      %172 = vector.shape_cast %171 : vector<1x10x16xf32> to vector<10x16xf32>
      %173 = vector.shape_cast %170 : vector<10x16xf32> to vector<1x10x16xf32>
      tpu.vector_store %arg13[%c11_112, %c0_113, %c0_114], %173 {strides = array<i32>} : memref<14x22x16xf32, #tpu.memory_space<vmem>>, vector<1x10x16xf32>,
      %174 = vector.extract_strided_slice %125 {offsets = [0, 5], sizes = [10, 16], strides = [1, 1]} : vector<10x22xf32> to vector<10x16xf32>
      %c12_115 = arith.constant 12 : index
      %c0_116 = arith.constant 0 : index
      %c0_117 = arith.constant 0 : index
      %175 = vector.load %arg13[%c12_115, %c0_116, %c0_117] : memref<14x22x16xf32, #tpu.memory_space<vmem>>, vector<1x10x16xf32>
      %176 = vector.shape_cast %175 : vector<1x10x16xf32> to vector<10x16xf32>
      %177 = vector.shape_cast %174 : vector<10x16xf32> to vector<1x10x16xf32>
      tpu.vector_store %arg13[%c12_115, %c0_116, %c0_117], %177 {strides = array<i32>} : memref<14x22x16xf32, #tpu.memory_space<vmem>>, vector<1x10x16xf32>,
      %178 = vector.extract_strided_slice %125 {offsets = [0, 6], sizes = [10, 16], strides = [1, 1]} : vector<10x22xf32> to vector<10x16xf32>
      %c13_118 = arith.constant 13 : index
      %c0_119 = arith.constant 0 : index
      %c0_120 = arith.constant 0 : index
      %179 = vector.load %arg13[%c13_118, %c0_119, %c0_120] : memref<14x22x16xf32, #tpu.memory_space<vmem>>, vector<1x10x16xf32>
      %180 = vector.shape_cast %179 : vector<1x10x16xf32> to vector<10x16xf32>
      %181 = vector.shape_cast %178 : vector<10x16xf32> to vector<1x10x16xf32>
      tpu.vector_store %arg13[%c13_118, %c0_119, %c0_120], %181 {strides = array<i32>} : memref<14x22x16xf32, #tpu.memory_space<vmem>>, vector<1x10x16xf32>,
      %cst_121 = arith.constant 0.000000e+00 : f32
      %182 = vector.broadcast %cst_121 : f32 to vector<4x16xf32>
      %c0_i32_122 = arith.constant 0 : i32
      %c7_i32_123 = arith.constant 7 : i32
      %183 = arith.addi %c0_i32_122, %c7_i32_123 : i32
      %c1_i32_124 = arith.constant 1 : i32
      %184 = scf.for %arg14 = %c0_i32_122 to %183 step %c1_i32_124 iter_args(%arg15 = %182) -> (vector<4x16xf32>)  : i32 {
        %c7_i32_194 = arith.constant 7 : i32
        %282 = arith.muli %arg14, %c7_i32_194 : i32
        %c196_i32 = arith.constant 196 : i32
        %283 = arith.addi %c196_i32, %282 : i32
        %c0_i32_195 = arith.constant 0 : i32
        %284 = arith.addi %283, %c0_i32_195 : i32
        %285 = arith.index_cast %284 : i32 to index
        %286 = memref.load %arg3[%285] : memref<297xf32, #tpu.memory_space<smem>>
        %c0_196 = arith.constant 0 : index
        %287 = arith.index_cast %arg14 : i32 to index
        %c0_197 = arith.constant 0 : index
        %288 = vector.load %arg13[%c0_196, %287, %c0_197] : memref<14x22x16xf32, #tpu.memory_space<vmem>>, vector<1x4x16xf32>
        %289 = vector.shape_cast %288 : vector<1x4x16xf32> to vector<4x16xf32>
        %290 = vector.broadcast %286 : f32 to vector<4x16xf32>
        %291 = arith.mulf %290, %289 : vector<4x16xf32>
        %292 = arith.addf %arg15, %291 : vector<4x16xf32>
        %c7_i32_198 = arith.constant 7 : i32
        %293 = arith.muli %arg14, %c7_i32_198 : i32
        %c196_i32_199 = arith.constant 196 : i32
        %294 = arith.addi %c196_i32_199, %293 : i32
        %c1_i32_200 = arith.constant 1 : i32
        %295 = arith.addi %294, %c1_i32_200 : i32
        %296 = arith.index_cast %295 : i32 to index
        %297 = memref.load %arg3[%296] : memref<297xf32, #tpu.memory_space<smem>>
        %c1_201 = arith.constant 1 : index
        %298 = arith.index_cast %arg14 : i32 to index
        %c0_202 = arith.constant 0 : index
        %299 = vector.load %arg13[%c1_201, %298, %c0_202] : memref<14x22x16xf32, #tpu.memory_space<vmem>>, vector<1x4x16xf32>
        %300 = vector.shape_cast %299 : vector<1x4x16xf32> to vector<4x16xf32>
        %301 = vector.broadcast %297 : f32 to vector<4x16xf32>
        %302 = arith.mulf %301, %300 : vector<4x16xf32>
        %303 = arith.addf %292, %302 : vector<4x16xf32>
        %c7_i32_203 = arith.constant 7 : i32
        %304 = arith.muli %arg14, %c7_i32_203 : i32
        %c196_i32_204 = arith.constant 196 : i32
        %305 = arith.addi %c196_i32_204, %304 : i32
        %c2_i32 = arith.constant 2 : i32
        %306 = arith.addi %305, %c2_i32 : i32
        %307 = arith.index_cast %306 : i32 to index
        %308 = memref.load %arg3[%307] : memref<297xf32, #tpu.memory_space<smem>>
        %c2_205 = arith.constant 2 : index
        %309 = arith.index_cast %arg14 : i32 to index
        %c0_206 = arith.constant 0 : index
        %310 = vector.load %arg13[%c2_205, %309, %c0_206] : memref<14x22x16xf32, #tpu.memory_space<vmem>>, vector<1x4x16xf32>
        %311 = vector.shape_cast %310 : vector<1x4x16xf32> to vector<4x16xf32>
        %312 = vector.broadcast %308 : f32 to vector<4x16xf32>
        %313 = arith.mulf %312, %311 : vector<4x16xf32>
        %314 = arith.addf %303, %313 : vector<4x16xf32>
        %c7_i32_207 = arith.constant 7 : i32
        %315 = arith.muli %arg14, %c7_i32_207 : i32
        %c196_i32_208 = arith.constant 196 : i32
        %316 = arith.addi %c196_i32_208, %315 : i32
        %c3_i32 = arith.constant 3 : i32
        %317 = arith.addi %316, %c3_i32 : i32
        %318 = arith.index_cast %317 : i32 to index
        %319 = memref.load %arg3[%318] : memref<297xf32, #tpu.memory_space<smem>>
        %c3_209 = arith.constant 3 : index
        %320 = arith.index_cast %arg14 : i32 to index
        %c0_210 = arith.constant 0 : index
        %321 = vector.load %arg13[%c3_209, %320, %c0_210] : memref<14x22x16xf32, #tpu.memory_space<vmem>>, vector<1x4x16xf32>
        %322 = vector.shape_cast %321 : vector<1x4x16xf32> to vector<4x16xf32>
        %323 = vector.broadcast %319 : f32 to vector<4x16xf32>
        %324 = arith.mulf %323, %322 : vector<4x16xf32>
        %325 = arith.addf %314, %324 : vector<4x16xf32>
        %c7_i32_211 = arith.constant 7 : i32
        %326 = arith.muli %arg14, %c7_i32_211 : i32
        %c196_i32_212 = arith.constant 196 : i32
        %327 = arith.addi %c196_i32_212, %326 : i32
        %c4_i32_213 = arith.constant 4 : i32
        %328 = arith.addi %327, %c4_i32_213 : i32
        %329 = arith.index_cast %328 : i32 to index
        %330 = memref.load %arg3[%329] : memref<297xf32, #tpu.memory_space<smem>>
        %c4_214 = arith.constant 4 : index
        %331 = arith.index_cast %arg14 : i32 to index
        %c0_215 = arith.constant 0 : index
        %332 = vector.load %arg13[%c4_214, %331, %c0_215] : memref<14x22x16xf32, #tpu.memory_space<vmem>>, vector<1x4x16xf32>
        %333 = vector.shape_cast %332 : vector<1x4x16xf32> to vector<4x16xf32>
        %334 = vector.broadcast %330 : f32 to vector<4x16xf32>
        %335 = arith.mulf %334, %333 : vector<4x16xf32>
        %336 = arith.addf %325, %335 : vector<4x16xf32>
        %c7_i32_216 = arith.constant 7 : i32
        %337 = arith.muli %arg14, %c7_i32_216 : i32
        %c196_i32_217 = arith.constant 196 : i32
        %338 = arith.addi %c196_i32_217, %337 : i32
        %c5_i32 = arith.constant 5 : i32
        %339 = arith.addi %338, %c5_i32 : i32
        %340 = arith.index_cast %339 : i32 to index
        %341 = memref.load %arg3[%340] : memref<297xf32, #tpu.memory_space<smem>>
        %c5_218 = arith.constant 5 : index
        %342 = arith.index_cast %arg14 : i32 to index
        %c0_219 = arith.constant 0 : index
        %343 = vector.load %arg13[%c5_218, %342, %c0_219] : memref<14x22x16xf32, #tpu.memory_space<vmem>>, vector<1x4x16xf32>
        %344 = vector.shape_cast %343 : vector<1x4x16xf32> to vector<4x16xf32>
        %345 = vector.broadcast %341 : f32 to vector<4x16xf32>
        %346 = arith.mulf %345, %344 : vector<4x16xf32>
        %347 = arith.addf %336, %346 : vector<4x16xf32>
        %c7_i32_220 = arith.constant 7 : i32
        %348 = arith.muli %arg14, %c7_i32_220 : i32
        %c196_i32_221 = arith.constant 196 : i32
        %349 = arith.addi %c196_i32_221, %348 : i32
        %c6_i32 = arith.constant 6 : i32
        %350 = arith.addi %349, %c6_i32 : i32
        %351 = arith.index_cast %350 : i32 to index
        %352 = memref.load %arg3[%351] : memref<297xf32, #tpu.memory_space<smem>>
        %c6_222 = arith.constant 6 : index
        %353 = arith.index_cast %arg14 : i32 to index
        %c0_223 = arith.constant 0 : index
        %354 = vector.load %arg13[%c6_222, %353, %c0_223] : memref<14x22x16xf32, #tpu.memory_space<vmem>>, vector<1x4x16xf32>
        %355 = vector.shape_cast %354 : vector<1x4x16xf32> to vector<4x16xf32>
        %356 = vector.broadcast %352 : f32 to vector<4x16xf32>
        %357 = arith.mulf %356, %355 : vector<4x16xf32>
        %358 = arith.addf %347, %357 : vector<4x16xf32>
        %c7_i32_224 = arith.constant 7 : i32
        %359 = arith.muli %arg14, %c7_i32_224 : i32
        %c245_i32 = arith.constant 245 : i32
        %360 = arith.addi %c245_i32, %359 : i32
        %c0_i32_225 = arith.constant 0 : i32
        %361 = arith.addi %360, %c0_i32_225 : i32
        %362 = arith.index_cast %361 : i32 to index
        %363 = memref.load %arg3[%362] : memref<297xf32, #tpu.memory_space<smem>>
        %c7_226 = arith.constant 7 : index
        %364 = arith.index_cast %arg14 : i32 to index
        %c0_227 = arith.constant 0 : index
        %365 = vector.load %arg13[%c7_226, %364, %c0_227] : memref<14x22x16xf32, #tpu.memory_space<vmem>>, vector<1x4x16xf32>
        %366 = vector.shape_cast %365 : vector<1x4x16xf32> to vector<4x16xf32>
        %367 = vector.broadcast %363 : f32 to vector<4x16xf32>
        %368 = arith.mulf %367, %366 : vector<4x16xf32>
        %369 = arith.addf %358, %368 : vector<4x16xf32>
        %c7_i32_228 = arith.constant 7 : i32
        %370 = arith.muli %arg14, %c7_i32_228 : i32
        %c245_i32_229 = arith.constant 245 : i32
        %371 = arith.addi %c245_i32_229, %370 : i32
        %c1_i32_230 = arith.constant 1 : i32
        %372 = arith.addi %371, %c1_i32_230 : i32
        %373 = arith.index_cast %372 : i32 to index
        %374 = memref.load %arg3[%373] : memref<297xf32, #tpu.memory_space<smem>>
        %c8_231 = arith.constant 8 : index
        %375 = arith.index_cast %arg14 : i32 to index
        %c0_232 = arith.constant 0 : index
        %376 = vector.load %arg13[%c8_231, %375, %c0_232] : memref<14x22x16xf32, #tpu.memory_space<vmem>>, vector<1x4x16xf32>
        %377 = vector.shape_cast %376 : vector<1x4x16xf32> to vector<4x16xf32>
        %378 = vector.broadcast %374 : f32 to vector<4x16xf32>
        %379 = arith.mulf %378, %377 : vector<4x16xf32>
        %380 = arith.addf %369, %379 : vector<4x16xf32>
        %c7_i32_233 = arith.constant 7 : i32
        %381 = arith.muli %arg14, %c7_i32_233 : i32
        %c245_i32_234 = arith.constant 245 : i32
        %382 = arith.addi %c245_i32_234, %381 : i32
        %c2_i32_235 = arith.constant 2 : i32
        %383 = arith.addi %382, %c2_i32_235 : i32
        %384 = arith.index_cast %383 : i32 to index
        %385 = memref.load %arg3[%384] : memref<297xf32, #tpu.memory_space<smem>>
        %c9_236 = arith.constant 9 : index
        %386 = arith.index_cast %arg14 : i32 to index
        %c0_237 = arith.constant 0 : index
        %387 = vector.load %arg13[%c9_236, %386, %c0_237] : memref<14x22x16xf32, #tpu.memory_space<vmem>>, vector<1x4x16xf32>
        %388 = vector.shape_cast %387 : vector<1x4x16xf32> to vector<4x16xf32>
        %389 = vector.broadcast %385 : f32 to vector<4x16xf32>
        %390 = arith.mulf %389, %388 : vector<4x16xf32>
        %391 = arith.addf %380, %390 : vector<4x16xf32>
        %c7_i32_238 = arith.constant 7 : i32
        %392 = arith.muli %arg14, %c7_i32_238 : i32
        %c245_i32_239 = arith.constant 245 : i32
        %393 = arith.addi %c245_i32_239, %392 : i32
        %c3_i32_240 = arith.constant 3 : i32
        %394 = arith.addi %393, %c3_i32_240 : i32
        %395 = arith.index_cast %394 : i32 to index
        %396 = memref.load %arg3[%395] : memref<297xf32, #tpu.memory_space<smem>>
        %c10_241 = arith.constant 10 : index
        %397 = arith.index_cast %arg14 : i32 to index
        %c0_242 = arith.constant 0 : index
        %398 = vector.load %arg13[%c10_241, %397, %c0_242] : memref<14x22x16xf32, #tpu.memory_space<vmem>>, vector<1x4x16xf32>
        %399 = vector.shape_cast %398 : vector<1x4x16xf32> to vector<4x16xf32>
        %400 = vector.broadcast %396 : f32 to vector<4x16xf32>
        %401 = arith.mulf %400, %399 : vector<4x16xf32>
        %402 = arith.addf %391, %401 : vector<4x16xf32>
        %c7_i32_243 = arith.constant 7 : i32
        %403 = arith.muli %arg14, %c7_i32_243 : i32
        %c245_i32_244 = arith.constant 245 : i32
        %404 = arith.addi %c245_i32_244, %403 : i32
        %c4_i32_245 = arith.constant 4 : i32
        %405 = arith.addi %404, %c4_i32_245 : i32
        %406 = arith.index_cast %405 : i32 to index
        %407 = memref.load %arg3[%406] : memref<297xf32, #tpu.memory_space<smem>>
        %c11_246 = arith.constant 11 : index
        %408 = arith.index_cast %arg14 : i32 to index
        %c0_247 = arith.constant 0 : index
        %409 = vector.load %arg13[%c11_246, %408, %c0_247] : memref<14x22x16xf32, #tpu.memory_space<vmem>>, vector<1x4x16xf32>
        %410 = vector.shape_cast %409 : vector<1x4x16xf32> to vector<4x16xf32>
        %411 = vector.broadcast %407 : f32 to vector<4x16xf32>
        %412 = arith.mulf %411, %410 : vector<4x16xf32>
        %413 = arith.addf %402, %412 : vector<4x16xf32>
        %c7_i32_248 = arith.constant 7 : i32
        %414 = arith.muli %arg14, %c7_i32_248 : i32
        %c245_i32_249 = arith.constant 245 : i32
        %415 = arith.addi %c245_i32_249, %414 : i32
        %c5_i32_250 = arith.constant 5 : i32
        %416 = arith.addi %415, %c5_i32_250 : i32
        %417 = arith.index_cast %416 : i32 to index
        %418 = memref.load %arg3[%417] : memref<297xf32, #tpu.memory_space<smem>>
        %c12_251 = arith.constant 12 : index
        %419 = arith.index_cast %arg14 : i32 to index
        %c0_252 = arith.constant 0 : index
        %420 = vector.load %arg13[%c12_251, %419, %c0_252] : memref<14x22x16xf32, #tpu.memory_space<vmem>>, vector<1x4x16xf32>
        %421 = vector.shape_cast %420 : vector<1x4x16xf32> to vector<4x16xf32>
        %422 = vector.broadcast %418 : f32 to vector<4x16xf32>
        %423 = arith.mulf %422, %421 : vector<4x16xf32>
        %424 = arith.addf %413, %423 : vector<4x16xf32>
        %c7_i32_253 = arith.constant 7 : i32
        %425 = arith.muli %arg14, %c7_i32_253 : i32
        %c245_i32_254 = arith.constant 245 : i32
        %426 = arith.addi %c245_i32_254, %425 : i32
        %c6_i32_255 = arith.constant 6 : i32
        %427 = arith.addi %426, %c6_i32_255 : i32
        %428 = arith.index_cast %427 : i32 to index
        %429 = memref.load %arg3[%428] : memref<297xf32, #tpu.memory_space<smem>>
        %c13_256 = arith.constant 13 : index
        %430 = arith.index_cast %arg14 : i32 to index
        %c0_257 = arith.constant 0 : index
        %431 = vector.load %arg13[%c13_256, %430, %c0_257] : memref<14x22x16xf32, #tpu.memory_space<vmem>>, vector<1x4x16xf32>
        %432 = vector.shape_cast %431 : vector<1x4x16xf32> to vector<4x16xf32>
        %433 = vector.broadcast %429 : f32 to vector<4x16xf32>
        %434 = arith.mulf %433, %432 : vector<4x16xf32>
        %435 = arith.addf %424, %434 : vector<4x16xf32>
        scf.yield %435 : vector<4x16xf32>
      }
      %c7_i32_125 = arith.constant 7 : i32
      %c296 = arith.constant 296 : index
      %185 = memref.load %arg3[%c296] : memref<297xf32, #tpu.memory_space<smem>>
      %186 = vector.broadcast %185 : f32 to vector<4x16xf32>
      %187 = arith.addf %184, %186 : vector<4x16xf32>
      %cst_126 = arith.constant 5.000000e-01 : f32
      %188 = vector.broadcast %cst_126 : f32 to vector<4x16xf32>
      %189 = arith.mulf %188, %187 : vector<4x16xf32>
      %190 = math.tanh %189 : vector<4x16xf32>
      %cst_127 = arith.constant 1.000000e+00 : f32
      %191 = vector.broadcast %cst_127 : f32 to vector<4x16xf32>
      %192 = arith.addf %190, %191 : vector<4x16xf32>
      %cst_128 = arith.constant 5.000000e-01 : f32
      %193 = vector.broadcast %cst_128 : f32 to vector<4x16xf32>
      %194 = arith.mulf %193, %192 : vector<4x16xf32>
      %c0_129 = arith.constant 0 : index
      %c0_130 = arith.constant 0 : index
      %c0_131 = arith.constant 0 : index
      %195 = vector.load %arg6[%c0_129, %c0_130, %c0_131] : memref<1x4x16xf32, #tpu.memory_space<vmem>>, vector<1x4x16xf32>
      %196 = vector.shape_cast %195 : vector<1x4x16xf32> to vector<4x16xf32>
      %197 = vector.shape_cast %194 : vector<4x16xf32> to vector<1x4x16xf32>
      tpu.vector_store %arg6[%c0_129, %c0_130, %c0_131], %197 {strides = array<i32>} : memref<1x4x16xf32, #tpu.memory_space<vmem>>, vector<1x4x16xf32>,
      %c0_132 = arith.constant 0 : index
      %c0_133 = arith.constant 0 : index
      %198 = vector.load %arg7[%c0_132, %c0_133] : memref<16x16xf32, #tpu.memory_space<vmem>>, vector<16x16xf32>
      %c0_134 = arith.constant 0 : index
      %c0_135 = arith.constant 0 : index
      %199 = vector.load %arg8[%c0_134, %c0_135] : memref<16x16xf32, #tpu.memory_space<vmem>>, vector<16x16xf32>
      %cst_136 = arith.constant 2.500000e-01 : f32
      %200 = vector.broadcast %cst_136 : f32 to vector<16x16xf32>
      %201 = arith.mulf %199, %200 : vector<16x16xf32>
      %cst_137 = arith.constant 0.000000e+00 : f32
      %202 = vector.broadcast %cst_137 : f32 to vector<3x16xf32>
      %203 = tpu.concatenate %202, %198, %202 in 0 : vector<3x16xf32>, vector<16x16xf32>, vector<3x16xf32> -> vector<22x16xf32>
      %cst_138 = arith.constant 0.000000e+00 : f32
      %204 = vector.broadcast %cst_138 : f32 to vector<22x3xf32>
      %205 = tpu.concatenate %204, %203, %204 in 1 : vector<22x3xf32>, vector<22x16xf32>, vector<22x3xf32> -> vector<22x22xf32>
      %cst_139 = arith.constant 0.000000e+00 : f32
      %206 = vector.broadcast %cst_139 : f32 to vector<3x16xf32>
      %207 = tpu.concatenate %206, %201, %206 in 0 : vector<3x16xf32>, vector<16x16xf32>, vector<3x16xf32> -> vector<22x16xf32>
      %cst_140 = arith.constant 0.000000e+00 : f32
      %208 = vector.broadcast %cst_140 : f32 to vector<22x3xf32>
      %209 = tpu.concatenate %208, %207, %208 in 1 : vector<22x3xf32>, vector<22x16xf32>, vector<22x3xf32> -> vector<22x22xf32>
      %210 = vector.extract_strided_slice %205 {offsets = [0, 0], sizes = [22, 16], strides = [1, 1]} : vector<22x22xf32> to vector<22x16xf32>
      %c0_141 = arith.constant 0 : index
      %c0_142 = arith.constant 0 : index
      %c0_143 = arith.constant 0 : index
      %211 = vector.load %arg13[%c0_141, %c0_142, %c0_143] : memref<14x22x16xf32, #tpu.memory_space<vmem>>, vector<1x22x16xf32>
      %212 = vector.shape_cast %211 : vector<1x22x16xf32> to vector<22x16xf32>
      %213 = vector.shape_cast %210 : vector<22x16xf32> to vector<1x22x16xf32>
      tpu.vector_store %arg13[%c0_141, %c0_142, %c0_143], %213 {strides = array<i32>} : memref<14x22x16xf32, #tpu.memory_space<vmem>>, vector<1x22x16xf32>,
      %214 = vector.extract_strided_slice %205 {offsets = [0, 1], sizes = [22, 16], strides = [1, 1]} : vector<22x22xf32> to vector<22x16xf32>
      %c1_144 = arith.constant 1 : index
      %c0_145 = arith.constant 0 : index
      %c0_146 = arith.constant 0 : index
      %215 = vector.load %arg13[%c1_144, %c0_145, %c0_146] : memref<14x22x16xf32, #tpu.memory_space<vmem>>, vector<1x22x16xf32>
      %216 = vector.shape_cast %215 : vector<1x22x16xf32> to vector<22x16xf32>
      %217 = vector.shape_cast %214 : vector<22x16xf32> to vector<1x22x16xf32>
      tpu.vector_store %arg13[%c1_144, %c0_145, %c0_146], %217 {strides = array<i32>} : memref<14x22x16xf32, #tpu.memory_space<vmem>>, vector<1x22x16xf32>,
      %218 = vector.extract_strided_slice %205 {offsets = [0, 2], sizes = [22, 16], strides = [1, 1]} : vector<22x22xf32> to vector<22x16xf32>
      %c2_147 = arith.constant 2 : index
      %c0_148 = arith.constant 0 : index
      %c0_149 = arith.constant 0 : index
      %219 = vector.load %arg13[%c2_147, %c0_148, %c0_149] : memref<14x22x16xf32, #tpu.memory_space<vmem>>, vector<1x22x16xf32>
      %220 = vector.shape_cast %219 : vector<1x22x16xf32> to vector<22x16xf32>
      %221 = vector.shape_cast %218 : vector<22x16xf32> to vector<1x22x16xf32>
      tpu.vector_store %arg13[%c2_147, %c0_148, %c0_149], %221 {strides = array<i32>} : memref<14x22x16xf32, #tpu.memory_space<vmem>>, vector<1x22x16xf32>,
      %222 = vector.extract_strided_slice %205 {offsets = [0, 3], sizes = [22, 16], strides = [1, 1]} : vector<22x22xf32> to vector<22x16xf32>
      %c3_150 = arith.constant 3 : index
      %c0_151 = arith.constant 0 : index
      %c0_152 = arith.constant 0 : index
      %223 = vector.load %arg13[%c3_150, %c0_151, %c0_152] : memref<14x22x16xf32, #tpu.memory_space<vmem>>, vector<1x22x16xf32>
      %224 = vector.shape_cast %223 : vector<1x22x16xf32> to vector<22x16xf32>
      %225 = vector.shape_cast %222 : vector<22x16xf32> to vector<1x22x16xf32>
      tpu.vector_store %arg13[%c3_150, %c0_151, %c0_152], %225 {strides = array<i32>} : memref<14x22x16xf32, #tpu.memory_space<vmem>>, vector<1x22x16xf32>,
      %226 = vector.extract_strided_slice %205 {offsets = [0, 4], sizes = [22, 16], strides = [1, 1]} : vector<22x22xf32> to vector<22x16xf32>
      %c4_153 = arith.constant 4 : index
      %c0_154 = arith.constant 0 : index
      %c0_155 = arith.constant 0 : index
      %227 = vector.load %arg13[%c4_153, %c0_154, %c0_155] : memref<14x22x16xf32, #tpu.memory_space<vmem>>, vector<1x22x16xf32>
      %228 = vector.shape_cast %227 : vector<1x22x16xf32> to vector<22x16xf32>
      %229 = vector.shape_cast %226 : vector<22x16xf32> to vector<1x22x16xf32>
      tpu.vector_store %arg13[%c4_153, %c0_154, %c0_155], %229 {strides = array<i32>} : memref<14x22x16xf32, #tpu.memory_space<vmem>>, vector<1x22x16xf32>,
      %230 = vector.extract_strided_slice %205 {offsets = [0, 5], sizes = [22, 16], strides = [1, 1]} : vector<22x22xf32> to vector<22x16xf32>
      %c5_156 = arith.constant 5 : index
      %c0_157 = arith.constant 0 : index
      %c0_158 = arith.constant 0 : index
      %231 = vector.load %arg13[%c5_156, %c0_157, %c0_158] : memref<14x22x16xf32, #tpu.memory_space<vmem>>, vector<1x22x16xf32>
      %232 = vector.shape_cast %231 : vector<1x22x16xf32> to vector<22x16xf32>
      %233 = vector.shape_cast %230 : vector<22x16xf32> to vector<1x22x16xf32>
      tpu.vector_store %arg13[%c5_156, %c0_157, %c0_158], %233 {strides = array<i32>} : memref<14x22x16xf32, #tpu.memory_space<vmem>>, vector<1x22x16xf32>,
      %234 = vector.extract_strided_slice %205 {offsets = [0, 6], sizes = [22, 16], strides = [1, 1]} : vector<22x22xf32> to vector<22x16xf32>
      %c6_159 = arith.constant 6 : index
      %c0_160 = arith.constant 0 : index
      %c0_161 = arith.constant 0 : index
      %235 = vector.load %arg13[%c6_159, %c0_160, %c0_161] : memref<14x22x16xf32, #tpu.memory_space<vmem>>, vector<1x22x16xf32>
      %236 = vector.shape_cast %235 : vector<1x22x16xf32> to vector<22x16xf32>
      %237 = vector.shape_cast %234 : vector<22x16xf32> to vector<1x22x16xf32>
      tpu.vector_store %arg13[%c6_159, %c0_160, %c0_161], %237 {strides = array<i32>} : memref<14x22x16xf32, #tpu.memory_space<vmem>>, vector<1x22x16xf32>,
      %238 = vector.extract_strided_slice %209 {offsets = [0, 0], sizes = [22, 16], strides = [1, 1]} : vector<22x22xf32> to vector<22x16xf32>
      %c7_162 = arith.constant 7 : index
      %c0_163 = arith.constant 0 : index
      %c0_164 = arith.constant 0 : index
      %239 = vector.load %arg13[%c7_162, %c0_163, %c0_164] : memref<14x22x16xf32, #tpu.memory_space<vmem>>, vector<1x22x16xf32>
      %240 = vector.shape_cast %239 : vector<1x22x16xf32> to vector<22x16xf32>
      %241 = vector.shape_cast %238 : vector<22x16xf32> to vector<1x22x16xf32>
      tpu.vector_store %arg13[%c7_162, %c0_163, %c0_164], %241 {strides = array<i32>} : memref<14x22x16xf32, #tpu.memory_space<vmem>>, vector<1x22x16xf32>,
      %242 = vector.extract_strided_slice %209 {offsets = [0, 1], sizes = [22, 16], strides = [1, 1]} : vector<22x22xf32> to vector<22x16xf32>
      %c8_165 = arith.constant 8 : index
      %c0_166 = arith.constant 0 : index
      %c0_167 = arith.constant 0 : index
      %243 = vector.load %arg13[%c8_165, %c0_166, %c0_167] : memref<14x22x16xf32, #tpu.memory_space<vmem>>, vector<1x22x16xf32>
      %244 = vector.shape_cast %243 : vector<1x22x16xf32> to vector<22x16xf32>
      %245 = vector.shape_cast %242 : vector<22x16xf32> to vector<1x22x16xf32>
      tpu.vector_store %arg13[%c8_165, %c0_166, %c0_167], %245 {strides = array<i32>} : memref<14x22x16xf32, #tpu.memory_space<vmem>>, vector<1x22x16xf32>,
      %246 = vector.extract_strided_slice %209 {offsets = [0, 2], sizes = [22, 16], strides = [1, 1]} : vector<22x22xf32> to vector<22x16xf32>
      %c9_168 = arith.constant 9 : index
      %c0_169 = arith.constant 0 : index
      %c0_170 = arith.constant 0 : index
      %247 = vector.load %arg13[%c9_168, %c0_169, %c0_170] : memref<14x22x16xf32, #tpu.memory_space<vmem>>, vector<1x22x16xf32>
      %248 = vector.shape_cast %247 : vector<1x22x16xf32> to vector<22x16xf32>
      %249 = vector.shape_cast %246 : vector<22x16xf32> to vector<1x22x16xf32>
      tpu.vector_store %arg13[%c9_168, %c0_169, %c0_170], %249 {strides = array<i32>} : memref<14x22x16xf32, #tpu.memory_space<vmem>>, vector<1x22x16xf32>,
      %250 = vector.extract_strided_slice %209 {offsets = [0, 3], sizes = [22, 16], strides = [1, 1]} : vector<22x22xf32> to vector<22x16xf32>
      %c10_171 = arith.constant 10 : index
      %c0_172 = arith.constant 0 : index
      %c0_173 = arith.constant 0 : index
      %251 = vector.load %arg13[%c10_171, %c0_172, %c0_173] : memref<14x22x16xf32, #tpu.memory_space<vmem>>, vector<1x22x16xf32>
      %252 = vector.shape_cast %251 : vector<1x22x16xf32> to vector<22x16xf32>
      %253 = vector.shape_cast %250 : vector<22x16xf32> to vector<1x22x16xf32>
      tpu.vector_store %arg13[%c10_171, %c0_172, %c0_173], %253 {strides = array<i32>} : memref<14x22x16xf32, #tpu.memory_space<vmem>>, vector<1x22x16xf32>,
      %254 = vector.extract_strided_slice %209 {offsets = [0, 4], sizes = [22, 16], strides = [1, 1]} : vector<22x22xf32> to vector<22x16xf32>
      %c11_174 = arith.constant 11 : index
      %c0_175 = arith.constant 0 : index
      %c0_176 = arith.constant 0 : index
      %255 = vector.load %arg13[%c11_174, %c0_175, %c0_176] : memref<14x22x16xf32, #tpu.memory_space<vmem>>, vector<1x22x16xf32>
      %256 = vector.shape_cast %255 : vector<1x22x16xf32> to vector<22x16xf32>
      %257 = vector.shape_cast %254 : vector<22x16xf32> to vector<1x22x16xf32>
      tpu.vector_store %arg13[%c11_174, %c0_175, %c0_176], %257 {strides = array<i32>} : memref<14x22x16xf32, #tpu.memory_space<vmem>>, vector<1x22x16xf32>,
      %258 = vector.extract_strided_slice %209 {offsets = [0, 5], sizes = [22, 16], strides = [1, 1]} : vector<22x22xf32> to vector<22x16xf32>
      %c12_177 = arith.constant 12 : index
      %c0_178 = arith.constant 0 : index
      %c0_179 = arith.constant 0 : index
      %259 = vector.load %arg13[%c12_177, %c0_178, %c0_179] : memref<14x22x16xf32, #tpu.memory_space<vmem>>, vector<1x22x16xf32>
      %260 = vector.shape_cast %259 : vector<1x22x16xf32> to vector<22x16xf32>
      %261 = vector.shape_cast %258 : vector<22x16xf32> to vector<1x22x16xf32>
      tpu.vector_store %arg13[%c12_177, %c0_178, %c0_179], %261 {strides = array<i32>} : memref<14x22x16xf32, #tpu.memory_space<vmem>>, vector<1x22x16xf32>,
      %262 = vector.extract_strided_slice %209 {offsets = [0, 6], sizes = [22, 16], strides = [1, 1]} : vector<22x22xf32> to vector<22x16xf32>
      %c13_180 = arith.constant 13 : index
      %c0_181 = arith.constant 0 : index
      %c0_182 = arith.constant 0 : index
      %263 = vector.load %arg13[%c13_180, %c0_181, %c0_182] : memref<14x22x16xf32, #tpu.memory_space<vmem>>, vector<1x22x16xf32>
      %264 = vector.shape_cast %263 : vector<1x22x16xf32> to vector<22x16xf32>
      %265 = vector.shape_cast %262 : vector<22x16xf32> to vector<1x22x16xf32>
      tpu.vector_store %arg13[%c13_180, %c0_181, %c0_182], %265 {strides = array<i32>} : memref<14x22x16xf32, #tpu.memory_space<vmem>>, vector<1x22x16xf32>,
      %cst_183 = arith.constant 0.000000e+00 : f32
      %266 = vector.broadcast %cst_183 : f32 to vector<16x16xf32>
      %c0_i32_184 = arith.constant 0 : i32
      %c7_i32_185 = arith.constant 7 : i32
      %267 = arith.addi %c0_i32_184, %c7_i32_185 : i32
      %c1_i32_186 = arith.constant 1 : i32
      %268 = scf.for %arg14 = %c0_i32_184 to %267 step %c1_i32_186 iter_args(%arg15 = %266) -> (vector<16x16xf32>)  : i32 {
        %c7_i32_194 = arith.constant 7 : i32
        %282 = arith.muli %arg14, %c7_i32_194 : i32
        %c0_i32_195 = arith.constant 0 : i32
        %283 = arith.addi %c0_i32_195, %282 : i32
        %c0_i32_196 = arith.constant 0 : i32
        %284 = arith.addi %283, %c0_i32_196 : i32
        %285 = arith.index_cast %284 : i32 to index
        %286 = memref.load %arg3[%285] : memref<297xf32, #tpu.memory_space<smem>>
        %c0_197 = arith.constant 0 : index
        %287 = arith.index_cast %arg14 : i32 to index
        %c0_198 = arith.constant 0 : index
        %288 = vector.load %arg13[%c0_197, %287, %c0_198] : memref<14x22x16xf32, #tpu.memory_space<vmem>>, vector<1x16x16xf32>
        %289 = vector.shape_cast %288 : vector<1x16x16xf32> to vector<16x16xf32>
        %290 = vector.broadcast %286 : f32 to vector<16x16xf32>
        %291 = arith.mulf %290, %289 : vector<16x16xf32>
        %292 = arith.addf %arg15, %291 : vector<16x16xf32>
        %c7_i32_199 = arith.constant 7 : i32
        %293 = arith.muli %arg14, %c7_i32_199 : i32
        %c0_i32_200 = arith.constant 0 : i32
        %294 = arith.addi %c0_i32_200, %293 : i32
        %c1_i32_201 = arith.constant 1 : i32
        %295 = arith.addi %294, %c1_i32_201 : i32
        %296 = arith.index_cast %295 : i32 to index
        %297 = memref.load %arg3[%296] : memref<297xf32, #tpu.memory_space<smem>>
        %c1_202 = arith.constant 1 : index
        %298 = arith.index_cast %arg14 : i32 to index
        %c0_203 = arith.constant 0 : index
        %299 = vector.load %arg13[%c1_202, %298, %c0_203] : memref<14x22x16xf32, #tpu.memory_space<vmem>>, vector<1x16x16xf32>
        %300 = vector.shape_cast %299 : vector<1x16x16xf32> to vector<16x16xf32>
        %301 = vector.broadcast %297 : f32 to vector<16x16xf32>
        %302 = arith.mulf %301, %300 : vector<16x16xf32>
        %303 = arith.addf %292, %302 : vector<16x16xf32>
        %c7_i32_204 = arith.constant 7 : i32
        %304 = arith.muli %arg14, %c7_i32_204 : i32
        %c0_i32_205 = arith.constant 0 : i32
        %305 = arith.addi %c0_i32_205, %304 : i32
        %c2_i32 = arith.constant 2 : i32
        %306 = arith.addi %305, %c2_i32 : i32
        %307 = arith.index_cast %306 : i32 to index
        %308 = memref.load %arg3[%307] : memref<297xf32, #tpu.memory_space<smem>>
        %c2_206 = arith.constant 2 : index
        %309 = arith.index_cast %arg14 : i32 to index
        %c0_207 = arith.constant 0 : index
        %310 = vector.load %arg13[%c2_206, %309, %c0_207] : memref<14x22x16xf32, #tpu.memory_space<vmem>>, vector<1x16x16xf32>
        %311 = vector.shape_cast %310 : vector<1x16x16xf32> to vector<16x16xf32>
        %312 = vector.broadcast %308 : f32 to vector<16x16xf32>
        %313 = arith.mulf %312, %311 : vector<16x16xf32>
        %314 = arith.addf %303, %313 : vector<16x16xf32>
        %c7_i32_208 = arith.constant 7 : i32
        %315 = arith.muli %arg14, %c7_i32_208 : i32
        %c0_i32_209 = arith.constant 0 : i32
        %316 = arith.addi %c0_i32_209, %315 : i32
        %c3_i32 = arith.constant 3 : i32
        %317 = arith.addi %316, %c3_i32 : i32
        %318 = arith.index_cast %317 : i32 to index
        %319 = memref.load %arg3[%318] : memref<297xf32, #tpu.memory_space<smem>>
        %c3_210 = arith.constant 3 : index
        %320 = arith.index_cast %arg14 : i32 to index
        %c0_211 = arith.constant 0 : index
        %321 = vector.load %arg13[%c3_210, %320, %c0_211] : memref<14x22x16xf32, #tpu.memory_space<vmem>>, vector<1x16x16xf32>
        %322 = vector.shape_cast %321 : vector<1x16x16xf32> to vector<16x16xf32>
        %323 = vector.broadcast %319 : f32 to vector<16x16xf32>
        %324 = arith.mulf %323, %322 : vector<16x16xf32>
        %325 = arith.addf %314, %324 : vector<16x16xf32>
        %c7_i32_212 = arith.constant 7 : i32
        %326 = arith.muli %arg14, %c7_i32_212 : i32
        %c0_i32_213 = arith.constant 0 : i32
        %327 = arith.addi %c0_i32_213, %326 : i32
        %c4_i32_214 = arith.constant 4 : i32
        %328 = arith.addi %327, %c4_i32_214 : i32
        %329 = arith.index_cast %328 : i32 to index
        %330 = memref.load %arg3[%329] : memref<297xf32, #tpu.memory_space<smem>>
        %c4_215 = arith.constant 4 : index
        %331 = arith.index_cast %arg14 : i32 to index
        %c0_216 = arith.constant 0 : index
        %332 = vector.load %arg13[%c4_215, %331, %c0_216] : memref<14x22x16xf32, #tpu.memory_space<vmem>>, vector<1x16x16xf32>
        %333 = vector.shape_cast %332 : vector<1x16x16xf32> to vector<16x16xf32>
        %334 = vector.broadcast %330 : f32 to vector<16x16xf32>
        %335 = arith.mulf %334, %333 : vector<16x16xf32>
        %336 = arith.addf %325, %335 : vector<16x16xf32>
        %c7_i32_217 = arith.constant 7 : i32
        %337 = arith.muli %arg14, %c7_i32_217 : i32
        %c0_i32_218 = arith.constant 0 : i32
        %338 = arith.addi %c0_i32_218, %337 : i32
        %c5_i32 = arith.constant 5 : i32
        %339 = arith.addi %338, %c5_i32 : i32
        %340 = arith.index_cast %339 : i32 to index
        %341 = memref.load %arg3[%340] : memref<297xf32, #tpu.memory_space<smem>>
        %c5_219 = arith.constant 5 : index
        %342 = arith.index_cast %arg14 : i32 to index
        %c0_220 = arith.constant 0 : index
        %343 = vector.load %arg13[%c5_219, %342, %c0_220] : memref<14x22x16xf32, #tpu.memory_space<vmem>>, vector<1x16x16xf32>
        %344 = vector.shape_cast %343 : vector<1x16x16xf32> to vector<16x16xf32>
        %345 = vector.broadcast %341 : f32 to vector<16x16xf32>
        %346 = arith.mulf %345, %344 : vector<16x16xf32>
        %347 = arith.addf %336, %346 : vector<16x16xf32>
        %c7_i32_221 = arith.constant 7 : i32
        %348 = arith.muli %arg14, %c7_i32_221 : i32
        %c0_i32_222 = arith.constant 0 : i32
        %349 = arith.addi %c0_i32_222, %348 : i32
        %c6_i32 = arith.constant 6 : i32
        %350 = arith.addi %349, %c6_i32 : i32
        %351 = arith.index_cast %350 : i32 to index
        %352 = memref.load %arg3[%351] : memref<297xf32, #tpu.memory_space<smem>>
        %c6_223 = arith.constant 6 : index
        %353 = arith.index_cast %arg14 : i32 to index
        %c0_224 = arith.constant 0 : index
        %354 = vector.load %arg13[%c6_223, %353, %c0_224] : memref<14x22x16xf32, #tpu.memory_space<vmem>>, vector<1x16x16xf32>
        %355 = vector.shape_cast %354 : vector<1x16x16xf32> to vector<16x16xf32>
        %356 = vector.broadcast %352 : f32 to vector<16x16xf32>
        %357 = arith.mulf %356, %355 : vector<16x16xf32>
        %358 = arith.addf %347, %357 : vector<16x16xf32>
        %c7_i32_225 = arith.constant 7 : i32
        %359 = arith.muli %arg14, %c7_i32_225 : i32
        %c49_i32 = arith.constant 49 : i32
        %360 = arith.addi %c49_i32, %359 : i32
        %c0_i32_226 = arith.constant 0 : i32
        %361 = arith.addi %360, %c0_i32_226 : i32
        %362 = arith.index_cast %361 : i32 to index
        %363 = memref.load %arg3[%362] : memref<297xf32, #tpu.memory_space<smem>>
        %c7_227 = arith.constant 7 : index
        %364 = arith.index_cast %arg14 : i32 to index
        %c0_228 = arith.constant 0 : index
        %365 = vector.load %arg13[%c7_227, %364, %c0_228] : memref<14x22x16xf32, #tpu.memory_space<vmem>>, vector<1x16x16xf32>
        %366 = vector.shape_cast %365 : vector<1x16x16xf32> to vector<16x16xf32>
        %367 = vector.broadcast %363 : f32 to vector<16x16xf32>
        %368 = arith.mulf %367, %366 : vector<16x16xf32>
        %369 = arith.addf %358, %368 : vector<16x16xf32>
        %c7_i32_229 = arith.constant 7 : i32
        %370 = arith.muli %arg14, %c7_i32_229 : i32
        %c49_i32_230 = arith.constant 49 : i32
        %371 = arith.addi %c49_i32_230, %370 : i32
        %c1_i32_231 = arith.constant 1 : i32
        %372 = arith.addi %371, %c1_i32_231 : i32
        %373 = arith.index_cast %372 : i32 to index
        %374 = memref.load %arg3[%373] : memref<297xf32, #tpu.memory_space<smem>>
        %c8_232 = arith.constant 8 : index
        %375 = arith.index_cast %arg14 : i32 to index
        %c0_233 = arith.constant 0 : index
        %376 = vector.load %arg13[%c8_232, %375, %c0_233] : memref<14x22x16xf32, #tpu.memory_space<vmem>>, vector<1x16x16xf32>
        %377 = vector.shape_cast %376 : vector<1x16x16xf32> to vector<16x16xf32>
        %378 = vector.broadcast %374 : f32 to vector<16x16xf32>
        %379 = arith.mulf %378, %377 : vector<16x16xf32>
        %380 = arith.addf %369, %379 : vector<16x16xf32>
        %c7_i32_234 = arith.constant 7 : i32
        %381 = arith.muli %arg14, %c7_i32_234 : i32
        %c49_i32_235 = arith.constant 49 : i32
        %382 = arith.addi %c49_i32_235, %381 : i32
        %c2_i32_236 = arith.constant 2 : i32
        %383 = arith.addi %382, %c2_i32_236 : i32
        %384 = arith.index_cast %383 : i32 to index
        %385 = memref.load %arg3[%384] : memref<297xf32, #tpu.memory_space<smem>>
        %c9_237 = arith.constant 9 : index
        %386 = arith.index_cast %arg14 : i32 to index
        %c0_238 = arith.constant 0 : index
        %387 = vector.load %arg13[%c9_237, %386, %c0_238] : memref<14x22x16xf32, #tpu.memory_space<vmem>>, vector<1x16x16xf32>
        %388 = vector.shape_cast %387 : vector<1x16x16xf32> to vector<16x16xf32>
        %389 = vector.broadcast %385 : f32 to vector<16x16xf32>
        %390 = arith.mulf %389, %388 : vector<16x16xf32>
        %391 = arith.addf %380, %390 : vector<16x16xf32>
        %c7_i32_239 = arith.constant 7 : i32
        %392 = arith.muli %arg14, %c7_i32_239 : i32
        %c49_i32_240 = arith.constant 49 : i32
        %393 = arith.addi %c49_i32_240, %392 : i32
        %c3_i32_241 = arith.constant 3 : i32
        %394 = arith.addi %393, %c3_i32_241 : i32
        %395 = arith.index_cast %394 : i32 to index
        %396 = memref.load %arg3[%395] : memref<297xf32, #tpu.memory_space<smem>>
        %c10_242 = arith.constant 10 : index
        %397 = arith.index_cast %arg14 : i32 to index
        %c0_243 = arith.constant 0 : index
        %398 = vector.load %arg13[%c10_242, %397, %c0_243] : memref<14x22x16xf32, #tpu.memory_space<vmem>>, vector<1x16x16xf32>
        %399 = vector.shape_cast %398 : vector<1x16x16xf32> to vector<16x16xf32>
        %400 = vector.broadcast %396 : f32 to vector<16x16xf32>
        %401 = arith.mulf %400, %399 : vector<16x16xf32>
        %402 = arith.addf %391, %401 : vector<16x16xf32>
        %c7_i32_244 = arith.constant 7 : i32
        %403 = arith.muli %arg14, %c7_i32_244 : i32
        %c49_i32_245 = arith.constant 49 : i32
        %404 = arith.addi %c49_i32_245, %403 : i32
        %c4_i32_246 = arith.constant 4 : i32
        %405 = arith.addi %404, %c4_i32_246 : i32
        %406 = arith.index_cast %405 : i32 to index
        %407 = memref.load %arg3[%406] : memref<297xf32, #tpu.memory_space<smem>>
        %c11_247 = arith.constant 11 : index
        %408 = arith.index_cast %arg14 : i32 to index
        %c0_248 = arith.constant 0 : index
        %409 = vector.load %arg13[%c11_247, %408, %c0_248] : memref<14x22x16xf32, #tpu.memory_space<vmem>>, vector<1x16x16xf32>
        %410 = vector.shape_cast %409 : vector<1x16x16xf32> to vector<16x16xf32>
        %411 = vector.broadcast %407 : f32 to vector<16x16xf32>
        %412 = arith.mulf %411, %410 : vector<16x16xf32>
        %413 = arith.addf %402, %412 : vector<16x16xf32>
        %c7_i32_249 = arith.constant 7 : i32
        %414 = arith.muli %arg14, %c7_i32_249 : i32
        %c49_i32_250 = arith.constant 49 : i32
        %415 = arith.addi %c49_i32_250, %414 : i32
        %c5_i32_251 = arith.constant 5 : i32
        %416 = arith.addi %415, %c5_i32_251 : i32
        %417 = arith.index_cast %416 : i32 to index
        %418 = memref.load %arg3[%417] : memref<297xf32, #tpu.memory_space<smem>>
        %c12_252 = arith.constant 12 : index
        %419 = arith.index_cast %arg14 : i32 to index
        %c0_253 = arith.constant 0 : index
        %420 = vector.load %arg13[%c12_252, %419, %c0_253] : memref<14x22x16xf32, #tpu.memory_space<vmem>>, vector<1x16x16xf32>
        %421 = vector.shape_cast %420 : vector<1x16x16xf32> to vector<16x16xf32>
        %422 = vector.broadcast %418 : f32 to vector<16x16xf32>
        %423 = arith.mulf %422, %421 : vector<16x16xf32>
        %424 = arith.addf %413, %423 : vector<16x16xf32>
        %c7_i32_254 = arith.constant 7 : i32
        %425 = arith.muli %arg14, %c7_i32_254 : i32
        %c49_i32_255 = arith.constant 49 : i32
        %426 = arith.addi %c49_i32_255, %425 : i32
        %c6_i32_256 = arith.constant 6 : i32
        %427 = arith.addi %426, %c6_i32_256 : i32
        %428 = arith.index_cast %427 : i32 to index
        %429 = memref.load %arg3[%428] : memref<297xf32, #tpu.memory_space<smem>>
        %c13_257 = arith.constant 13 : index
        %430 = arith.index_cast %arg14 : i32 to index
        %c0_258 = arith.constant 0 : index
        %431 = vector.load %arg13[%c13_257, %430, %c0_258] : memref<14x22x16xf32, #tpu.memory_space<vmem>>, vector<1x16x16xf32>
        %432 = vector.shape_cast %431 : vector<1x16x16xf32> to vector<16x16xf32>
        %433 = vector.broadcast %429 : f32 to vector<16x16xf32>
        %434 = arith.mulf %433, %432 : vector<16x16xf32>
        %435 = arith.addf %424, %434 : vector<16x16xf32>
        scf.yield %435 : vector<16x16xf32>
      }
      %c7_i32_187 = arith.constant 7 : i32
      %c294 = arith.constant 294 : index
      %269 = memref.load %arg3[%c294] : memref<297xf32, #tpu.memory_space<smem>>
      %270 = vector.broadcast %269 : f32 to vector<16x16xf32>
      %271 = arith.addf %268, %270 : vector<16x16xf32>
      %cst_188 = arith.constant 5.000000e-01 : f32
      %272 = vector.broadcast %cst_188 : f32 to vector<16x16xf32>
      %273 = arith.mulf %272, %271 : vector<16x16xf32>
      %274 = math.tanh %273 : vector<16x16xf32>
      %cst_189 = arith.constant 1.000000e+00 : f32
      %275 = vector.broadcast %cst_189 : f32 to vector<16x16xf32>
      %276 = arith.addf %274, %275 : vector<16x16xf32>
      %cst_190 = arith.constant 5.000000e-01 : f32
      %277 = vector.broadcast %cst_190 : f32 to vector<16x16xf32>
      %278 = arith.mulf %277, %276 : vector<16x16xf32>
      %c0_191 = arith.constant 0 : index
      %c0_192 = arith.constant 0 : index
      %c0_193 = arith.constant 0 : index
      %279 = vector.load %arg4[%c0_191, %c0_192, %c0_193] : memref<1x16x16xf32, #tpu.memory_space<vmem>>, vector<1x16x16xf32>
      %280 = vector.shape_cast %279 : vector<1x16x16xf32> to vector<16x16xf32>
      %281 = vector.shape_cast %278 : vector<16x16xf32> to vector<1x16x16xf32>
      tpu.vector_store %arg4[%c0_191, %c0_192, %c0_193], %281 {strides = array<i32>} : memref<1x16x16xf32, #tpu.memory_space<vmem>>, vector<1x16x16xf32>,
    } else {
    }
    return
  }
  func.func @transform_0(%arg0: i32, %arg1: i32) -> (i32, i32, i32, i32) {
    %c0_i32 = arith.constant 0 : i32
    %c0_i32_0 = arith.constant 0 : i32
    %c0_i32_1 = arith.constant 0 : i32
    return %arg0, %arg1, %c0_i32, %c0_i32_0 : i32, i32, i32, i32
  }
  func.func @transform_1(%arg0: i32, %arg1: i32) -> i32 {
    %c0_i32 = arith.constant 0 : i32
    %c0_i32_0 = arith.constant 0 : i32
    return %c0_i32 : i32
  }
  func.func @transform_2(%arg0: i32, %arg1: i32) -> (i32, i32, i32) {
    %c0_i32 = arith.constant 0 : i32
    %c0_i32_0 = arith.constant 0 : i32
    %c0_i32_1 = arith.constant 0 : i32
    return %arg0, %c0_i32, %c0_i32_0 : i32, i32, i32
  }
  func.func @transform_3(%arg0: i32, %arg1: i32) -> (i32, i32, i32) {
    %c0_i32 = arith.constant 0 : i32
    %c0_i32_0 = arith.constant 0 : i32
    %c0_i32_1 = arith.constant 0 : i32
    return %arg0, %c0_i32, %c0_i32_0 : i32, i32, i32
  }
  func.func @transform_4(%arg0: i32, %arg1: i32) -> (i32, i32, i32) {
    %c0_i32 = arith.constant 0 : i32
    %c0_i32_0 = arith.constant 0 : i32
    %c0_i32_1 = arith.constant 0 : i32
    return %arg0, %c0_i32, %c0_i32_0 : i32, i32, i32
  }
}

</mosaic_0001>

<bundles_post_ra>
// kernel: tpu_custom_call.1
= control target key start
LH: loop header
LB: loop body
LE: loop exit
PB: predicated region body
PF: predicated region fallthrough
CT: control target
= control target key end

     0   :  { %s3193_s0 = inlined_call_operand.hbm [shape: f32[2,4,16,16], index: 0, kind: input, shape index: {}]   ;;  %s3194_s1 = inlined_call_operand.hbm [shape: f32[297], index: 1, kind: input, shape index: {}]   ;;  %s3195_s2 = inlined_call_operand.hbm [shape: f32[2,16,16], index: 2, kind: output, shape index: {0}]   ;;  %s3196_s3 = inlined_call_operand.hbm [shape: f32[2,4,16], index: 3, kind: output, shape index: {1}]   ;;  %s3197_s4 = inlined_call_operand.hbm [shape: f32[2,4,16], index: 4, kind: output, shape index: {2}]  }
   0x1   :  { %3226 = sst [smem:[#allocation24_spill]] %s3193_s0 }
   0x2   :  { %3227 = sst [smem:[#allocation25_spill]] %s3194_s1 }
   0x3   :  { %10 = vsyncpa [#allocation10], 0 }
   0x4   :  { %12 = vsyncpa [#allocation10 + $0x1], 0 }
   0x5   :  { %13 = vsyncpa [#allocation12], 0 }
   0x6   :  { %14 = vsyncpa [#allocation11], 0 }
   0x7   :  { %16 = vsyncpa [#allocation11 + $0x1], 0 }
   0x8   :  { %17 = vsyncpa [#allocation16], 0 }
   0x9   :  { %19 = vsyncpa [#allocation16 + $0x1], 0  ;;  %s2274_s15 = smov 0   ;;  %s2276_s16 = smov 0  }
   0xa   :  { %s2278_s17 = smov 0   ;;  %s2280_s18 = smov 0  }
   0xb   :  { %s2282_s19 = smov 0   ;;  %s2284_s20 = smov 0  }
   0xc LB: > { %3228 = sst [smem:[#allocation22_spill]] %s2197_s19  ;;  %s2305_s21 = sadd.s32 4294967295, %s2201_s20   ;;  %s2201_s20 = sphi %s2284_s20, %s25_s20   ;;  %s2197_s19 = sphi %s2282_s19, %s3269_s19   ;;  %s2193_s18 = sphi %s2280_s18, %s3268_s18   ;;  %s2189_s17 = sphi %s2278_s17, %s3272_s17   ;;  %s2185_s16 = sphi %s2276_s16, %s3271_s16   ;;  %s2181_s15 = sphi %s2274_s15, %s3270_s15  }
   0xd   : > { %s3199_s22 = sadd.s32 4294967294, %s2201_s20   ;;  %p53_p0 = scmp.ne.s32.totalorder %s2189_s17, %s2185_s16 }
   0xe   : > { %p54_p1 = scmp.eq.s32.totalorder %s2201_s20, 0  ;;  %p59_p2 = scmp.ne.s32.totalorder %s2185_s16, %s2181_s15 }
   0xf   : > { %p3198_p3 = scmp.eq.s32.totalorder %s2305_s21, 0  ;;  %p104_p4 = scmp.eq.s32.totalorder %s2305_s21, 1 }
  0x10   : > { %p55_p5 = por %p54_p1, %p53_p0  ;;  %p110_p6 = scmp.eq.s32.totalorder %s3199_s22, 1 }
  0x11   : > { %p2320_p7 = por %p3198_p3, %p59_p2  ;;  %p2324_p8 = por %p104_p4, %p53_p0 }
  0x12   : > { %p2328_p9 = por %p110_p6, %p59_p2  ;;  %p1746_p10 = scmp.ge.s32.totalorder %s2201_s20, 1 }
  0x13   : > { %s3229_s24 = scalar_select %p2320_p7, 1, 0 }
  0x14   : > { %s3230_s25 = scalar_select %p2324_p8, 1, 0 }
  0x15   : > { %s3231_s26 = scalar_select %p2328_p9, 1, 0 }
  0x16   : > { %p169_p11 = scmp.lt.s32.totalorder %s2201_s20, 3  ;;  %p1855_p1 = scmp.lt.s32.totalorder %s2201_s20, 2 }
  0x17   : > { %s3200_s28 = sand.u32 1, %s2189_s17   ;;  %p3234_p2 = scmp.eq.s32.totalorder %s2305_s21, 0 }
  0x18   : > { %p2335_p13 = pnand %p1746_p10, %p169_p11  ;;  %p2343_p0 = pnand %p1855_p1, %p55_p5 }
  0x19   : > { %s37_s5 = sadd.s32 1, %s2197_s19  ;;  %s1749_s6 = sshll.u32 %s3200_s28, 6 }
  0x1a   : > { %p1836_p3 = pneg %p2335_p13  ;;  %p2356_p6 = scmp.ge.s32.totalorder %s37_s5, 2 }
  0x1b   : > { %s3237_s1 = sld [smem:[#allocation25_spill]] }
  0x1c   : > { %p2349_p4 = pnand %p1836_p3, %p3234_p2 }
  0x1e   : > { %p1986_p3 = pneg %p2349_p4 }
  0x21   : > { %s1984_s10 = scalar_lea.hbm %s3237_s1, 48  ;;  %s1989_s22 = scalar_lea.hbm %s3237_s1, 64 }
  0x22   : > { %p1985_p5 = scmp.ne.s32.totalorder %s3237_s1, %s1984_s10  ;;  %p1990_p1 = scmp.lt.u32.totalorder %s1989_s22, %s1984_s10 }
  0x23   : > { %p1991_p2 = scmp.lt.u32.totalorder %s1984_s10, %s3237_s1 }
  0x24   : > { %p1987_p10 = pnand %p1986_p3, %p1985_p5 }
  0x25   : > { %p1992_p12 = por %p1991_p2, %p1990_p1 }
  0x26   : > { %p1988_p11 = pneg %p1987_p10 }
  0x28   : > { %p1993_p9 = pnand %p1992_p12, %p1988_p11 }
  0x2a   : > { %1996 = shalt.err (!%p1993_p9)
}
  0x2b   : > { %s2231_s8 = smov [#allocation13]   ;;  %s3274_s5 = smov (%p2356_p6, %s37_s5), 0 }
  0x2c   : > { %1839 = dma.hbm_to_smem (!%p2349_p4), %s3237_s1, 48, %s2231_s8, [#allocation12]  }
  0x2d   : > { %3238 = sst [smem:[#allocation23_spill]] %s3274_s5  ;;  %s1822_s22 = sshll.u32 %s2197_s19, 10 }
  0x2e   : > { %s41_s23 = ssub.s32 %s2197_s19, %s3274_s5  ;;  %s3239_s0 = sld [smem:[#allocation24_spill]] }
  0x2f   : > { %p44_p9 = scmp.eq.s32.totalorder %s41_s23, 0  ;;  %s195_s12 = scalar_lea.vmem [#allocation9], %s1749_s6 }
  0x30   : > { %s205_s13 = sshll.u32 %s195_s12, 4  ;;  %s3240_s7 = sadd.s32 1, %s2189_s17  ;;  %s2391_s13 = int_to_ptr.vmem [resolvable:$true] %s205_s13 }
  0x31   : > { %s2396_s14 = scalar_select %p44_p9, %s2189_s17, %s3240_s7  }
  0x32   : > { %s3241_s8 = sand.u32 1, %s2189_s17   ;;  %p1999_p4 = pneg %p2343_p0 }
  0x33   : > { %s2400_s9 = scalar_lea.sflag [#allocation10], %s3241_s8 }
  0x34   : > { %s2389_s10 = scalar_lea.hbm %s3239_s0, %s1822_s22  ;;  %s2002_s6 = scalar_lea.hbm %s3239_s0, 2048 }
  0x35   : > { %s1997_s11 = scalar_lea.hbm %s2389_s10, 1024  ;;  %p2003_p3 = scmp.lt.u32.totalorder %s2389_s10, %s3239_s0 }
  0x36   : > { %p1998_p12 = scmp.ne.s32.totalorder %s2389_s10, %s1997_s11  ;;  %p2004_p10 = scmp.lt.u32.totalorder %s2002_s6, %s1997_s11 }
  0x37   : > { %p2006_p1 = scmp.lt.u32.totalorder %s1997_s11, %s2389_s10 }
  0x38   : > { %p2000_p6 = pnand %p1999_p4, %p1998_p12  ;;  %p2005_p11 = por %p2004_p10, %p2003_p3 }
  0x3a   : > { %p2001_p5 = pneg %p2000_p6  ;;  %p2007_p2 = por %p2006_p1, %p2005_p11 }
  0x3c   : > { %p2008_p9 = pnand %p2007_p2, %p2001_p5 }
  0x3e   : > { %2011 = shalt.err (!%p2008_p9)
}
  0x3f   : > { %s2012_s12 = scalar_lea.vmem %s2391_s13, 1024  ;;  %s2232_s7 = smov [#allocation9]  }
  0x40   : > { %p2013_p12 = scmp.ne.s32.totalorder %s2391_s13, %s2012_s12  ;;  %s2017_s8 = sshll.u32 %s2232_s7, 4  ;;  %s2018_s8 = int_to_ptr.vmem [resolvable:$false] %s2017_s8 }
  0x41   : > { %s2019_s22 = scalar_lea.vmem %s2018_s8, 2048  ;;  %p2020_p7 = scmp.lt.s32.totalorder %s2391_s13, %s2018_s8 }
  0x42   : > { %p2015_p6 = pnand %p2013_p12, %p1999_p4  ;;  %p2021_p3 = scmp.lt.s32.totalorder %s2019_s22, %s2012_s12 }
  0x44   : > { %p2016_p8 = pneg %p2015_p6  ;;  %p2022_p10 = por %p2021_p3, %p2020_p7 }
  0x46   : > { %p2023_p11 = pnand %p2022_p10, %p2016_p8 }
  0x48   : > { %2026 = shalt.err (!%p2023_p11)
}
  0x49   : > { %s2233_s11 = smov 128   ;;  %s2234_s23 = smov 8  }
  0x4a   : > { %1843 = dma.hbm_to_vmem [thread:$0]  (!%p2343_p0), %s2389_s10, 1024, %s2391_s13, %s2400_s9, %s2233_s11, %s2233_s11, %s2234_s23  }
  0x4b   : > { %217 = sbr.rel (%p2335_p13) target bundleno = 1138 (0x472), region = 28  ;;  %s2431_s6 = sand.u32 (!%p2335_p13), 1, %s2185_s16  }
  0x4c   : > { %s1753_s28 = sshll.u32 (!%p2335_p13), %s2431_s6, 6  ;;  %s220_s30 = scalar_lea.sflag (!%p2335_p13), [#allocation10], %s2431_s6 }
  0x4d   : > { %s223_s12 = scalar_lea.vmem (!%p2335_p13), [#allocation9], %s1753_s28  ;;  %p3242_p7 = scmp.ne.s32.totalorder (!%p2335_p13), %s3229_s24, 0 }
  0x52   : > { %2164 = dma.done.wait (%p3242_p7), %s220_s30, 1024  }
  0x53   : > { %2166 = vsyncadd (%p3242_p7), %s220_s30, 4294966272  ;;  %p3243_p8 = scmp.eq.s32.totalorder %s2305_s21, 0 }
  0x55   : > { %2168 = dma.done.wait (%p3243_p8), [#allocation12], 48   ;;  %p3244_p0 = pmov %p3243_p8 }
  0x57   : > { %2170 = vsyncadd (%p3244_p0), [#allocation12], 4294967248 }
  0x58   : > { %232 = sfence }
  0x59   : > { %v264_v0 = vld [vmem:[%s223_s12] sm:$0xff]  ;;  %v2235_v1 = vmov 0.0   ;;  %s3221_s27 = smov 3   ;;  %v265_v2 = vld [vmem:[%s223_s12 + $0x8] sm:$0xff]  ;;  %v266_v3 = vld [vmem:[%s223_s12 + $0x10] sm:$0xff]  ;;  %vm276_vm0 = vcmask 130048  }
  0x5a   : > { %567 = vrot.lane.b32.xlu0 %v2235_v1, %s3221_s27  ;;  %v267_v4 = vld [vmem:[%s223_s12 + $0x18] sm:$0xff]  ;;  %v268_v5 = vld [vmem:[%s223_s12 + $0x20] sm:$0xff]  ;;  %v269_v6 = vld [vmem:[%s223_s12 + $0x28] sm:$0xff]  ;;  %v2237_v8 = vmov -inf   ;;  %279 = vst.msk [vmem:[#allocation3] sm:$0xff] %vm276_vm0, %v2235_v1  ;;  %v2449_v9 = vsel %vm276_vm0, %v264_v0, -inf }
  0x5b   : > { %v270_v7 = vld [vmem:[%s223_s12 + $0x30] sm:$0xff]  ;;  %277 = vst.msk [vmem:[#allocation2] sm:$0xff] %vm276_vm0, %v2237_v8  ;;  %278 = vst.msk [vmem:[#allocation2 + $0x8] sm:$0xff] %vm276_vm0, %v2237_v8  ;;  %v2452_v10 = vsel %vm276_vm0, %v266_v3, -inf  ;;  %v2455_v11 = vsel %vm276_vm0, %v265_v2, -inf  ;;  %v271_v12 = vld [vmem:[%s223_s12 + $0x38] sm:$0xff] }
  0x5c   : > { %280 = vst.msk [vmem:[#allocation3 + $0x8] sm:$0xff] %vm276_vm0, %v2235_v1  ;;  %v2458_v13 = vsel %vm276_vm0, %v268_v5, -inf  ;;  %v2461_v14 = vsel %vm276_vm0, %v270_v7, -inf  ;;  %v2464_v15 = vsel %vm276_vm0, %v267_v4, -inf  ;;  %v2467_v16 = vsel %vm276_vm0, %v269_v6, -inf  ;;  %s3209_s24 = smov 126  }
  0x5d   : > { %v287_v17 = vmax.f32 %v2449_v9, %v2458_v13  ;;  %v289_v18 = vmax.f32 %v2452_v10, %v2461_v14  ;;  %v294_v19 = vmax.f32 %v2455_v11, %v2467_v16  ;;  %v2476_v20 = vsel %vm276_vm0, %v271_v12, -inf  ;;  %s3218_s29 = smov 125   ;;  %s3215_s10 = smov 127  }
  0x5e   : > { %v296_v21 = vmax.f32 %v2464_v15, %v2476_v20  ;;  %v2481_v22 = vsel %vm276_vm0, %v264_v0, 0.0  ;;  %v2484_v23 = vsel %vm276_vm0, %v266_v3, 0.0  ;;  %v2487_v24 = vsel %vm276_vm0, %v268_v5, 0.0  ;;  %s3206_s13 = smov 124   ;;  %s3212_s9 = smov 123  }
  0x5f   : > { %v290_v25 = vmax.f32 %v287_v17, %v289_v18  ;;  %v306_v26 = vadd.f32 %v2484_v23, %v2481_v22  ;;  %v2492_v27 = vsel %vm276_vm0, %v270_v7, 0.0  ;;  %v2495_v28 = vsel %vm276_vm0, %v265_v2, 0.0  ;;  %s3203_s7 = smov 122   ;;  %s1755_s8 = sshll.u32 %s2431_s6, 4 }
  0x60   : > { %v297_v29 = vmax.f32 %v294_v19, %v296_v21  ;;  %v2498_v30 = vsel %vm276_vm0, %v267_v4, 0.0  ;;  %v2501_v31 = vsel %vm276_vm0, %v269_v6, 0.0  ;;  %v2504_v32 = vsel %vm276_vm0, %v271_v12, 0.0  ;;  %s1756_s22 = sshll.u32 %s2431_s6, 2  ;;  %s2668_s11 = scalar_lea.vmem [#allocation14], %s1755_s8 }
  0x61   : > { %v308_v33 = vadd.f32 %v2487_v24, %v306_v26  ;;  %v313_v34 = vadd.f32 %v2498_v30, %v2495_v28  ;;  %v323_v35 = vmax.f32 %v2449_v9, %v2455_v11  ;;  %v330_v36 = vmax.f32 %v2452_v10, %v2464_v15  ;;  %v302_v39 = vld [vmem:[#allocation3] sm:$0xff]  ;;  %s2672_s23 = scalar_lea.vmem [#allocation15], %s1756_s22  ;;  %s2676_s28 = scalar_lea.vmem [#allocation17], %s1756_s22 }
  0x62   : > { %v281_v37 = vld [vmem:[#allocation2] sm:$0xff]  ;;  %v282_v38 = vld [vmem:[#allocation2 + $0x8] sm:$0xff]  ;;  %v337_v40 = vmax.f32 %v2458_v13, %v2467_v16  ;;  %v344_v41 = vmax.f32 %v2461_v14, %v2476_v20  ;;  %v365_v42 = vadd.f32 %v2495_v28, %v2481_v22  ;;  %v372_v43 = vadd.f32 %v2498_v30, %v2484_v23  ;;  %s2680_s30 = smov 0  }
  0x63   : > { %v298_v44 = vmax.f32 %v281_v37, %v290_v25  ;;  %v299_v45 = vmax.f32 %v282_v38, %v297_v29  ;;  %v310_v46 = vadd.f32 %v2492_v27, %v308_v33  ;;  %v315_v47 = vadd.f32 %v2501_v31, %v313_v34  ;;  %v303_v48 = vld [vmem:[#allocation3 + $0x8] sm:$0xff] }
  0x64   : > { %v324_v49 = vrot.slane %v323_v35, 4  ;;  %v331_v50 = vrot.slane %v330_v36, 4  ;;  %v338_v51 = vrot.slane %v337_v40, 4  ;;  %v345_v52 = vrot.slane %v344_v41, 4 }
  0x65   : > { %vm355_vm1 = vcmask 1041409   ;;  %300 = vst.msk [vmem:[#allocation2] sm:$0xff] %vm276_vm0, %v298_v44  ;;  %301 = vst.msk [vmem:[#allocation2 + $0x8] sm:$0xff] %vm276_vm0, %v299_v45  ;;  %v317_v53 = vadd.f32 %v2504_v32, %v315_v47  ;;  %v318_v54 = vadd.f32 %v310_v46, %v302_v39  ;;  %v366_v55 = vrot.slane %v365_v42, 4 }
  0x66   : > { %v373_v56 = vrot.slane %v372_v43, 4  ;;  %vm357_vm2 = vcmask 1042434   ;;  %v325_v57 = vmax.f32 %v323_v35, %v324_v49  ;;  %v332_v58 = vmax.f32 %v330_v36, %v331_v50 }
  0x67   : > { %v339_v59 = vmax.f32 %v337_v40, %v338_v51  ;;  %v346_v60 = vmax.f32 %v344_v41, %v345_v52  ;;  %vm359_vm3 = vcmask 1043459   ;;  %v319_v61 = vadd.f32 %v317_v53, %v303_v48  ;;  %320 = vst.msk [vmem:[#allocation3] sm:$0xff] %vm276_vm0, %v318_v54 }
  0x68   : > { %v367_v62 = vadd.f32 %v366_v55, %v365_v42  ;;  %v374_v63 = vadd.f32 %v373_v56, %v372_v43  ;;  %v379_v0 = vadd.f32 %v2501_v31, %v2487_v24  ;;  %v326_v1 = vrot.slane %v325_v57, 2 }
  0x69   : > { %v333_v2 = vrot.slane %v332_v58, 2  ;;  %v340_v3 = vrot.slane %v339_v59, 2  ;;  %v347_v4 = vrot.slane %v346_v60, 2  ;;  %321 = vst.msk [vmem:[#allocation3 + $0x8] sm:$0xff] %vm276_vm0, %v319_v61  ;;  %v386_v8 = vadd.f32 %v2504_v32, %v2492_v27 }
  0x6a   : > { %v368_v5 = vrot.slane %v367_v62, 2  ;;  %v375_v6 = vrot.slane %v374_v63, 2  ;;  %v380_v7 = vrot.slane %v379_v0, 4  ;;  %v327_v12 = vmax.f32 %v325_v57, %v326_v1 }
  0x6b   : > { %v334_v17 = vmax.f32 %v332_v58, %v333_v2  ;;  %v341_v18 = vmax.f32 %v339_v59, %v340_v3  ;;  %v348_v19 = vmax.f32 %v346_v60, %v347_v4  ;;  %v387_v29 = vrot.slane %v386_v8, 4 }
  0x6c   : > { %v369_v21 = vadd.f32 %v368_v5, %v367_v62  ;;  %v376_v25 = vadd.f32 %v375_v6, %v374_v63  ;;  %v381_v26 = vadd.f32 %v380_v7, %v379_v0  ;;  %v328_v33 = vrot.slane %v327_v12, 1 }
  0x6d   : > { %v335_v34 = vrot.slane %v334_v17, 1  ;;  %v342_v35 = vrot.slane %v341_v18, 1  ;;  %v349_v36 = vrot.slane %v348_v19, 1  ;;  %v388_v40 = vadd.f32 %v387_v29, %v386_v8 }
  0x6e   : > { %v370_v37 = vrot.slane %v369_v21, 1  ;;  %v377_v38 = vrot.slane %v376_v25, 1  ;;  %v382_v39 = vrot.slane %v381_v26, 2  ;;  %v329_v41 = vmax.f32 %v327_v12, %v328_v33 }
  0x6f   : > { %v336_v42 = vmax.f32 %v334_v17, %v335_v34  ;;  %v343_v43 = vmax.f32 %v341_v18, %v342_v35  ;;  %v350_v44 = vmax.f32 %v348_v19, %v349_v36  ;;  %v389_v48 = vrot.slane %v388_v40, 2 }
  0x70   : > { %v371_v45 = vadd.f32 %v370_v37, %v369_v21  ;;  %v378_v46 = vadd.f32 %v377_v38, %v376_v25  ;;  %v383_v47 = vadd.f32 %v382_v39, %v381_v26  ;;  %vm363_vm4 = vcmask 125952  }
  0x71   : > { %v356_v49 = vsel %vm355_vm1, %v336_v42, %v329_v41  ;;  %v390_v52 = vadd.f32 %v389_v48, %v388_v40  ;;  %vm559_vm5 = vcmask 1042432   ;;  %vm561_vm6 = vcmask 1046528  }
  0x72   : > { %v358_v50 = vsel %vm357_vm2, %v343_v43, %v356_v49  ;;  %v384_v51 = vrot.slane %v383_v47, 1  ;;  %v393_v53 = vmul.f32 0.0625, %v371_v45  ;;  %v394_v55 = vmul.f32 0.0625, %v378_v46 }
  0x73   : > { %v360_v54 = vsel %vm359_vm3, %v350_v44, %v358_v50  ;;  %v391_v57 = vrot.slane %v390_v52, 1  ;;  %vm571_vm7 = vcmask 23552   ;;  %vm574_vm8 = vcmask 154624  }
  0x74   : > { %364 = vst.msk [vmem:[#allocation4] sm:$0xf] %vm363_vm4, %v360_v54  ;;  %v385_v56 = vadd.f32 %v384_v51, %v383_v47  ;;  %v401_v58 = vsel %vm355_vm1, %v394_v55, %v393_v53  ;;  %vm589_vm9 = vcmask 123904   ;;  %vm442_vm10 = vcmask 130112  }
  0x75   : > { %v392_v59 = vadd.f32 %v391_v57, %v390_v52 }
  0x76   : > { %v395_v60 = vmul.f32 0.0625, %v385_v56 }
  0x77   : > { %v396_v61 = vmul.f32 0.0625, %v392_v59 }
  0x78   : > { %v402_v62 = vsel %vm357_vm2, %v395_v60, %v401_v58 }
  0x79   : > { %v403_v63 = vsel %vm359_vm3, %v396_v61, %v402_v62 }
  0x7a   : > { %406 = vst.msk [vmem:[#allocation5] sm:$0xf] %vm363_vm4, %v403_v63 }
  0x7b   : > { %v554_v0 = vld [vmem:[#allocation4] sm:$0xf] }
  0x7c   : > { %v557_v1 = vrot.slane %v554_v0, 5 }
  0x7e   : > { %v560_v2 = vsel %vm559_vm5, 0.0, %v557_v1 }
  0x7f   : > { %v562_v3 = vsel %vm561_vm6, %v560_v2, 0.0 }
  0x80   : > { %565 = vrot.lane.b32.xlu0 %v562_v3, %s3221_s27 }
  0x81   : > { %v555_v4 = vld [vmem:[#allocation5] sm:$0xf] }
  0x82   : > { %v578_v5 = vrot.slane %v555_v4, 5 }
  0x84   : > { %v580_v6 = vsel %vm559_vm5, 0.0, %v578_v5 }
  0x85   : > { %v581_v7 = vsel %vm561_vm6, %v580_v6, 0.0 }
  0x86   : > { %583 = vrot.lane.b32.xlu1 %v581_v7, %s3221_s27 }
  0x9f   : > { %479 = vadd.xlane.f32.xlu0 %v2495_v28  ;;  %v431_v28 = vlaneseq }
  0xa1   : > { %v434_v17 = vshrl.u32 %v431_v28, 7 }
  0xa3   : > { %481 = vadd.xlane.f32.xlu0 %v2484_v23 }
  0xa7   : > { %485 = vadd.xlane.f32.xlu0 %v2487_v24 }
  0xaa   : > { %477 = vadd.xlane.f32.xlu1 %v2481_v22 }
  0xab   : > { %407 = vmax.xlane.f32.xlu0 %v2449_v9 }
  0xae   : > { %483 = vadd.xlane.f32.xlu1 %v2498_v30 }
  0xaf   : > { %411 = vmax.xlane.f32.xlu0 %v2452_v10 }
  0xb2   : > { %487 = vadd.xlane.f32.xlu1 %v2501_v31 }
  0xb3   : > { %489 = vadd.xlane.f32.xlu0 %v2492_v27 }
  0xb6   : > { %409 = vmax.xlane.f32.xlu1 %v2455_v11 }
  0xb7   : > { %415 = vmax.xlane.f32.xlu0 %v2458_v13 }
  0xba   : > { %413 = vmax.xlane.f32.xlu1 %v2464_v15 }
  0xbb   : > { %419 = vmax.xlane.f32.xlu0 %v2461_v14 }
  0xbe   : > { %491 = vadd.xlane.f32.xlu1 %v2504_v32  ;;  %v432_v32 = vand.u32 127, %v431_v28 }
  0xc0   : > { %v437_v18 = vadd.s32 4294967288, %v432_v32  ;;  %v435_v25 = vsub.s32 %v432_v32, %v434_v17 }
  0xc2   : > { %417 = vmax.xlane.f32.xlu1 %v2467_v16  ;;  %v440_v29 = vsub.s32 %v437_v18, %v434_v17 }
  0xc6   : > { %421 = vmax.xlane.f32.xlu1 %v2476_v20 }
  0xcc   : > { %v568_v9 = vpop.permute.xlu0 %567 }
  0xcd   : > { %v573_v10 = vsel %vm571_vm7, 0.0, %v568_v9 }
  0xce   : > { %v2564_v11 = vsel %vm574_vm8, %v573_v10, 0.0 }
  0xcf   : > { %590 = vst.msk [vmem:[#allocation8 + $0x8] sm:$0x3] %vm589_vm9, %v2564_v11  ;;  %649 = vst.msk [vmem:[#allocation8 + $0xb0] sm:$0x3] %vm589_vm9, %v2564_v11 }
  0xd1   : > { %604 = vrot.lane.b32.xlu0 %v2564_v11, %s3209_s24 }
  0xd5   : > { %613 = vrot.lane.b32.xlu0 %v2564_v11, %s3218_s29 }
  0xd7   : > { %595 = vrot.lane.b32.xlu1 %v2564_v11, %s3215_s10 }
  0xd9   : > { %622 = vrot.lane.b32.xlu0 %v2564_v11, %s3206_s13 }
  0xdd   : > { %631 = vrot.lane.b32.xlu0 %v2564_v11, %s3212_s9 }
  0xe1   : > { %640 = vrot.lane.b32.xlu0 %v2564_v11, %s3203_s7 }
  0xf2   : > { %v566_v13 = vpop.permute.xlu0 %565 }
  0xf3   : > { %v572_v14 = vsel %vm571_vm7, 0.0, %v566_v13 }
  0xf4   : > { %v575_v15 = vsel %vm574_vm8, %v572_v14, 0.0 }
  0xf5   : > { %588 = vst.msk [vmem:[#allocation8] sm:$0xff] %vm276_vm0, %v575_v15  ;;  %602 = vrot.lane.b32.xlu1 %v575_v15, %s3209_s24  ;;  %593 = vrot.lane.b32.xlu0 %v575_v15, %s3215_s10 }
  0xf8   : > { %v584_v16 = vpop.permute.xlu1 %583 }
  0xf9   : > { %611 = vrot.lane.b32.xlu1 %v575_v15, %s3218_s29  ;;  %v586_v20 = vsel %vm571_vm7, 0.0, %v584_v16 }
  0xfa   : > { %v587_v22 = vsel %vm574_vm8, %v586_v20, 0.0 }
  0xfb   : > { %648 = vst.msk [vmem:[#allocation8 + $0xa8] sm:$0xff] %vm276_vm0, %v587_v22  ;;  %657 = vrot.lane.b32.xlu0 %v587_v22, %s3209_s24 }
  0xfd   : > { %620 = vrot.lane.b32.xlu1 %v575_v15, %s3206_s13 }
  0xff   : > { %669 = vrot.lane.b32.xlu0 %v587_v22, %s3206_s13 }
 0x101   : > { %629 = vrot.lane.b32.xlu1 %v575_v15, %s3212_s9 }
 0x103   : > { %681 = vrot.lane.b32.xlu0 %v587_v22, %s3203_s7 }
 0x105   : > { %638 = vrot.lane.b32.xlu1 %v575_v15, %s3203_s7 }
 0x109   : > { %651 = vrot.lane.b32.xlu1 %v587_v22, %s3215_s10 }
 0x10d   : > { %663 = vrot.lane.b32.xlu1 %v587_v22, %s3218_s29 }
 0x111   : > { %675 = vrot.lane.b32.xlu1 %v587_v22, %s3212_s9 }
 0x12c   : > { %v480_v23 = vpop.xlane.xlu0 %479 }
 0x12d   : > { %v494_v33 = vmul.f32 0.0625, %v480_v23 }
 0x12f   : > { %v516_v39 = vrot.slane %v494_v33, %v440_v29 }
 0x130   : > { %v482_v24 = vpop.xlane.xlu0 %481 }
 0x131   : > { %v495_v35 = vmul.f32 0.0625, %v482_v24 }
 0x133   : > { %v521_v43 = vrot.slane %v495_v35, %v435_v25 }
 0x134   : > { %v486_v27 = vpop.xlane.xlu0 %485 }
 0x135   : > { %v497_v41 = vmul.f32 0.0625, %v486_v27 }
 0x137   : > { %v478_v30 = vpop.xlane.xlu1 %477  ;;  %v530_v49 = vrot.slane %v497_v41, %v435_v25 }
 0x138   : > { %v408_v31 = vpop.xlane.xlu0 %407  ;;  %v493_v26 = vmul.f32 0.0625, %v478_v30 }
 0x139   : > { %v436_v50 = vrot.slane %v408_v31, %v435_v25 }
 0x13a   : > { %v512_v38 = vrot.slane %v493_v26, %v435_v25 }
 0x13b   : > { %v484_v8 = vpop.xlane.xlu1 %483 }
 0x13c   : > { %v412_v12 = vpop.xlane.xlu0 %411  ;;  %v496_v34 = vmul.f32 0.0625, %v484_v8  ;;  %v517_v47 = vsel %vm442_vm10, %v516_v39, %v512_v38 }
 0x13d   : > { %v447_v54 = vrot.slane %v412_v12, %v435_v25 }
 0x13e   : > { %v525_v42 = vrot.slane %v496_v34, %v440_v29 }
 0x13f   : > { %v488_v19 = vpop.xlane.xlu1 %487 }
 0x140   : > { %v490_v21 = vpop.xlane.xlu0 %489  ;;  %v498_v40 = vmul.f32 0.0625, %v488_v19  ;;  %v526_v51 = vsel %vm442_vm10, %v525_v42, %v521_v43 }
 0x141   : > { %v499_v46 = vmul.f32 0.0625, %v490_v21  ;;  %v545_v59 = vsel %vm355_vm1, %v526_v51, %v517_v47 }
 0x142   : > { %v534_v48 = vrot.slane %v498_v40, %v440_v29 }
 0x143   : > { %v410_v36 = vpop.xlane.xlu1 %409  ;;  %v539_v58 = vrot.slane %v499_v46, %v435_v25 }
 0x144   : > { %v416_v37 = vpop.xlane.xlu0 %415  ;;  %v441_v52 = vrot.slane %v410_v36, %v440_v29  ;;  %v535_v60 = vsel %vm442_vm10, %v534_v48, %v530_v49 }
 0x145   : > { %v456_v0 = vrot.slane %v416_v37, %v435_v25  ;;  %v546_v3 = vsel %vm357_vm2, %v535_v60, %v545_v59 }
 0x146   : > { %v443_v61 = vsel %vm442_vm10, %v441_v52, %v436_v50 }
 0x147   : > { %v414_v44 = vpop.xlane.xlu1 %413 }
 0x148   : > { %v420_v45 = vpop.xlane.xlu0 %419  ;;  %v451_v53 = vrot.slane %v414_v44, %v440_v29 }
 0x149   : > { %v465_v10 = vrot.slane %v420_v45, %v435_v25 }
 0x14a   : > { %v452_v62 = vsel %vm442_vm10, %v451_v53, %v447_v54 }
 0x14b   : > { %v492_v55 = vpop.xlane.xlu1 %491  ;;  %v471_v6 = vsel %vm355_vm1, %v452_v62, %v443_v61 }
 0x14c   : > { %v2604_v56 = vpop.permute.xlu0 %604  ;;  %v500_v57 = vmul.f32 0.0625, %v492_v55 }
 0x14d   : > { %610 = vst.msk [vmem:[#allocation8 + $0x38] sm:$0x3] %vm589_vm9, %v2604_v56  ;;  %662 = vst.msk [vmem:[#allocation8 + $0xe0] sm:$0x3] %vm589_vm9, %v2604_v56 }
 0x14e   : > { %v543_v63 = vrot.slane %v500_v57, %v440_v29 }
 0x14f   : > { %v418_v1 = vpop.xlane.xlu1 %417 }
 0x150   : > { %v2614_v2 = vpop.permute.xlu0 %613  ;;  %v544_v4 = vsel %vm442_vm10, %v543_v63, %v539_v58  ;;  %v460_v5 = vrot.slane %v418_v1, %v440_v29 }
 0x151   : > { %619 = vst.msk [vmem:[#allocation8 + $0x50] sm:$0x3] %vm589_vm9, %v2614_v2  ;;  %668 = vst.msk [vmem:[#allocation8 + $0xf8] sm:$0x3] %vm589_vm9, %v2614_v2  ;;  %v547_v7 = vsel %vm359_vm3, %v544_v4, %v546_v3 }
 0x152   : > { %550 = vst.msk [vmem:[#allocation7] sm:$0xf] %vm363_vm4, %v547_v7  ;;  %v461_v9 = vsel %vm442_vm10, %v460_v5, %v456_v0 }
 0x153   : > { %v422_v13 = vpop.xlane.xlu1 %421  ;;  %v472_v15 = vsel %vm357_vm2, %v461_v9, %v471_v6 }
 0x154   : > { %v2626_v14 = vpop.permute.xlu0 %622  ;;  %v469_v16 = vrot.slane %v422_v13, %v440_v29  ;;  %v2678_v29 = vmov 0.0  }
 0x155   : > { %628 = vst.msk [vmem:[#allocation8 + $0x68] sm:$0x3] %vm589_vm9, %v2626_v14  ;;  %674 = vst.msk [vmem:[#allocation8 + $0x110] sm:$0x3] %vm589_vm9, %v2626_v14 }
 0x156   : > { %v470_v20 = vsel %vm442_vm10, %v469_v16, %v465_v10 }
 0x157   : > { %v473_v22 = vsel %vm359_vm3, %v470_v20, %v472_v15  ;;  %v2637_v24 = vpop.permute.xlu1 %595 }
 0x158   : > { %v2635_v23 = vpop.permute.xlu0 %631  ;;  %476 = vst.msk [vmem:[#allocation6] sm:$0xf] %vm363_vm4, %v473_v22 }
 0x159   : > { %637 = vst.msk [vmem:[#allocation8 + $0x80] sm:$0x3] %vm589_vm9, %v2635_v23  ;;  %680 = vst.msk [vmem:[#allocation8 + $0x128] sm:$0x3] %vm589_vm9, %v2635_v23 }
 0x15a   : > { %601 = vst.msk [vmem:[#allocation8 + $0x20] sm:$0x3] %vm589_vm9, %v2637_v24  ;;  %656 = vst.msk [vmem:[#allocation8 + $0xc8] sm:$0x3] %vm589_vm9, %v2637_v24 }
 0x15c   : > { %v2648_v27 = vpop.permute.xlu0 %640 }
 0x15d   : > { %646 = vst.msk [vmem:[#allocation8 + $0x98] sm:$0x3] %vm589_vm9, %v2648_v27  ;;  %686 = vst.msk [vmem:[#allocation8 + $0x140] sm:$0x3] %vm589_vm9, %v2648_v27 }
 0x167   : > { %v603_v28 = vpop.permute.xlu1 %602  ;;  %v594_v30 = vpop.permute.xlu0 %593 }
 0x168   : > { %609 = vst.msk [vmem:[#allocation8 + $0x30] sm:$0xff] %vm276_vm0, %v603_v28  ;;  %600 = vst.msk [vmem:[#allocation8 + $0x18] sm:$0xff] %vm276_vm0, %v594_v30 }
 0x16b   : > { %v612_v31 = vpop.permute.xlu1 %611 }
 0x16c   : > { %618 = vst.msk [vmem:[#allocation8 + $0x48] sm:$0xff] %vm276_vm0, %v612_v31 }
 0x16d   : > { %v658_v32 = vpop.permute.xlu0 %657 }
 0x16e   : > { %661 = vst.msk [vmem:[#allocation8 + $0xd8] sm:$0xff] %vm276_vm0, %v658_v32 }
 0x16f   : > { %v621_v8 = vpop.permute.xlu1 %620 }
 0x170   : > { %627 = vst.msk [vmem:[#allocation8 + $0x60] sm:$0xff] %vm276_vm0, %v621_v8 }
 0x171   : > { %v670_v12 = vpop.permute.xlu0 %669 }
 0x172   : > { %673 = vst.msk [vmem:[#allocation8 + $0x108] sm:$0xff] %vm276_vm0, %v670_v12 }
 0x173   : > { %v630_v17 = vpop.permute.xlu1 %629 }
 0x174   : > { %636 = vst.msk [vmem:[#allocation8 + $0x78] sm:$0xff] %vm276_vm0, %v630_v17 }
 0x175   : > { %v682_v18 = vpop.permute.xlu0 %681 }
 0x176   : > { %685 = vst.msk [vmem:[#allocation8 + $0x138] sm:$0xff] %vm276_vm0, %v682_v18 }
 0x177   : > { %v639_v19 = vpop.permute.xlu1 %638 }
 0x178   : > { %645 = vst.msk [vmem:[#allocation8 + $0x90] sm:$0xff] %vm276_vm0, %v639_v19 }
 0x17b   : > { %v652_v21 = vpop.permute.xlu1 %651 }
 0x17c   : > { %655 = vst.msk [vmem:[#allocation8 + $0xc0] sm:$0xff] %vm276_vm0, %v652_v21 }
 0x17f   : > { %v664_v25 = vpop.permute.xlu1 %663 }
 0x180   : > { %667 = vst.msk [vmem:[#allocation8 + $0xf0] sm:$0xff] %vm276_vm0, %v664_v25 }
 0x183   : > { %v676_v26 = vpop.permute.xlu1 %675 }
 0x184   : > { %679 = vst.msk [vmem:[#allocation8 + $0x120] sm:$0xff] %vm276_vm0, %v676_v26 }
 0x185 LB: >> { %s2687_s12 = smul.u32 7, %s2209_s30  ;;  %s2696_s1 = scalar_lea.vmem [#allocation8], %s2209_s30  ;;  %s2209_s30 = sphi %s2680_s30, %s692_s30   ;;  %v2205_v29 = vphi %v2678_v29, %v3245_v29  }
 0x186   : >> { %s692_s30 = sadd.s32 1, %s2209_s30  }
 0x187   : >> { %s695_s8 = sadd.s32 98, %s2687_s12  ;;  %s702_s22 = sadd.s32 99, %s2687_s12 }
 0x188   : >> { %s696_s7 = sld [smem:[#allocation13 + %s695_s8]]  ;;  %s710_s24 = sadd.s32 100, %s2687_s12 }
 0x189   : >> { %s703_s13 = sld [smem:[#allocation13 + %s702_s22]]  ;;  %s718_s9 = sadd.s32 101, %s2687_s12 }
 0x18a   : >> { %s711_s10 = sld [smem:[#allocation13 + %s710_s24]]  ;;  %s726_s27 = sadd.s32 102, %s2687_s12 }
 0x18b   : >> { %s719_s29 = sld [smem:[#allocation13 + %s718_s9]]  ;;  %s734_s0 = sadd.s32 103, %s2687_s12  ;;  %v698_v33 = vld [vmem:[%s2696_s1] sm:$0xf]  ;;  %v1758_v34 = vld [vmem:[%s2696_s1 + $0x18] sm:$0xf] }
 0x18c   : >> { %s727_s5 = sld [smem:[#allocation13 + %s726_s27]]  ;;  %s742_s8 = sadd.s32 104, %s2687_s12  ;;  %v1759_v37 = vld [vmem:[%s2696_s1 + $0x30] sm:$0xf]  ;;  %v1760_v41 = vld [vmem:[%s2696_s1 + $0x48] sm:$0xf] }
 0x18d   : >> { %s2700_s19 = sld [smem:[#allocation13 + %s734_s0]]  ;;  %s750_s22 = sadd.s32 147, %s2687_s12  ;;  %v1761_v45 = vld [vmem:[%s2696_s1 + $0x60] sm:$0xf]  ;;  %v1762_v49 = vld [vmem:[%s2696_s1 + $0x78] sm:$0xf] }
 0x18e   : >> { %v699_v35 = vstv %s696_s7  ;;  %s2705_s24 = sld [smem:[#allocation13 + %s742_s8]]  ;;  %s758_s9 = sadd.s32 148, %s2687_s12  ;;  %v1763_v53 = vld [vmem:[%s2696_s1 + $0x90] sm:$0xf]  ;;  %v1764_v58 = vld [vmem:[%s2696_s1 + $0xa8] sm:$0xf] }
 0x18f   : >> { %v707_v36 = vstv %s703_s13  ;;  %v700_v38 = vmul.f32 %v699_v35, %v698_v33  ;;  %s2709_s0 = sld [smem:[#allocation13 + %s750_s22]]  ;;  %s766_s27 = sadd.s32 149, %s2687_s12  ;;  %v1765_v62 = vld [vmem:[%s2696_s1 + $0xc0] sm:$0xf]  ;;  %v1766_v3 = vld [vmem:[%s2696_s1 + $0xd8] sm:$0xf] }
 0x190   : >> { %v708_v39 = vmul.f32 %v1758_v34, %v707_v36  ;;  %v715_v40 = vstv %s711_s10  ;;  %s2713_s13 = sld [smem:[#allocation13 + %s758_s9]]  ;;  %s774_s10 = sadd.s32 150, %s2687_s12  ;;  %v1767_v7 = vld [vmem:[%s2696_s1 + $0xf0] sm:$0xf]  ;;  %v1768_v15 = vld [vmem:[%s2696_s1 + $0x108] sm:$0xf] }
 0x191   : >> { %v723_v42 = vstv %s719_s29  ;;  %v701_v43 = vadd.f32 %v2205_v29, %v700_v38  ;;  %v716_v44 = vmul.f32 %v1759_v37, %v715_v40  ;;  %s767_s29 = sld [smem:[#allocation13 + %s766_s27]]  ;;  %s782_s7 = sadd.s32 151, %s2687_s12  ;;  %v1769_v28 = vld [vmem:[%s2696_s1 + $0x120] sm:$0xf]  ;;  %v1770_v8 = vld [vmem:[%s2696_s1 + $0x138] sm:$0xf] }
 0x192   : >> { %v731_v46 = vstv %s727_s5  ;;  %v724_v48 = vmul.f32 %v1760_v41, %v723_v42  ;;  %s775_s5 = sld [smem:[#allocation13 + %s774_s10]]  ;;  %s790_s8 = sadd.s32 152, %s2687_s12 }
 0x193   : >> { %v709_v47 = vadd.f32 %v708_v39, %v701_v43  ;;  %v739_v50 = vstv %s2700_s19  ;;  %v732_v52 = vmul.f32 %v1761_v45, %v731_v46  ;;  %s783_s22 = sld [smem:[#allocation13 + %s782_s7]]  ;;  %s798_s19 = sadd.s32 153, %s2687_s12 }
 0x194   : >> { %v747_v54 = vstv %s2705_s24  ;;  %v740_v57 = vmul.f32 %v1762_v49, %v739_v50  ;;  %s791_s9 = sld [smem:[#allocation13 + %s790_s8]]  ;;  %p689_p13 = scmp.ge.s32.totalorder %s692_s30, 7  }
 0x195   : >> { %v717_v51 = vadd.f32 %v716_v44, %v709_v47  ;;  %v755_v59 = vstv %s2709_s0  ;;  %v748_v61 = vmul.f32 %v1763_v53, %v747_v54  ;;  %s799_s24 = sld [smem:[#allocation13 + %s798_s19]]  ;;  %v815_v33 = vld [vmem:[#allocation7] sm:$0xf] (%p689_p13)  ;;  %839 = vst.msk [vmem:[#allocation8 + $0x8] sm:$0x3] (%p689_p13), %vm589_vm9, %v2564_v11  ;;  %s3246_s1 = smov (%p689_p13), 3  }
 0x196   : >> { %v763_v63 = vstv %s2713_s13  ;;  %v756_v1 = vmul.f32 %v1764_v58, %v755_v59  ;;  %845 = vst.msk [vmem:[#allocation8 + $0x20] sm:$0x3] (%p689_p13), %vm589_vm9, %v2637_v24  ;;  %850 = vst.msk [vmem:[#allocation8 + $0x38] sm:$0x3] (%p689_p13), %vm589_vm9, %v2604_v56  ;;  %s1771_s30 = sld [smem:[#allocation13 + $0x127]] (%p689_p13)  ;;  %s3247_s12 = smov (%p689_p13), 125  }
 0x197   : >> { %v725_v55 = vadd.f32 %v724_v48, %v717_v51  ;;  %v771_v4 = vstv %s767_s29  ;;  %v764_v6 = vmul.f32 %v1765_v62, %v763_v63  ;;  %855 = vst.msk [vmem:[#allocation8 + $0x50] sm:$0x3] (%p689_p13), %vm589_vm9, %v2614_v2  ;;  %860 = vst.msk [vmem:[#allocation8 + $0x68] sm:$0x3] (%p689_p13), %vm589_vm9, %v2626_v14  ;;  %s3248_s0 = smov (%p689_p13), 127   ;;  %s3249_s27 = smov (%p689_p13), 123  }
 0x198   : >> { %v779_v9 = vstv %s775_s5  ;;  %v772_v13 = vmul.f32 %v1766_v3, %v771_v4  ;;  %865 = vst.msk [vmem:[#allocation8 + $0x80] sm:$0x3] (%p689_p13), %vm589_vm9, %v2635_v23  ;;  %870 = vst.msk [vmem:[#allocation8 + $0x98] sm:$0x3] (%p689_p13), %vm589_vm9, %v2648_v27  ;;  %s3250_s13 = smov (%p689_p13), 126   ;;  %s3251_s10 = smov (%p689_p13), 124  }
 0x199   : >> { %v733_v60 = vadd.f32 %v732_v52, %v725_v55  ;;  %v787_v16 = vstv %s783_s22  ;;  %v780_v22 = vmul.f32 %v1767_v7, %v779_v9  ;;  %872 = vst.msk [vmem:[#allocation8 + $0xb0] sm:$0x3] (%p689_p13), %vm589_vm9, %v2564_v11  ;;  %878 = vst.msk [vmem:[#allocation8 + $0xc8] sm:$0x3] (%p689_p13), %vm589_vm9, %v2637_v24  ;;  %v828_v11 = vrot.slane (%p689_p13), %v815_v33, 5  ;;  %s3252_s29 = smov (%p689_p13), 122  }
 0x19a   : >> { %v795_v30 = vstv %s791_s9  ;;  %v788_v32 = vmul.f32 %v1768_v15, %v787_v16  ;;  %883 = vst.msk [vmem:[#allocation8 + $0xe0] sm:$0x3] (%p689_p13), %vm589_vm9, %v2604_v56  ;;  %888 = vst.msk [vmem:[#allocation8 + $0xf8] sm:$0x3] (%p689_p13), %vm589_vm9, %v2614_v2  ;;  %v2803_v58 = vmov (%p689_p13), 0.0   ;;  %s2805_s7 = smov (%p689_p13), 0  }
 0x19b   : >> { %v741_v0 = vadd.f32 %v740_v57, %v733_v60  ;;  %v803_v12 = vstv %s799_s24  ;;  %v796_v18 = vmul.f32 %v1769_v28, %v795_v30  ;;  %893 = vst.msk [vmem:[#allocation8 + $0x110] sm:$0x3] (%p689_p13), %vm589_vm9, %v2626_v14  ;;  %898 = vst.msk [vmem:[#allocation8 + $0x128] sm:$0x3] (%p689_p13), %vm589_vm9, %v2635_v23  ;;  %v830_v24 = vsel (%p689_p13), %vm559_vm5, 0.0, %v828_v11 }
 0x19c   : >> { %v804_v21 = vmul.f32 %v1770_v8, %v803_v12  ;;  %903 = vst.msk [vmem:[#allocation8 + $0x140] sm:$0x3] (%p689_p13), %vm589_vm9, %v2648_v27  ;;  %v831_v2 = vsel (%p689_p13), %vm561_vm6, %v830_v24, 0.0  ;;  %v807_v14 = vstv (%p689_p13), %s1771_s30 }
 0x19d   : >> { %v749_v5 = vadd.f32 %v748_v61, %v741_v0 }
 0x19f   : >> { %v757_v10 = vadd.f32 %v756_v1, %v749_v5 }
 0x1a1   : >> { %v765_v20 = vadd.f32 %v764_v6, %v757_v10 }
 0x1a3   : >> { %v773_v31 = vadd.f32 %v772_v13, %v765_v20 }
 0x1a5   : >> { %v781_v17 = vadd.f32 %v780_v22, %v773_v31 }
 0x1a7   : >> { %v789_v19 = vadd.f32 %v788_v32, %v781_v17  ;;  %691 = sbr.rel (!%p689_p13) target bundleno = 389 (0x185), region = 198 }
 0x1a9   : >> { %v797_v25 = vadd.f32 %v796_v18, %v789_v19 }
 0x1ab   : >> { %v805_v26 = vadd.f32 %v804_v21, %v797_v25  }
 0x1ad   : >> { %v3245_v29 = vmov %v805_v26  ;;  %v808_v23 = vadd.f32 (%p689_p13), %v807_v14, %v805_v26 }
 0x1ae   : > { %v814_v29 = vld [vmem:[#allocation6] sm:$0xf] }
 0x1af   : > { %v817_v34 = vrot.slane %v814_v29, 5  ;;  %v809_v36 = vmul.f32 0.5, %v808_v23 }
 0x1b1   : > { %v819_v35 = vsel %vm559_vm5, 0.0, %v817_v34  ;;  %1976 = vtanh.f32 %v809_v36 }
 0x1b2   : > { %v820_v56 = vsel %vm561_vm6, %v819_v35, 0.0 }
 0x1b3   : > { %822 = vrot.lane.b32.xlu0 %v820_v56, %s3246_s1 }
 0x1b7   : > { %833 = vrot.lane.b32.xlu0 %v831_v2, %s3246_s1 }
 0x1bb   : > { %v1977_v42 = vpop.eup %1976 }
 0x1bc   : > { %v811_v43 = vadd.f32 1.0, %v1977_v42 }
 0x1be   : > { %v812_v44 = vmul.f32 0.5, %v811_v43 }
 0x1c0   : > { %813 = vst.msk [vmem:[%s2672_s23] sm:$0xf] %vm363_vm4, %v812_v44 }
 0x225   : > { %v823_v27 = vpop.permute.xlu0 %822 }
 0x226   : > { %v825_v37 = vsel %vm571_vm7, 0.0, %v823_v27 }
 0x227   : > { %v826_v38 = vsel %vm574_vm8, %v825_v37, 0.0 }
 0x228   : > { %838 = vst.msk [vmem:[#allocation8] sm:$0xff] %vm276_vm0, %v826_v38  ;;  %851 = vrot.lane.b32.xlu0 %v826_v38, %s3247_s12  ;;  %841 = vrot.lane.b32.xlu1 %v826_v38, %s3248_s0 }
 0x229   : > { %v834_v39 = vpop.permute.xlu0 %833 }
 0x22a   : > { %v836_v40 = vsel %vm571_vm7, 0.0, %v834_v39 }
 0x22b   : > { %v837_v41 = vsel %vm574_vm8, %v836_v40, 0.0 }
 0x22c   : > { %861 = vrot.lane.b32.xlu0 %v826_v38, %s3249_s27  ;;  %846 = vrot.lane.b32.xlu1 %v826_v38, %s3250_s13  ;;  %871 = vst.msk [vmem:[#allocation8 + $0xa8] sm:$0xff] %vm276_vm0, %v837_v41 }
 0x230   : > { %856 = vrot.lane.b32.xlu1 %v826_v38, %s3251_s10  ;;  %874 = vrot.lane.b32.xlu0 %v837_v41, %s3248_s0 }
 0x234   : > { %866 = vrot.lane.b32.xlu1 %v826_v38, %s3252_s29  ;;  %884 = vrot.lane.b32.xlu0 %v837_v41, %s3247_s12 }
 0x238   : > { %879 = vrot.lane.b32.xlu1 %v837_v41, %s3250_s13  ;;  %894 = vrot.lane.b32.xlu0 %v837_v41, %s3249_s27 }
 0x23c   : > { %889 = vrot.lane.b32.xlu1 %v837_v41, %s3251_s10 }
 0x240   : > { %899 = vrot.lane.b32.xlu1 %v837_v41, %s3252_s29 }
 0x29a   : > { %v842_v45 = vpop.permute.xlu1 %841  ;;  %v852_v46 = vpop.permute.xlu0 %851 }
 0x29b   : > { %844 = vst.msk [vmem:[#allocation8 + $0x18] sm:$0xff] %vm276_vm0, %v842_v45  ;;  %854 = vst.msk [vmem:[#allocation8 + $0x48] sm:$0xff] %vm276_vm0, %v852_v46 }
 0x29e   : > { %v847_v47 = vpop.permute.xlu1 %846  ;;  %v862_v48 = vpop.permute.xlu0 %861 }
 0x29f   : > { %849 = vst.msk [vmem:[#allocation8 + $0x30] sm:$0xff] %vm276_vm0, %v847_v47  ;;  %864 = vst.msk [vmem:[#allocation8 + $0x78] sm:$0xff] %vm276_vm0, %v862_v48 }
 0x2a2   : > { %v857_v49 = vpop.permute.xlu1 %856  ;;  %v875_v50 = vpop.permute.xlu0 %874 }
 0x2a3   : > { %859 = vst.msk [vmem:[#allocation8 + $0x60] sm:$0xff] %vm276_vm0, %v857_v49  ;;  %877 = vst.msk [vmem:[#allocation8 + $0xc0] sm:$0xff] %vm276_vm0, %v875_v50 }
 0x2a6   : > { %v867_v51 = vpop.permute.xlu1 %866  ;;  %v885_v52 = vpop.permute.xlu0 %884 }
 0x2a7   : > { %869 = vst.msk [vmem:[#allocation8 + $0x90] sm:$0xff] %vm276_vm0, %v867_v51  ;;  %887 = vst.msk [vmem:[#allocation8 + $0xf0] sm:$0xff] %vm276_vm0, %v885_v52 }
 0x2aa   : > { %v880_v53 = vpop.permute.xlu1 %879  ;;  %v895_v54 = vpop.permute.xlu0 %894 }
 0x2ab   : > { %882 = vst.msk [vmem:[#allocation8 + $0xd8] sm:$0xff] %vm276_vm0, %v880_v53  ;;  %897 = vst.msk [vmem:[#allocation8 + $0x120] sm:$0xff] %vm276_vm0, %v895_v54 }
 0x2ae   : > { %v890_v55 = vpop.permute.xlu1 %889 }
 0x2af   : > { %892 = vst.msk [vmem:[#allocation8 + $0x108] sm:$0xff] %vm276_vm0, %v890_v55 }
 0x2b2   : > { %v900_v57 = vpop.permute.xlu1 %899 }
 0x2b3   : > { %902 = vst.msk [vmem:[#allocation8 + $0x138] sm:$0xff] %vm276_vm0, %v900_v57 }
 0x2b4 LB: >> { %s2812_s5 = smul.u32 7, %s2217_s7  ;;  %s2821_s13 = scalar_lea.vmem [#allocation8], %s2217_s7  ;;  %s2217_s7 = sphi %s2805_s7, %s909_s7   ;;  %v2213_v58 = vphi %v2803_v58, %v3254_v58  }
 0x2b5   : >> { %s909_s7 = sadd.s32 1, %s2217_s7  }
 0x2b6   : >> { %s912_s8 = sadd.s32 196, %s2812_s5  ;;  %s919_s22 = sadd.s32 197, %s2812_s5 }
 0x2b7   : >> { %s913_s19 = sld [smem:[#allocation13 + %s912_s8]]  ;;  %s927_s24 = sadd.s32 198, %s2812_s5 }
 0x2b8   : >> { %s920_s9 = sld [smem:[#allocation13 + %s919_s22]]  ;;  %s935_s1 = sadd.s32 199, %s2812_s5 }
 0x2b9   : >> { %s928_s30 = sld [smem:[#allocation13 + %s927_s24]]  ;;  %s943_s0 = sadd.s32 200, %s2812_s5 }
 0x2ba   : >> { %s936_s12 = sld [smem:[#allocation13 + %s935_s1]]  ;;  %s951_s27 = sadd.s32 201, %s2812_s5  ;;  %v915_v59 = vld [vmem:[%s2821_s13] sm:$0xf]  ;;  %v1772_v60 = vld [vmem:[%s2821_s13 + $0x18] sm:$0xf] }
 0x2bb   : >> { %s944_s10 = sld [smem:[#allocation13 + %s943_s0]]  ;;  %s959_s8 = sadd.s32 202, %s2812_s5  ;;  %v1773_v63 = vld [vmem:[%s2821_s13 + $0x30] sm:$0xf]  ;;  %v1774_v4 = vld [vmem:[%s2821_s13 + $0x48] sm:$0xf] }
 0x2bc   : >> { %s2825_s29 = sld [smem:[#allocation13 + %s951_s27]]  ;;  %s967_s22 = sadd.s32 245, %s2812_s5  ;;  %v1775_v9 = vld [vmem:[%s2821_s13 + $0x60] sm:$0xf]  ;;  %v1776_v16 = vld [vmem:[%s2821_s13 + $0x78] sm:$0xf] }
 0x2bd   : >> { %v916_v61 = vstv %s913_s19  ;;  %s2830_s24 = sld [smem:[#allocation13 + %s959_s8]]  ;;  %s975_s1 = sadd.s32 246, %s2812_s5  ;;  %v1777_v30 = vld [vmem:[%s2821_s13 + $0x90] sm:$0xf]  ;;  %v1778_v12 = vld [vmem:[%s2821_s13 + $0xa8] sm:$0xf] }
 0x2be   : >> { %v924_v62 = vstv %s920_s9  ;;  %v917_v0 = vmul.f32 %v916_v61, %v915_v59  ;;  %s2834_s0 = sld [smem:[#allocation13 + %s967_s22]]  ;;  %s983_s19 = sadd.s32 247, %s2812_s5  ;;  %v1779_v21 = vld [vmem:[%s2821_s13 + $0xc0] sm:$0xf]  ;;  %v1780_v33 = vld [vmem:[%s2821_s13 + $0xd8] sm:$0xf] }
 0x2bf   : >> { %v925_v1 = vmul.f32 %v1772_v60, %v924_v62  ;;  %v932_v3 = vstv %s928_s30  ;;  %s2838_s9 = sld [smem:[#allocation13 + %s975_s1]]  ;;  %s991_s30 = sadd.s32 248, %s2812_s5  ;;  %v1781_v24 = vld [vmem:[%s2821_s13 + $0xf0] sm:$0xf]  ;;  %v1782_v23 = vld [vmem:[%s2821_s13 + $0x108] sm:$0xf] }
 0x2c0   : >> { %v940_v5 = vstv %s936_s12  ;;  %v918_v6 = vadd.f32 %v2213_v58, %v917_v0  ;;  %v933_v7 = vmul.f32 %v1773_v63, %v932_v3  ;;  %s984_s12 = sld [smem:[#allocation13 + %s983_s19]]  ;;  %s999_s27 = sadd.s32 249, %s2812_s5  ;;  %v1783_v38 = vld [vmem:[%s2821_s13 + $0x120] sm:$0xf]  ;;  %v1784_v42 = vld [vmem:[%s2821_s13 + $0x138] sm:$0xf] }
 0x2c1   : >> { %v948_v10 = vstv %s944_s10  ;;  %v941_v15 = vmul.f32 %v1774_v4, %v940_v5  ;;  %s992_s10 = sld [smem:[#allocation13 + %s991_s30]]  ;;  %s1007_s8 = sadd.s32 250, %s2812_s5 }
 0x2c2   : >> { %v926_v13 = vadd.f32 %v925_v1, %v918_v6  ;;  %v956_v20 = vstv %s2825_s29  ;;  %v949_v28 = vmul.f32 %v1775_v9, %v948_v10  ;;  %s1000_s22 = sld [smem:[#allocation13 + %s999_s27]]  ;;  %s1015_s29 = sadd.s32 251, %s2812_s5 }
 0x2c3   : >> { %v964_v31 = vstv %s2830_s24  ;;  %v957_v8 = vmul.f32 %v1776_v16, %v956_v20  ;;  %s1008_s1 = sld [smem:[#allocation13 + %s1007_s8]]  ;;  %p906_p4 = scmp.ge.s32.totalorder %s909_s7, 7  }
 0x2c4   : >> { %v934_v22 = vadd.f32 %v933_v7, %v926_v13  ;;  %v972_v17 = vstv %s2834_s0  ;;  %v965_v19 = vmul.f32 %v1777_v30, %v964_v31  ;;  %s1016_s24 = sld [smem:[#allocation13 + %s1015_s29]]  ;;  %v1031_v50 = vld [vmem:[#allocation2] sm:$0xff] (%p906_p4)  ;;  %v1032_v51 = vld [vmem:[#allocation2 + $0x8] sm:$0xff] (%p906_p4)  ;;  %v1033_v52 = vld [vmem:[#allocation3] sm:$0xff] (%p906_p4)  ;;  %s3255_s5 = smov (%p906_p4), 3   ;;  %vm1091_vm11 = vcmask (%p906_p4), 128000  }
 0x2c5   : >> { %v980_v25 = vstv %s2838_s9  ;;  %v973_v29 = vmul.f32 %v1778_v12, %v972_v17  ;;  %v1039_v53 = vrot.slane (%p906_p4), %v1031_v50, 5  ;;  %v1040_v54 = vrot.slane (%p906_p4), %v1032_v51, 5  ;;  %v1034_v57 = vld [vmem:[#allocation3 + $0x8] sm:$0xff] (%p906_p4)  ;;  %s3256_s7 = smov (%p906_p4), 127   ;;  %s3257_s13 = smov (%p906_p4), 126  }
 0x2c6   : >> { %v942_v32 = vadd.f32 %v941_v15, %v934_v22  ;;  %v988_v34 = vstv %s984_s12  ;;  %v981_v35 = vmul.f32 %v1779_v21, %v980_v25  ;;  %v1035_v55 = vmul.f32 (%p906_p4), 0.25, %v1033_v52  ;;  %s3258_s0 = smov (%p906_p4), 125   ;;  %s3259_s19 = smov (%p906_p4), 124  }
 0x2c7   : >> { %v996_v56 = vstv %s992_s10  ;;  %v989_v14 = vmul.f32 %v1780_v33, %v988_v34  ;;  %v1036_v59 = vmul.f32 (%p906_p4), 0.25, %v1034_v57  ;;  %v1044_v60 = vsel (%p906_p4), %vm559_vm5, 0.0, %v1039_v53  ;;  %s3260_s9 = smov (%p906_p4), 123   ;;  %s3261_s30 = smov (%p906_p4), 122  }
 0x2c8   : >> { %v950_v18 = vadd.f32 %v949_v28, %v942_v32  ;;  %v1004_v36 = vstv %s1000_s22  ;;  %v997_v37 = vmul.f32 %v1781_v24, %v996_v56  ;;  %v1065_v61 = vrot.slane (%p906_p4), %v1035_v55, 5  ;;  %1048 = vrot.lane.b32.xlu0 (%p906_p4), %v1044_v60, %s3255_s5  ;;  %s1785_s12 = sld [smem:[#allocation13 + $0x128]] (%p906_p4)  ;;  %s2974_s27 = smov (%p906_p4), 0  }
 0x2c9   : >> { %v1012_v39 = vstv %s1008_s1  ;;  %v1005_v41 = vmul.f32 %v1782_v23, %v1004_v36  ;;  %v1041_v62 = vsel (%p906_p4), %vm559_vm5, %v1039_v53, %v1040_v54  ;;  %v1066_v0 = vrot.slane (%p906_p4), %v1036_v59, 5 }
 0x2ca   : >> { %v958_v26 = vadd.f32 %v957_v8, %v950_v18  ;;  %v1020_v43 = vstv %s1016_s24  ;;  %v1013_v45 = vmul.f32 %v1783_v38, %v1012_v39  ;;  %v1070_v63 = vsel (%p906_p4), %vm559_vm5, 0.0, %v1065_v61 }
 0x2cb   : >> { %v1021_v47 = vmul.f32 %v1784_v42, %v1020_v43  ;;  %v1071_v1 = vsel (%p906_p4), %vm559_vm5, %v1066_v0, 0.0  ;;  %v1067_v3 = vsel (%p906_p4), %vm559_vm5, %v1065_v61, %v1066_v0  ;;  %v2972_v0 = vmov (%p906_p4), 0.0  }
 0x2cc   : >> { %v966_v11 = vadd.f32 %v965_v19, %v958_v26  ;;  %1050 = vrot.lane.b32.xlu0 (%p906_p4), %v1041_v62, %s3255_s5 }
 0x2ce   : >> { %v974_v2 = vadd.f32 %v973_v29, %v966_v11  ;;  %v1024_v18 = vstv (%p906_p4), %s1785_s12 }
 0x2d0   : >> { %v982_v27 = vadd.f32 %v981_v35, %v974_v2  ;;  %1076 = vrot.lane.b32.xlu0 (%p906_p4), %v1067_v3, %s3255_s5 }
 0x2d2   : >> { %v990_v40 = vadd.f32 %v989_v14, %v982_v27 }
 0x2d4   : >> { %v998_v44 = vadd.f32 %v997_v37, %v990_v40 }
 0x2d6   : >> { %v1006_v46 = vadd.f32 %v1005_v41, %v998_v44 }
 0x2d7   : > { %908 = sbr.rel (!%p906_p4) target bundleno = 692 (0x2b4), region = 209 }
 0x2d8   : >> { %v1014_v48 = vadd.f32 %v1013_v45, %v1006_v46 }
 0x2da   : >> { %v2857_v58 = vadd.f32 %v1021_v47, %v1014_v48  }
 0x2dc   : >> { %v3253_v49 = vmov %v2857_v58 }
 0x2dd   : >> { %v3254_v58 = vmov %v3253_v49  ;;  %v1025_v19 = vadd.f32 (%p906_p4), %v1024_v18, %v3253_v49 }
 0x2de   : > { %v1045_v58 = vsel %vm559_vm5, %v1040_v54, 0.0 }
 0x2df   : > { %1052 = vrot.lane.b32.xlu1 %v1045_v58, %s3255_s5  ;;  %v1026_v21 = vmul.f32 0.5, %v1025_v19 }
 0x2e1   : > { %1978 = vtanh.f32 %v1026_v21 }
 0x2e3   : > { %1074 = vrot.lane.b32.xlu1 %v1070_v63, %s3255_s5  ;;  %v2970_v63 = vmov 0.0  }
 0x2e7   : > { %1078 = vrot.lane.b32.xlu1 %v1071_v1, %s3255_s5 }
 0x2eb   : > { %v1979_v25 = vpop.eup %1978 }
 0x2ec   : > { %v1028_v26 = vadd.f32 1.0, %v1979_v25 }
 0x2ee   : > { %v1029_v29 = vmul.f32 0.5, %v1028_v26 }
 0x2f0   : > { %1030 = vst.msk [vmem:[%s2676_s28] sm:$0xf] %vm363_vm4, %v1029_v29 }
 0x33a   : > { %v1049_v4 = vpop.permute.xlu0 %1048 }
 0x33b   : > { %v1057_v6 = vsel %vm571_vm7, 0.0, %v1049_v4 }
 0x33c   : > { %v1060_v9 = vsel %vm574_vm8, %v1057_v6, 0.0 }
 0x33d   : > { %1089 = vst.msk [vmem:[#allocation8] sm:$0xff] %vm276_vm0, %v1060_v9  ;;  %1096 = vrot.lane.b32.xlu0 %v1060_v9, %s3256_s7 }
 0x33e   : > { %v1051_v13 = vpop.permute.xlu0 %1050 }
 0x33f   : > { %v1058_v16 = vsel %vm571_vm7, 0.0, %v1051_v13 }
 0x340   : > { %v1061_v22 = vsel %vm574_vm8, %v1058_v16, 0.0 }
 0x341   : > { %1090 = vst.msk [vmem:[#allocation8 + $0x8] sm:$0xff] %vm276_vm0, %v1061_v22  ;;  %1098 = vrot.lane.b32.xlu1 %v1061_v22, %s3256_s7 }
 0x342   : > { %v1077_v31 = vpop.permute.xlu0 %1076 }
 0x343   : > { %v1084_v8 = vsel %vm571_vm7, 0.0, %v1077_v31 }
 0x344   : > { %v1087_v17 = vsel %vm574_vm8, %v1084_v8, 0.0 }
 0x345   : > { %1108 = vrot.lane.b32.xlu1 %v1060_v9, %s3257_s13  ;;  %1169 = vst.msk [vmem:[#allocation8 + $0xb0] sm:$0xff] %vm276_vm0, %v1087_v17 }
 0x351   : > { %v1053_v5 = vpop.permute.xlu1 %1052 }
 0x352   : > { %v1059_v7 = vsel %vm571_vm7, 0.0, %v1053_v5 }
 0x353   : > { %v1062_v10 = vsel %vm574_vm8, %v1059_v7, 0.0 }
 0x354   : > { %1092 = vst.msk [vmem:[#allocation8 + $0x10] sm:$0x3f] %vm1091_vm11, %v1062_v10  ;;  %1100 = vrot.lane.b32.xlu0 %v1062_v10, %s3256_s7  ;;  %1112 = vrot.lane.b32.xlu1 %v1062_v10, %s3257_s13 }
 0x355   : > { %v1075_v15 = vpop.permute.xlu1 %1074 }
 0x356   : > { %v1083_v20 = vsel %vm571_vm7, 0.0, %v1075_v15 }
 0x357   : > { %v1086_v28 = vsel %vm574_vm8, %v1083_v20, 0.0 }
 0x358   : > { %1168 = vst.msk [vmem:[#allocation8 + $0xa8] sm:$0xff] %vm276_vm0, %v1086_v28  ;;  %1110 = vrot.lane.b32.xlu0 %v1061_v22, %s3257_s13  ;;  %1122 = vrot.lane.b32.xlu1 %v1061_v22, %s3258_s0 }
 0x359   : > { %v1079_v30 = vpop.permute.xlu1 %1078 }
 0x35a   : > { %v1085_v32 = vsel %vm571_vm7, 0.0, %v1079_v30 }
 0x35b   : > { %v1088_v12 = vsel %vm574_vm8, %v1085_v32, 0.0 }
 0x35c   : > { %1170 = vst.msk [vmem:[#allocation8 + $0xb8] sm:$0x3f] %vm1091_vm11, %v1088_v12  ;;  %1120 = vrot.lane.b32.xlu0 %v1060_v9, %s3258_s0  ;;  %1132 = vrot.lane.b32.xlu1 %v1060_v9, %s3259_s19 }
 0x360   : > { %1124 = vrot.lane.b32.xlu0 %v1062_v10, %s3258_s0  ;;  %1136 = vrot.lane.b32.xlu1 %v1062_v10, %s3259_s19 }
 0x364   : > { %1134 = vrot.lane.b32.xlu0 %v1061_v22, %s3259_s19  ;;  %1146 = vrot.lane.b32.xlu1 %v1061_v22, %s3260_s9 }
 0x368   : > { %1144 = vrot.lane.b32.xlu0 %v1060_v9, %s3260_s9  ;;  %1156 = vrot.lane.b32.xlu1 %v1060_v9, %s3261_s30 }
 0x36c   : > { %1148 = vrot.lane.b32.xlu0 %v1062_v10, %s3260_s9  ;;  %1160 = vrot.lane.b32.xlu1 %v1062_v10, %s3261_s30 }
 0x370   : > { %1158 = vrot.lane.b32.xlu0 %v1061_v22, %s3261_s30  ;;  %1176 = vrot.lane.b32.xlu1 %v1087_v17, %s3256_s7 }
 0x374   : > { %1174 = vrot.lane.b32.xlu0 %v1086_v28, %s3256_s7  ;;  %1186 = vrot.lane.b32.xlu1 %v1086_v28, %s3257_s13 }
 0x378   : > { %1178 = vrot.lane.b32.xlu0 %v1088_v12, %s3256_s7  ;;  %1190 = vrot.lane.b32.xlu1 %v1088_v12, %s3257_s13 }
 0x37c   : > { %1188 = vrot.lane.b32.xlu0 %v1087_v17, %s3257_s13  ;;  %1200 = vrot.lane.b32.xlu1 %v1087_v17, %s3258_s0 }
 0x380   : > { %1198 = vrot.lane.b32.xlu0 %v1086_v28, %s3258_s0  ;;  %1210 = vrot.lane.b32.xlu1 %v1086_v28, %s3259_s19 }
 0x384   : > { %1202 = vrot.lane.b32.xlu0 %v1088_v12, %s3258_s0  ;;  %1214 = vrot.lane.b32.xlu1 %v1088_v12, %s3259_s19 }
 0x388   : > { %1212 = vrot.lane.b32.xlu0 %v1087_v17, %s3259_s19  ;;  %1224 = vrot.lane.b32.xlu1 %v1087_v17, %s3260_s9 }
 0x38c   : > { %1222 = vrot.lane.b32.xlu0 %v1086_v28, %s3260_s9  ;;  %1234 = vrot.lane.b32.xlu1 %v1086_v28, %s3261_s30 }
 0x390   : > { %1226 = vrot.lane.b32.xlu0 %v1088_v12, %s3260_s9  ;;  %1238 = vrot.lane.b32.xlu1 %v1088_v12, %s3261_s30 }
 0x394   : > { %1236 = vrot.lane.b32.xlu0 %v1087_v17, %s3261_s30 }
 0x3af   : > { %v1097_v33 = vpop.permute.xlu0 %1096 }
 0x3b0   : > { %1105 = vst.msk [vmem:[#allocation8 + $0x18] sm:$0xff] %vm276_vm0, %v1097_v33 }
 0x3b3   : > { %v1099_v34 = vpop.permute.xlu1 %1098 }
 0x3b4   : > { %1106 = vst.msk [vmem:[#allocation8 + $0x20] sm:$0xff] %vm276_vm0, %v1099_v34 }
 0x3b7   : > { %v1109_v35 = vpop.permute.xlu1 %1108 }
 0x3b8   : > { %1117 = vst.msk [vmem:[#allocation8 + $0x30] sm:$0xff] %vm276_vm0, %v1109_v35 }
 0x3c6   : > { %v1101_v11 = vpop.permute.xlu0 %1100  ;;  %v1113_v56 = vpop.permute.xlu1 %1112 }
 0x3c7   : > { %1107 = vst.msk [vmem:[#allocation8 + $0x28] sm:$0x3f] %vm1091_vm11, %v1101_v11  ;;  %1119 = vst.msk [vmem:[#allocation8 + $0x40] sm:$0x3f] %vm1091_vm11, %v1113_v56 }
 0x3ca   : > { %v1111_v24 = vpop.permute.xlu0 %1110  ;;  %v1123_v14 = vpop.permute.xlu1 %1122 }
 0x3cb   : > { %1118 = vst.msk [vmem:[#allocation8 + $0x38] sm:$0xff] %vm276_vm0, %v1111_v24  ;;  %1130 = vst.msk [vmem:[#allocation8 + $0x50] sm:$0xff] %vm276_vm0, %v1123_v14 }
 0x3ce   : > { %v1121_v2 = vpop.permute.xlu0 %1120  ;;  %v1133_v36 = vpop.permute.xlu1 %1132 }
 0x3cf   : > { %1129 = vst.msk [vmem:[#allocation8 + $0x48] sm:$0xff] %vm276_vm0, %v1121_v2  ;;  %1141 = vst.msk [vmem:[#allocation8 + $0x60] sm:$0xff] %vm276_vm0, %v1133_v36 }
 0x3d2   : > { %v1125_v23 = vpop.permute.xlu0 %1124  ;;  %v1137_v37 = vpop.permute.xlu1 %1136 }
 0x3d3   : > { %1131 = vst.msk [vmem:[#allocation8 + $0x58] sm:$0x3f] %vm1091_vm11, %v1125_v23  ;;  %1143 = vst.msk [vmem:[#allocation8 + $0x70] sm:$0x3f] %vm1091_vm11, %v1137_v37 }
 0x3d6   : > { %v1135_v27 = vpop.permute.xlu0 %1134  ;;  %v1147_v39 = vpop.permute.xlu1 %1146 }
 0x3d7   : > { %1142 = vst.msk [vmem:[#allocation8 + $0x68] sm:$0xff] %vm276_vm0, %v1135_v27  ;;  %1154 = vst.msk [vmem:[#allocation8 + $0x80] sm:$0xff] %vm276_vm0, %v1147_v39 }
 0x3da   : > { %v1145_v38 = vpop.permute.xlu0 %1144  ;;  %v1157_v41 = vpop.permute.xlu1 %1156 }
 0x3db   : > { %1153 = vst.msk [vmem:[#allocation8 + $0x78] sm:$0xff] %vm276_vm0, %v1145_v38  ;;  %1165 = vst.msk [vmem:[#allocation8 + $0x90] sm:$0xff] %vm276_vm0, %v1157_v41 }
 0x3de   : > { %v1149_v40 = vpop.permute.xlu0 %1148  ;;  %v1161_v43 = vpop.permute.xlu1 %1160 }
 0x3df   : > { %1155 = vst.msk [vmem:[#allocation8 + $0x88] sm:$0x3f] %vm1091_vm11, %v1149_v40  ;;  %1167 = vst.msk [vmem:[#allocation8 + $0xa0] sm:$0x3f] %vm1091_vm11, %v1161_v43 }
 0x3e2   : > { %v1159_v42 = vpop.permute.xlu0 %1158  ;;  %v1177_v45 = vpop.permute.xlu1 %1176 }
 0x3e3   : > { %1166 = vst.msk [vmem:[#allocation8 + $0x98] sm:$0xff] %vm276_vm0, %v1159_v42  ;;  %1184 = vst.msk [vmem:[#allocation8 + $0xc8] sm:$0xff] %vm276_vm0, %v1177_v45 }
 0x3e6   : > { %v1175_v44 = vpop.permute.xlu0 %1174  ;;  %v1187_v47 = vpop.permute.xlu1 %1186 }
 0x3e7   : > { %1183 = vst.msk [vmem:[#allocation8 + $0xc0] sm:$0xff] %vm276_vm0, %v1175_v44  ;;  %1195 = vst.msk [vmem:[#allocation8 + $0xd8] sm:$0xff] %vm276_vm0, %v1187_v47 }
 0x3ea   : > { %v1179_v46 = vpop.permute.xlu0 %1178  ;;  %v1191_v49 = vpop.permute.xlu1 %1190 }
 0x3eb   : > { %1185 = vst.msk [vmem:[#allocation8 + $0xd0] sm:$0x3f] %vm1091_vm11, %v1179_v46  ;;  %1197 = vst.msk [vmem:[#allocation8 + $0xe8] sm:$0x3f] %vm1091_vm11, %v1191_v49 }
 0x3ee   : > { %v1189_v48 = vpop.permute.xlu0 %1188  ;;  %v1201_v51 = vpop.permute.xlu1 %1200 }
 0x3ef   : > { %1196 = vst.msk [vmem:[#allocation8 + $0xe0] sm:$0xff] %vm276_vm0, %v1189_v48  ;;  %1208 = vst.msk [vmem:[#allocation8 + $0xf8] sm:$0xff] %vm276_vm0, %v1201_v51 }
 0x3f2   : > { %v1199_v50 = vpop.permute.xlu0 %1198  ;;  %v1211_v53 = vpop.permute.xlu1 %1210 }
 0x3f3   : > { %1207 = vst.msk [vmem:[#allocation8 + $0xf0] sm:$0xff] %vm276_vm0, %v1199_v50  ;;  %1219 = vst.msk [vmem:[#allocation8 + $0x108] sm:$0xff] %vm276_vm0, %v1211_v53 }
 0x3f6   : > { %v1203_v52 = vpop.permute.xlu0 %1202  ;;  %v1215_v55 = vpop.permute.xlu1 %1214 }
 0x3f7   : > { %1209 = vst.msk [vmem:[#allocation8 + $0x100] sm:$0x3f] %vm1091_vm11, %v1203_v52  ;;  %1221 = vst.msk [vmem:[#allocation8 + $0x118] sm:$0x3f] %vm1091_vm11, %v1215_v55 }
 0x3fa   : > { %v1213_v54 = vpop.permute.xlu0 %1212  ;;  %v1225_v59 = vpop.permute.xlu1 %1224 }
 0x3fb   : > { %1220 = vst.msk [vmem:[#allocation8 + $0x110] sm:$0xff] %vm276_vm0, %v1213_v54  ;;  %1232 = vst.msk [vmem:[#allocation8 + $0x128] sm:$0xff] %vm276_vm0, %v1225_v59 }
 0x3fe   : > { %v1223_v57 = vpop.permute.xlu0 %1222  ;;  %v1235_v58 = vpop.permute.xlu1 %1234 }
 0x3ff   : > { %1231 = vst.msk [vmem:[#allocation8 + $0x120] sm:$0xff] %vm276_vm0, %v1223_v57  ;;  %1243 = vst.msk [vmem:[#allocation8 + $0x138] sm:$0xff] %vm276_vm0, %v1235_v58 }
 0x402   : > { %v1227_v60 = vpop.permute.xlu0 %1226  ;;  %v1239_v62 = vpop.permute.xlu1 %1238 }
 0x403   : > { %1233 = vst.msk [vmem:[#allocation8 + $0x130] sm:$0x3f] %vm1091_vm11, %v1227_v60  ;;  %1245 = vst.msk [vmem:[#allocation8 + $0x148] sm:$0x3f] %vm1091_vm11, %v1239_v62 }
 0x406   : > { %v1237_v61 = vpop.permute.xlu0 %1236 }
 0x407   : > { %1244 = vst.msk [vmem:[#allocation8 + $0x140] sm:$0xff] %vm276_vm0, %v1237_v61 }
 0x408 LB: >> { %s2982_s10 = smul.u32 7, %s2229_s27  ;;  %s2994_s0 = scalar_lea.vmem [#allocation8], %s2229_s27  ;;  %s2229_s27 = sphi %s2974_s27, %s1251_s27   ;;  %v2225_v0 = vphi %v2972_v0, %v3263_v0   ;;  %v2221_v63 = vphi %v2970_v63, %v3262_v63  }
 0x409   : >> { %s1251_s27 = sadd.s32 1, %s2229_s27  }
 0x40a   : >> { %s1255_s8 = sld [smem:[#allocation13 + %s2982_s10]]  ;;  %s1264_s22 = sadd.s32 1, %s2982_s10 }
 0x40b   : >> { %s1265_s29 = sld [smem:[#allocation13 + %s1264_s22]]  ;;  %s1275_s1 = sadd.s32 2, %s2982_s10 }
 0x40c   : >> { %s2987_s24 = sld [smem:[#allocation13 + %s1275_s1]]  ;;  %s1286_s5 = sadd.s32 3, %s2982_s10 }
 0x40d   : >> { %s2990_s7 = sld [smem:[#allocation13 + %s1286_s5]]  ;;  %s1297_s13 = sadd.s32 4, %s2982_s10 }
 0x40e   : >> { %v1257_v1 = vld [vmem:[%s2994_s0] sm:$0xff]  ;;  %v1258_v3 = vld [vmem:[%s2994_s0 + $0x8] sm:$0xff]  ;;  %s2998_s19 = sld [smem:[#allocation13 + %s1297_s13]]  ;;  %s1308_s9 = sadd.s32 5, %s2982_s10  ;;  %v1786_v4 = vld [vmem:[%s2994_s0 + $0x18] sm:$0xff] }
 0x40f   : >> { %v1787_v5 = vld [vmem:[%s2994_s0 + $0x20] sm:$0xff]  ;;  %s3003_s30 = sld [smem:[#allocation13 + %s1308_s9]]  ;;  %s1319_s12 = sadd.s32 6, %s2982_s10  ;;  %v1788_v7 = vld [vmem:[%s2994_s0 + $0x30] sm:$0xff]  ;;  %v1789_v9 = vld [vmem:[%s2994_s0 + $0x38] sm:$0xff] }
 0x410   : >> { %v1259_v6 = vstv %s1255_s8  ;;  %s3008_s22 = sld [smem:[#allocation13 + %s1319_s12]]  ;;  %s1330_s1 = sadd.s32 49, %s2982_s10  ;;  %v1790_v28 = vld [vmem:[%s2994_s0 + $0x48] sm:$0xff]  ;;  %v1791_v30 = vld [vmem:[%s2994_s0 + $0x50] sm:$0xff]  ;;  %v1792_v18 = vld [vmem:[%s2994_s0 + $0x60] sm:$0xff] }
 0x411   : >> { %v1260_v10 = vmul.f32 %v1259_v6, %v1257_v1  ;;  %v1261_v13 = vmul.f32 %v1259_v6, %v1258_v3  ;;  %v1270_v15 = vstv %s1265_s29  ;;  %s1341_s5 = sadd.s32 50, %s2982_s10  ;;  %s3015_s8 = sld [smem:[#allocation13 + %s1330_s1]]  ;;  %v1793_v19 = vld [vmem:[%s2994_s0 + $0x68] sm:$0xff]  ;;  %v1794_v34 = vld [vmem:[%s2994_s0 + $0x78] sm:$0xff]  ;;  %v1795_v11 = vld [vmem:[%s2994_s0 + $0x80] sm:$0xff] }
 0x412   : >> { %v1271_v16 = vmul.f32 %v1786_v4, %v1270_v15  ;;  %v1272_v20 = vmul.f32 %v1787_v5, %v1270_v15  ;;  %v1281_v22 = vstv %s2987_s24  ;;  %s1352_s13 = sadd.s32 51, %s2982_s10  ;;  %s3022_s29 = sld [smem:[#allocation13 + %s1341_s5]]  ;;  %v1796_v23 = vld [vmem:[%s2994_s0 + $0x90] sm:$0xff]  ;;  %v1797_v36 = vld [vmem:[%s2994_s0 + $0x98] sm:$0xff]  ;;  %v1798_v41 = vld [vmem:[%s2994_s0 + $0xa8] sm:$0xff] }
 0x413   : >> { %v1262_v31 = vadd.f32 %v2225_v0, %v1260_v10  ;;  %v1263_v32 = vadd.f32 %v2221_v63, %v1261_v13  ;;  %v1282_v8 = vmul.f32 %v1788_v7, %v1281_v22  ;;  %v1283_v12 = vmul.f32 %v1789_v9, %v1281_v22  ;;  %s1363_s24 = sadd.s32 52, %s2982_s10  ;;  %v1799_v42 = vld [vmem:[%s2994_s0 + $0xb0] sm:$0xff]  ;;  %v1800_v48 = vld [vmem:[%s2994_s0 + $0xc0] sm:$0xff]  ;;  %v1801_v49 = vld [vmem:[%s2994_s0 + $0xc8] sm:$0xff]  ;;  %p1248_p5 = scmp.ge.s32.totalorder %s1251_s27, 7  }
 0x414   : >> { %v1292_v17 = vstv %s2990_s7  ;;  %v1303_v21 = vstv %s2998_s19  ;;  %s3028_s7 = sld [smem:[#allocation13 + %s1352_s13]]  ;;  %s1374_s19 = sadd.s32 53, %s2982_s10  ;;  %v1802_v55 = vld [vmem:[%s2994_s0 + $0xd8] sm:$0xff]  ;;  %v1803_v57 = vld [vmem:[%s2994_s0 + $0xe0] sm:$0xff] }
 0x415   : >> { %v1273_v25 = vadd.f32 %v1271_v16, %v1262_v31  ;;  %v1274_v26 = vadd.f32 %v1272_v20, %v1263_v32  ;;  %v1293_v29 = vmul.f32 %v1790_v28, %v1292_v17  ;;  %v1294_v33 = vmul.f32 %v1791_v30, %v1292_v17  ;;  %s3034_s9 = sld [smem:[#allocation13 + %s1363_s24]]  ;;  %v1804_v63 = vld [vmem:[%s2994_s0 + $0xf0] sm:$0xff]  ;;  %v1805_v0 = vld [vmem:[%s2994_s0 + $0xf8] sm:$0xff]  ;;  %v1806_v7 = vld [vmem:[%s2994_s0 + $0x108] sm:$0xff]  ;;  %p3264_p2 = scmp.ne.s32.totalorder (%p1248_p5), %s3230_s25, 0 }
 0x416   : >> { %v1314_v35 = vstv %s3003_s30  ;;  %v1304_v2 = vmul.f32 %v1792_v18, %v1303_v21  ;;  %v1305_v14 = vmul.f32 %v1793_v19, %v1303_v21  ;;  %v1325_v27 = vstv %s3008_s22  ;;  %s1385_s30 = sadd.s32 54, %s2982_s10  ;;  %s3040_s12 = sld [smem:[#allocation13 + %s1374_s19]]  ;;  %v1807_v9 = vld [vmem:[%s2994_s0 + $0x110] sm:$0xff]  ;;  %v1808_v22 = vld [vmem:[%s2994_s0 + $0x120] sm:$0xff] }
 0x417   : >> { %v1284_v24 = vadd.f32 %v1282_v8, %v1273_v25  ;;  %v1285_v56 = vadd.f32 %v1283_v12, %v1274_v26  ;;  %v1315_v39 = vmul.f32 %v1794_v34, %v1314_v35  ;;  %v1316_v40 = vmul.f32 %v1795_v11, %v1314_v35  ;;  %s1396_s22 = sadd.s32 55, %s2982_s10  ;;  %s3046_s1 = sld [smem:[#allocation13 + %s1385_s30]]  ;;  %v1809_v28 = vld [vmem:[%s2994_s0 + $0x128] sm:$0xff]  ;;  %v1810_v17 = vld [vmem:[%s2994_s0 + $0x138] sm:$0xff]  ;;  %v1811_v18 = vld [vmem:[%s2994_s0 + $0x140] sm:$0xff] }
 0x418   : >> { %v1336_v43 = vstv %s3015_s8  ;;  %v1326_v46 = vmul.f32 %v1796_v23, %v1325_v27  ;;  %v1327_v47 = vmul.f32 %v1797_v36, %v1325_v27  ;;  %v1347_v50 = vstv %s3022_s29  ;;  %s3051_s5 = sld [smem:[#allocation13 + %s1396_s22]]  ;;  %s1426_s0 = sand.u32 (%p1248_p5), 1, %s2305_s21  }
 0x419   : >> { %v1295_v37 = vadd.f32 %v1293_v29, %v1284_v24  ;;  %v1296_v38 = vadd.f32 %v1294_v33, %v1285_v56  ;;  %v1337_v53 = vmul.f32 %v1798_v41, %v1336_v43  ;;  %v1338_v54 = vmul.f32 %v1799_v42, %v1336_v43  ;;  %s3072_s10 = sld [smem:[#allocation13 + $0x126]] (%p1248_p5)  ;;  %s1818_s8 = sshll.u32 (%p1248_p5), %s2193_s18, 6 }
 0x41a   : >> { %v1358_v59 = vstv %s3028_s7  ;;  %v1348_v61 = vmul.f32 %v1800_v48, %v1347_v50  ;;  %v1349_v62 = vmul.f32 %v1801_v49, %v1347_v50  ;;  %s3081_s24 = scalar_lea.hbm (%p1248_p5), %s3196_s3, %s1818_s8  ;;  %s1461_s7 = sshll.u32 (%p1248_p5), %s2672_s23, 4  ;;  %s1462_s7 = int_to_ptr.vmem [resolvable:$true] %s1461_s7 }
 0x41b   : >> { %v1306_v44 = vadd.f32 %v1304_v2, %v1295_v37  ;;  %v1307_v45 = vadd.f32 %v1305_v14, %v1296_v38  ;;  %v1369_v1 = vstv %s3034_s9  ;;  %v1359_v5 = vmul.f32 %v1802_v55, %v1358_v59  ;;  %s3084_s19 = scalar_lea.sflag (%p1248_p5), [#allocation16], %s1426_s0  ;;  %s2027_s27 = scalar_lea.vmem (%p1248_p5), %s1462_s7, 64 }
 0x41c   : >> { %v1360_v6 = vmul.f32 %v1803_v57, %v1358_v59  ;;  %v1380_v10 = vstv %s3040_s12  ;;  %v1370_v16 = vmul.f32 %v1804_v63, %v1369_v1  ;;  %v1371_v20 = vmul.f32 %v1805_v0, %v1369_v1  ;;  %p2028_p1 = scmp.ne.s32.totalorder (%p1248_p5), %s1462_s7, %s2027_s27  ;;  %s2244_s9 = smov (%p1248_p5), [#allocation15]  }
 0x41d   : >> { %v1317_v51 = vadd.f32 %v1315_v39, %v1306_v44  ;;  %v1318_v52 = vadd.f32 %v1316_v40, %v1307_v45  ;;  %v1391_v30 = vstv %s3046_s1  ;;  %v1381_v8 = vmul.f32 %v1806_v7, %v1380_v10  ;;  %s2031_s30 = sshll.u32 (%p1248_p5), %s2244_s9, 4  ;;  %s2032_s30 = int_to_ptr.vmem [resolvable:$false] %s2031_s30 }
 0x41e   : >> { %v1382_v12 = vmul.f32 %v1807_v9, %v1380_v10  ;;  %v1402_v19 = vstv %s3051_s5  ;;  %v1392_v26 = vmul.f32 %v1808_v22, %v1391_v30  ;;  %v1393_v29 = vmul.f32 %v1809_v28, %v1391_v30  ;;  %p2029_p9 = pnand (%p1248_p5), %p2028_p1, %p3264_p2  ;;  %s2033_s21 = scalar_lea.vmem (%p1248_p5), %s2032_s30, 128 }
 0x41f   : >> { %v1328_v60 = vadd.f32 %v1326_v46, %v1317_v51  ;;  %v1329_v58 = vadd.f32 %v1327_v47, %v1318_v52  ;;  %v1403_v11 = vmul.f32 %v1810_v17, %v1402_v19  ;;  %v1404_v35 = vmul.f32 %v1811_v18, %v1402_v19  ;;  %p2034_p6 = scmp.lt.s32.totalorder (%p1248_p5), %s1462_s7, %s2032_s30  ;;  %p2035_p3 = scmp.lt.s32.totalorder (%p1248_p5), %s2033_s21, %s2027_s27 }
 0x420   : > { %p2030_p12 = pneg (%p1248_p5), %p2029_p9 }
 0x421   : >> { %v1339_v3 = vadd.f32 %v1337_v53, %v1328_v60  ;;  %v1340_v4 = vadd.f32 %v1338_v54, %v1329_v58  ;;  %p2036_p10 = por (%p1248_p5), %p2035_p3, %p2034_p6 }
 0x423   : >> { %v1350_v13 = vadd.f32 %v1348_v61, %v1339_v3  ;;  %v1351_v15 = vadd.f32 %v1349_v62, %v1340_v4  ;;  %p2037_p11 = pnand (%p1248_p5), %p2036_p10, %p2030_p12 }
 0x425   : >> { %v1361_v31 = vadd.f32 %v1359_v5, %v1350_v13  ;;  %v1362_v32 = vadd.f32 %v1360_v6, %v1351_v15 }
 0x427   : >> { %v1372_v21 = vadd.f32 %v1370_v16, %v1361_v31  ;;  %v1373_v25 = vadd.f32 %v1371_v20, %v1362_v32 }
 0x429   : >> { %v1383_v33 = vadd.f32 %v1381_v8, %v1372_v21  ;;  %v1384_v34 = vadd.f32 %v1382_v12, %v1373_v25  ;;  %1250 = sbr.rel (!%p1248_p5) target bundleno = 1032 (0x408), region = 220 }
 0x42b   : >> { %v1394_v24 = vadd.f32 %v1392_v26, %v1383_v33  ;;  %v1395_v56 = vadd.f32 %v1393_v29, %v1384_v34 }
 0x42d   : >> { %v1405_v2 = vadd.f32 %v1403_v11, %v1394_v24   ;;  %v1406_v14 = vadd.f32 %v1404_v35, %v1395_v56  }
 0x42f   : >> { %v3262_v63 = vmov %v1406_v14  ;;  %v3263_v0 = vmov %v1405_v2 }
 0x430   : > { %2040 = shalt.err (!%p2037_p11)
}
 0x431   : > { %s2041_s23 = scalar_lea.hbm %s3081_s24, 64  ;;  %s2045_s1 = scalar_lea.hbm %s3196_s3, 128 }
 0x432   : > { %p2042_p7 = scmp.ne.s32.totalorder %s3081_s24, %s2041_s23  ;;  %p2046_p13 = scmp.lt.u32.totalorder %s3081_s24, %s3196_s3 }
 0x433   : > { %p2047_p4 = scmp.lt.u32.totalorder %s2045_s1, %s2041_s23  ;;  %p2049_p1 = scmp.lt.u32.totalorder %s2041_s23, %s3081_s24 }
 0x434   : > { %p2043_p8 = pnand %p2042_p7, %p3264_p2 }
 0x435   : > { %p2048_p5 = por %p2047_p4, %p2046_p13 }
 0x436   : > { %p2044_p0 = pneg %p2043_p8 }
 0x437   : > { %p2050_p9 = por %p2049_p1, %p2048_p5 }
 0x439   : > { %p2051_p12 = pnand %p2050_p9, %p2044_p0 }
 0x43b   : > { %2054 = shalt.err (!%p2051_p12)
}
 0x43c   : > { %1831 = dma.vmem_to_hbm [thread:$0]  (%p3264_p2), %s1462_s7, 64, %s3081_s24, %s3084_s19   ;;  %v1408_v23 = vstv %s3072_s10 }
 0x43d   : > { %v1409_v36 = vadd.f32 %v1408_v23, %v1405_v2  ;;  %v1410_v27 = vadd.f32 %v1408_v23, %v1406_v14  ;;  %s3110_s27 = scalar_lea.hbm %s3197_s4, %s1818_s8  ;;  %s1474_s9 = sshll.u32 %s2676_s28, 4  ;;  %s1475_s9 = int_to_ptr.vmem [resolvable:$true] %s1474_s9 }
 0x43e   : > { %s2055_s30 = scalar_lea.vmem %s1475_s9, 64  ;;  %s2245_s21 = smov [#allocation17]  }
 0x43f   : > { %v1411_v37 = vmul.f32 0.5, %v1409_v36  ;;  %v1412_v38 = vmul.f32 0.5, %v1410_v27  ;;  %p2056_p6 = scmp.ne.s32.totalorder %s1475_s9, %s2055_s30  ;;  %s2059_s24 = sshll.u32 %s2245_s21, 4  ;;  %s2060_s24 = int_to_ptr.vmem [resolvable:$false] %s2059_s24 }
 0x440   : > { %s2061_s10 = scalar_lea.vmem %s2060_s24, 128  ;;  %p2062_p11 = scmp.lt.s32.totalorder %s1475_s9, %s2060_s24 }
 0x441   : > { %p2057_p3 = pnand %p2056_p6, %p3264_p2  ;;  %p2063_p7 = scmp.lt.s32.totalorder %s2061_s10, %s2055_s30 }
 0x443   : > { %p2058_p10 = pneg %p2057_p3  ;;  %p2064_p8 = por %p2063_p7, %p2062_p11 }
 0x445   : > { %p2065_p0 = pnand %p2064_p8, %p2058_p10 }
 0x447   : > { %2068 = shalt.err (!%p2065_p0)
}
 0x448   : > { %s2069_s28 = scalar_lea.hbm %s3110_s27, 64  ;;  %s2073_s23 = scalar_lea.hbm %s3197_s4, 128 }
 0x449   : > { %p2070_p13 = scmp.ne.s32.totalorder %s3110_s27, %s2069_s28  ;;  %p2074_p1 = scmp.lt.u32.totalorder %s3110_s27, %s3197_s4 }
 0x44a   : > { %p2075_p9 = scmp.lt.u32.totalorder %s2073_s23, %s2069_s28  ;;  %p2077_p6 = scmp.lt.u32.totalorder %s2069_s28, %s3110_s27 }
 0x44b   : > { %p2071_p4 = pnand %p2070_p13, %p3264_p2 }
 0x44c   : > { %p2076_p12 = por %p2075_p9, %p2074_p1 }
 0x44d   : > { %p2072_p5 = pneg %p2071_p4 }
 0x44e   : > { %p2078_p3 = por %p2077_p6, %p2076_p12 }
 0x450   : > { %p2079_p10 = pnand %p2078_p3, %p2072_p5 }
 0x452   : > { %2082 = shalt.err (!%p2079_p10)
}
 0x453   : > { %1832 = dma.vmem_to_hbm [thread:$0]  (%p3264_p2), %s1475_s9, 64, %s3110_s27, %s3084_s19   ;;  %1980 = vtanh.f32 %v1411_v37 }
 0x454   : > { %1982 = vtanh.f32 %v1412_v38  ;;  %s1823_s1 = sshll.u32 %s2193_s18, 8  ;;  %s1445_s5 = sshll.u32 %s2668_s11, 4  ;;  %s3138_s5 = int_to_ptr.vmem [resolvable:$true] %s1445_s5 }
 0x455   : > { %s3136_s29 = scalar_lea.hbm %s3195_s2, %s1823_s1  ;;  %s1422_s18 = scalar_lea.sflag [#allocation11], %s2431_s6 }
 0x456   : > { %s2083_s19 = scalar_lea.vmem %s3138_s5, 256  ;;  %s2246_s27 = smov [#allocation14]  }
 0x457   : > { %p2084_p11 = scmp.ne.s32.totalorder %s3138_s5, %s2083_s19  ;;  %s2087_s9 = sshll.u32 %s2246_s27, 4  ;;  %s2088_s9 = int_to_ptr.vmem [resolvable:$false] %s2087_s9 }
 0x458   : > { %s2089_s30 = scalar_lea.vmem %s2088_s9, 512  ;;  %p2090_p0 = scmp.lt.s32.totalorder %s3138_s5, %s2088_s9 }
 0x459   : > { %p2085_p7 = pnand %p2084_p11, %p3264_p2  ;;  %p2091_p13 = scmp.lt.s32.totalorder %s2089_s30, %s2083_s19 }
 0x45b   : > { %p2086_p8 = pneg %p2085_p7  ;;  %p2092_p4 = por %p2091_p13, %p2090_p0 }
 0x45d   : > { %v1981_v39 = vpop.eup %1980  ;;  %p2093_p5 = pnand %p2092_p4, %p2086_p8 }
 0x45e   : > { %v1983_v40 = vpop.eup %1982  ;;  %v1415_v41 = vadd.f32 1.0, %v1981_v39 }
 0x45f   : > { %v1416_v42 = vadd.f32 1.0, %v1983_v40 }
 0x460   : > { %v1417_v43 = vmul.f32 0.5, %v1415_v41 }
 0x461   : > { %v1418_v44 = vmul.f32 0.5, %v1416_v42 }
 0x462   : > { %1419 = vst.msk [vmem:[%s2668_s11] sm:$0xff] %vm276_vm0, %v1417_v43 }
 0x463   : > { %1420 = vst.msk [vmem:[%s2668_s11 + $0x8] sm:$0xff] %vm276_vm0, %v1418_v44 }
 0x464   : > { %2096 = shalt.err (!%p2093_p5)
}
 0x465   : > { %s2097_s11 = scalar_lea.hbm %s3136_s29, 256  ;;  %s2101_s10 = scalar_lea.hbm %s3195_s2, 512 }
 0x466   : > { %p2098_p1 = scmp.ne.s32.totalorder %s3136_s29, %s2097_s11  ;;  %p2102_p6 = scmp.lt.u32.totalorder %s3136_s29, %s3195_s2 }
 0x467   : > { %p2103_p3 = scmp.lt.u32.totalorder %s2101_s10, %s2097_s11  ;;  %p2105_p11 = scmp.lt.u32.totalorder %s2097_s11, %s3136_s29 }
 0x468   : > { %p2099_p9 = pnand %p2098_p1, %p3264_p2 }
 0x469   : > { %p2104_p10 = por %p2103_p3, %p2102_p6 }
 0x46a   : > { %p2100_p12 = pneg %p2099_p9 }
 0x46b   : > { %p2106_p7 = por %p2105_p11, %p2104_p10 }
 0x46d   : > { %p2107_p8 = pnand %p2106_p7, %p2100_p12 }
 0x46f   : > { %2110 = shalt.err (!%p2107_p8)
}
 0x470   : > { %s2247_s7 = smov 128   ;;  %s2248_s23 = smov 8  }
 0x471   : > { %1830 = dma.vmem_to_hbm [thread:$0]  (%p3264_p2), %s3138_s5, 256, %s3136_s29, %s1422_s18, %s2247_s7, %s2247_s7, %s2248_s23  }
 0x472 PF: > { %s1486_s12 = sand.u32 1, %s2181_s15   ;;  %p3265_p0 = scmp.ne.s32.totalorder %s3231_s26, 0 }
 0x473   : > { %p3266_p13 = scmp.ge.s32.totalorder %s2201_s20, 2  ;;  %s1487_s22 = scalar_lea.sflag [#allocation11], %s1486_s12 }
 0x475   : > { %p1845_p4 = pnand %p3266_p13, %p3265_p0 }
 0x477   : > { %2172 = dma.done.wait (!%p1845_p4), %s1487_s22, 256  }
 0x478   : > { %2174 = vsyncadd (!%p1845_p4), %s1487_s22, 4294967040  ;;  %s3267_s1 = sadd.s32 4294967294, %s2201_s20  }
 0x479   : > { %s1495_s0 = sand.u32 1, %s3267_s1  }
 0x47a   : > { %s1496_s13 = scalar_lea.sflag [#allocation16], %s1495_s0 }
 0x47b   : > { %2176 = dma.done.wait (!%p1845_p4), %s1496_s13, 128  }
 0x47c   : > { %2178 = vsyncadd (!%p1845_p4), %s1496_s13, 4294967168  ;;  %s25_s20 = sadd.s32 1, %s2201_s20   ;;  %s3268_s18 = sld [smem:[#allocation22_spill]] }
 0x47d   : > { %p22_p2 = scmp.ge.s32.totalorder %s25_s20, 4   ;;  %s3269_s19 = sld [smem:[#allocation23_spill]] }
 0x47e   : > { %s3270_s15 = smov %s2185_s16  ;;  %s3271_s16 = smov %s2189_s17 }
 0x47f   : > { %s3272_s17 = smov %s2396_s14  ;;  %24 = sbr.rel (!%p22_p2) target bundleno = 12 (0xc), region = 231 }
 0x486   :  { %1510 = vsyncpa [#allocation10], 1 }
 0x487   :  { %1512 = vsyncpa [#allocation10 + $0x1], 1 }
 0x488   :  { %1513 = vsyncpa [#allocation11], 1 }
 0x489   :  { %1515 = vsyncpa [#allocation11 + $0x1], 1 }
 0x48a   :  { %1516 = vsyncpa [#allocation16], 1 }
 0x48b   :  { %1518 = vsyncpa [#allocation16 + $0x1], 1 }
 0x48c   :  { %1519 = vsyncpa [#allocation12], 1 }
 0x48d   :  { %1521 = vsyncpa [#allocation12 + $0x1], 1 }

</bundles_post_ra>
